<compile_context>
chip_gen: v5e
topology: v5e:2x2
jax: 0.10.0
libtpu: 0.0.40
codegen_flags: <defaults>
</compile_context>

<pallas_src>
import functools

import numpy as np

import jax
import jax.numpy as jnp
from jax.experimental import pallas as pl
from jax.experimental.pallas import tpu as pltpu


# ---------------------------------------------------------------------------
# Static index bookkeeping (all shapes fixed: 16x16 input, k=2, s=2 everywhere).
#
# Per-sample row/column layouts (t = 2*kh + kw is a 2x2 tap index, m3 = 2*h3 + w3
# indexes the 2x2 latent grid):
#   patches / L1 in : row = 4*t3 + m3,              col = 4*t2 + k0        (16 x 16)
#   act1  (L1 out)  : row = (t3, sample, m3),       col = 128*t2 + c1      (16B x 512)
#   act2  (L2 out)  : row = (sample, m3),           col = 256*t3 + c2      (4B x 1024)
#   a1    (L3 out)  : row = (sample, m3),           col = c3               (4B x 512)
#   actd1 (d1 out)  : row = (t1, sample, m3),       col = c                (16B x 256)
#   actd2 (d2 out)  : row = (t2, t1, sample, m3),   col = c                (64B x 128)
#   rec   (d3 out)  : row = (t2, t1, sample, m3),   col = t3 (cols 0..3)   (64B x 128)
# ---------------------------------------------------------------------------
def _build_patch_indices():
    """(16, 16) flat indices into the zero-padded 20x20 image (per sample)."""
    idx = np.zeros((16, 16), dtype=np.int32)
    for t3 in range(4):
        kh3, kw3 = divmod(t3, 2)
        for m3 in range(4):
            ho3, wo3 = divmod(m3, 2)
            row = 4 * t3 + m3
            for t2 in range(4):
                kh2, kw2 = divmod(t2, 2)
                h1 = 4 * ho3 + 2 * kh3 + kh2          # conv1 output coordinate
                w1 = 4 * wo3 + 2 * kw3 + kw2
                for k0 in range(4):
                    kh0, kw0 = divmod(k0, 2)
                    idx[row, 4 * t2 + k0] = (2 * h1 + kh0) * 20 + (2 * w1 + kw0)
    return idx


def _build_output_indices():
    """(144,) flat indices into the per-sample (t2, t1, m3, 128) rec block -> 12x12."""
    idx = np.zeros((144,), dtype=np.int32)
    for i in range(12):
        for j in range(12):
            p, q = i + 2, j + 2                        # padding=2 crop of the 16x16 grid
            m3 = 2 * (p >> 3) + (q >> 3)
            t1 = 2 * ((p >> 2) & 1) + ((q >> 2) & 1)
            t2 = 2 * ((p >> 1) & 1) + ((q >> 1) & 1)
            t3 = 2 * (p & 1) + (q & 1)
            idx[i * 12 + j] = ((t2 * 4 + t1) * 4 + m3) * 128 + t3
    return idx


_PATCH_IDX = _build_patch_indices()
_OUT_IDX = _build_output_indices()


# ---------------------------------------------------------------------------
# The fused kernel: whole 6-layer forward for B samples per grid step.
# ---------------------------------------------------------------------------
def _cae_kernel(patches_ref, w1, b1, w2, b2, w3, b3,
                dw1, db1, dw2, db2, dw3, db3,
                a1_ref, rec_ref,
                act2, actd1, actd2, *, bb):
    f32 = jnp.float32
    bf16 = jnp.bfloat16

    # -- encoder L1: Conv2d(1,128,k2,s2,p2) as ONE block-diagonal GEMM (K=16, N=512).
    h1 = jnp.dot(patches_ref[...], w1[...], preferred_element_type=f32)     # (16B, 512)
    x1 = jnp.maximum(h1 + b1[...], 0.0).astype(bf16)

    # -- encoder L2: Conv2d(128,256,k2,s2) as ONE K=512 GEMM; scatter t3 row blocks
    #    into the column blocks of act2 (K-concatenation for L3).
    h2 = jnp.maximum(jnp.dot(x1, w2[...], preferred_element_type=f32) + b2[...], 0.0)
    for t in range(4):                                                      # (16B, 256)
        act2[:, pl.ds(256 * t, 256)] = h2[4 * bb * t:4 * bb * (t + 1), :].astype(bf16)

    # -- encoder L3: Conv2d(256,512,k2,s2) as ONE K=1024 GEMM -> a1 (only real rows).
    y3 = jnp.maximum(
        jnp.dot(act2[...], w3[...], preferred_element_type=f32) + b3[...], 0.0)
    a1_ref[...] = y3                                                        # (4B, 512)

    # -- decoder d1: ConvTranspose2d(512,256,k2,s2) as ONE N=1024 GEMM; column tap
    #    blocks -> row blocks of actd1.
    hd1 = jnp.maximum(
        jnp.dot(y3.astype(bf16), dw1[...], preferred_element_type=f32) + db1[...], 0.0)
    for t in range(4):                                                      # (4B, 1024)
        actd1[pl.ds(4 * bb * t, 4 * bb), :] = hd1[:, 256 * t:256 * (t + 1)].astype(bf16)

    # -- decoder d2: ConvTranspose2d(256,128,k2,s2) as ONE N=512 GEMM.
    hd2 = jnp.maximum(
        jnp.dot(actd1[...], dw2[...], preferred_element_type=f32) + db2[...], 0.0)
    for t in range(4):                                                      # (16B, 512)
        actd2[pl.ds(16 * bb * t, 16 * bb), :] = hd2[:, 128 * t:128 * (t + 1)].astype(bf16)

    # -- decoder d3: ConvTranspose2d(128,1,k2,s2,p2)+ReLU; the 4 taps are packed into
    #    output columns 0..3 of a single (128,128) weight (cols 4..127 are exact zeros).
    hd3 = jnp.dot(actd2[...], dw3[...], preferred_element_type=f32)
    rec_ref[...] = jnp.maximum(hd3 + db3[...], 0.0)                         # (64B, 128)


def _make_fused_call(num_blocks, bb):
    def const_spec(shape):
        return pl.BlockSpec(shape, lambda g, _s=shape: (0,) * len(_s))

    in_specs = [
        pl.BlockSpec((16 * bb, 16), lambda g: (g, 0)),        # layer-1 patches
        const_spec((16, 512)), const_spec((1, 512)),          # w1 (block-diag), b1
        const_spec((512, 256)), const_spec((1, 256)),         # w2 (K-merged), b2
        const_spec((1024, 512)), const_spec((1, 512)),        # w3 (K-merged), b3
        const_spec((512, 1024)), const_spec((1, 1024)),       # dw1 (N-merged), db1
        const_spec((256, 512)), const_spec((1, 512)),         # dw2 (N-merged), db2
        const_spec((128, 128)), const_spec((1, 128)),         # dw3 (tap-packed), db3
    ]
    out_specs = [
        pl.BlockSpec((4 * bb, 512), lambda g: (g, 0)),        # a1 rows (all real)
        pl.BlockSpec((64 * bb, 128), lambda g: (g, 0)),       # rec rows (cols 0..3 real)
    ]
    out_shape = [
        jax.ShapeDtypeStruct((num_blocks * 4 * bb, 512), jnp.float32),
        jax.ShapeDtypeStruct((num_blocks * 64 * bb, 128), jnp.float32),
    ]
    scratch = [
        pltpu.VMEM((4 * bb, 1024), jnp.bfloat16),   # act2  (L2 out, K-concat for L3)
        pltpu.VMEM((16 * bb, 256), jnp.bfloat16),   # actd1 (d1 out)
        pltpu.VMEM((64 * bb, 128), jnp.bfloat16),   # actd2 (d2 out)
    ]
    return pl.pallas_call(
        functools.partial(_cae_kernel, bb=bb),
        out_shape=out_shape,
        grid_spec=pltpu.PrefetchScalarGridSpec(
            num_scalar_prefetch=0,
            grid=(num_blocks,),
            in_specs=in_specs,
            out_specs=out_specs,
            scratch_shapes=scratch,
        ),
        compiler_params=pltpu.CompilerParams(
            dimension_semantics=("parallel",),      # sample blocks across TCs (v7x)
        ),
    )


# ---------------------------------------------------------------------------
# Parameter init (PyTorch-default-like) and one-time kernel-layout preparation
# ---------------------------------------------------------------------------
def init_params(key):
    def uniform(k, shape, bound):
        return jax.random.uniform(k, shape, jnp.float32, -bound, bound)

    def conv(k, cout, cin, ksz=2):
        bound = 1.0 / (cin * ksz * ksz) ** 0.5
        kw, kb = jax.random.split(k)
        return uniform(kw, (cout, cin, ksz, ksz), bound), uniform(kb, (cout,), bound)

    def deconv(k, cin, cout, ksz=2):
        bound = 1.0 / (cin * ksz * ksz) ** 0.5
        kw, kb = jax.random.split(k)
        return uniform(kw, (cin, cout, ksz, ksz), bound), uniform(kb, (cout,), bound)

    keys = jax.random.split(key, 6)
    p = {}
    p["c1_w"], p["c1_b"] = conv(keys[0], 128, 1)
    p["c2_w"], p["c2_b"] = conv(keys[1], 256, 128)
    p["c3_w"], p["c3_b"] = conv(keys[2], 512, 256)
    p["d1_w"], p["d1_b"] = deconv(keys[3], 512, 256)
    p["d2_w"], p["d2_b"] = deconv(keys[4], 256, 128)
    p["d3_w"], p["d3_b"] = deconv(keys[5], 128, 1)
    return p


def prepare_params(params, compute_dtype=jnp.bfloat16):
    """One-time reshape/pad of weights into merged GEMM layout (done at init)."""
    f32 = jnp.float32

    def conv_taps(w):      # (Cout, Cin, 2, 2) -> (4, Cin, Cout), tap t = 2*kh + kw
        return jnp.stack([w[:, :, kh, kw].T for kh in (0, 1) for kw in (0, 1)], axis=0)

    def deconv_taps(w):    # (Cin, Cout, 2, 2) -> (4, Cin, Cout)
        return jnp.stack([w[:, :, kh, kw] for kh in (0, 1) for kw in (0, 1)], axis=0)

    # L1: block-diagonal (16, 512): rows 4*t2 + k0, cols 128*t2 + cout.
    c1 = params["c1_w"].reshape(128, 4).T.astype(f32)        # (k0, cout)
    w1 = jnp.zeros((16, 512), f32)
    for t2 in range(4):
        w1 = w1.at[4 * t2:4 * (t2 + 1), 128 * t2:128 * (t2 + 1)].set(c1)

    # L2/L3: K-concatenated (4*Cin, Cout).
    w2 = conv_taps(params["c2_w"]).reshape(512, 256)
    w3 = conv_taps(params["c3_w"]).reshape(1024, 512)

    # d1/d2: N-concatenated (Cin, 4*Cout).
    dw1 = jnp.transpose(deconv_taps(params["d1_w"]), (1, 0, 2)).reshape(512, 1024)
    dw2 = jnp.transpose(deconv_taps(params["d2_w"]), (1, 0, 2)).reshape(256, 512)

    # d3: 4 taps packed into output columns 0..3 (the only real output channel).
    dw3 = jnp.zeros((128, 128), f32).at[:, :4].set(params["d3_w"].reshape(128, 4))
    db3 = jnp.zeros((1, 128), f32).at[0, :4].set(params["d3_b"][0].astype(f32))

    cd = compute_dtype
    return {
        "w1": w1.astype(cd),
        "b1": jnp.tile(params["c1_b"].astype(f32), 4).reshape(1, 512),
        "w2": w2.astype(cd),
        "b2": params["c2_b"].reshape(1, 256).astype(f32),
        "w3": w3.astype(cd),
        "b3": params["c3_b"].reshape(1, 512).astype(f32),
        "dw1": dw1.astype(cd),
        "db1": jnp.tile(params["d1_b"].astype(f32), 4).reshape(1, 1024),
        "dw2": dw2.astype(cd),
        "db2": jnp.tile(params["d2_b"].astype(f32), 4).reshape(1, 512),
        "dw3": dw3.astype(cd),
        "db3": db3,
    }


# ---------------------------------------------------------------------------
# StackedAutoEncoder forward (eval mode): returns (a1, reconstruct(a1))
# ---------------------------------------------------------------------------
@functools.partial(jax.jit, static_argnames=("training", "block_b"))
def stacked_autoencoder_forward(prepared, x, training=False, block_b=8):
    n = x.shape[0]
    assert x.shape[1:] == (1, 16, 16), "kernel specialized for (N, 1, 16, 16) inputs"

    # Per-grid-step sample block (kept even so every tile is 8-row aligned).
    bb = min(block_b, n)
    bb = max(2, bb + (bb % 2))
    n_pad = ((n + bb - 1) // bb) * bb
    g = n_pad // bb

    # Layer-1 patch gather (Cin=1): pad to 20x20, gather the 16 (t2,k0) pixels per
    # (t3, m3) row, then rearrange samples into (t3, sample, m3) block row order.
    xp = x[:, 0].astype(jnp.float32)
    if n_pad != n:
        xp = jnp.concatenate([xp, jnp.zeros((n_pad - n, 16, 16), jnp.float32)], axis=0)
    xpad = jnp.pad(xp, ((0, 0), (2, 2), (2, 2)))                            # (Np,20,20)
    patches = xpad.reshape(n_pad, 400)[:, _PATCH_IDX]                       # (Np,16,16)
    patches = patches.reshape(g, bb, 4, 4, 16).transpose(0, 2, 1, 3, 4)
    patches = patches.reshape(g * 16 * bb, 16).astype(jnp.bfloat16)

    a1_rows, rec_rows = _make_fused_call(g, bb)(
        patches,
        prepared["w1"], prepared["b1"], prepared["w2"], prepared["b2"],
        prepared["w3"], prepared["b3"], prepared["dw1"], prepared["db1"],
        prepared["dw2"], prepared["db2"], prepared["dw3"], prepared["db3"])

    # a1 rows are globally ordered 4*sample + m3 (only real rows were written).
    a1 = a1_rows[:4 * n].reshape(n, 2, 2, 512).transpose(0, 3, 1, 2)        # (N,512,2,2)
    if training:
        # TODO(synk): training-mode in-forward MSE loss + SGD step is not reproduced.
        return a1

    # rec rows per block are ordered (t2, t1, sample, m3); column t3 holds the pixel.
    rec = rec_rows.reshape(g, 4, 4, bb, 4, 128).transpose(0, 3, 1, 2, 4, 5)
    rec = rec.reshape(n_pad, 4 * 4 * 4 * 128)[:n]
    rec = rec[:, _OUT_IDX].reshape(n, 1, 12, 12)                            # (N,1,12,12)
    return a1, rec


# ---------------------------------------------------------------------------
# Pure-JAX reference (for a correctness sanity check)
# ---------------------------------------------------------------------------
def _reference_forward(params, x):
    hi = jax.lax.Precision.HIGHEST

    def conv(x, w, b, padding=0):
        if padding:
            x = jnp.pad(x, ((0, 0), (0, 0), (padding, padding), (padding, padding)))
        n, c, h, wd = x.shape
        ho, wo = (h - 2) // 2 + 1, (wd - 2) // 2 + 1
        xx = x[:, :, :2 * ho, :2 * wo].reshape(n, c, ho, 2, wo, 2)
        y = jnp.einsum("nchpwq,ocpq->nohw", xx, w, precision=hi)
        return jnp.maximum(y + b[None, :, None, None], 0.0)

    def deconv(x, w, b, padding=0):
        n, c, h, wd = x.shape
        y = jnp.einsum("nchw,copq->nohpwq", x, w, precision=hi)
        y = y.reshape(n, w.shape[1], 2 * h, 2 * wd)
        y = jnp.maximum(y + b[None, :, None, None], 0.0)
        if padding:
            y = y[:, :, padding:2 * h - padding, padding:2 * wd - padding]
        return y

    h = conv(x, params["c1_w"], params["c1_b"], padding=2)
    h = conv(h, params["c2_w"], params["c2_b"])
    a1 = conv(h, params["c3_w"], params["c3_b"])
    r = deconv(a1, params["d1_w"], params["d1_b"])
    r = deconv(r, params["d2_w"], params["d2_b"])
    r = deconv(r, params["d3_w"], params["d3_b"], padding=2)
    return a1, r


if __name__ == "__main__":
    key = jax.random.PRNGKey(0)
    pkey, xkey, xkey2 = jax.random.split(key, 3)
    params = init_params(pkey)
    prepared = prepare_params(params)                       # one-time weight layout

    # Small demo batch (n=2).
    x = jax.random.normal(xkey, (2, 1, 16, 16), jnp.float32)
    a1, recon = stacked_autoencoder_forward(prepared, x)
    jax.block_until_ready((a1, recon))
    assert a1.shape == (2, 512, 2, 2), a1.shape
    assert recon.shape == (2, 1, 12, 12), recon.shape
    ref_a1, ref_rec = _reference_forward(params, x)
    assert bool(jnp.allclose(a1, ref_a1, rtol=5e-2, atol=5e-2)), "a1 mismatch vs reference"
    assert bool(jnp.allclose(recon, ref_rec, rtol=5e-2, atol=5e-2)), "recon mismatch vs reference"

    # Larger batch exercising the multi-sample-per-step path (B=8, grid=2, padding).
    x2 = jax.random.normal(xkey2, (15, 1, 16, 16), jnp.float32)
    a1b, reconb = stacked_autoencoder_forward(prepared, x2)
    jax.block_until_ready((a1b, reconb))
    ref_a1b, ref_recb = _reference_forward(params, x2)
    assert bool(jnp.allclose(a1b, ref_a1b, rtol=5e-2, atol=5e-2)), "a1 (batched) mismatch"
    assert bool(jnp.allclose(reconb, ref_recb, rtol=5e-2, atol=5e-2)), "recon (batched) mismatch"

    print("KERNEL_OK")
</pallas_src>

<mosaic_0001>
module attributes {stable_mosaic.version = 11 : i64} {
  func.func @_cae_kernel(%arg0: i32, %arg1: memref<32x16xbf16, #tpu.memory_space<vmem>>, %arg2: memref<16x512xbf16, #tpu.memory_space<vmem>>, %arg3: memref<1x512xf32, #tpu.memory_space<vmem>>, %arg4: memref<512x256xbf16, #tpu.memory_space<vmem>>, %arg5: memref<1x256xf32, #tpu.memory_space<vmem>>, %arg6: memref<1024x512xbf16, #tpu.memory_space<vmem>>, %arg7: memref<1x512xf32, #tpu.memory_space<vmem>>, %arg8: memref<512x1024xbf16, #tpu.memory_space<vmem>>, %arg9: memref<1x1024xf32, #tpu.memory_space<vmem>>, %arg10: memref<256x512xbf16, #tpu.memory_space<vmem>>, %arg11: memref<1x512xf32, #tpu.memory_space<vmem>>, %arg12: memref<128x128xbf16, #tpu.memory_space<vmem>>, %arg13: memref<1x128xf32, #tpu.memory_space<vmem>>, %arg14: memref<8x512xf32, #tpu.memory_space<vmem>>, %arg15: memref<128x128xf32, #tpu.memory_space<vmem>>, %arg16: memref<8x1024xbf16, #tpu.memory_space<vmem>>, %arg17: memref<32x256xbf16, #tpu.memory_space<vmem>>, %arg18: memref<128x128xbf16, #tpu.memory_space<vmem>>) attributes {dimension_semantics = [#tpu.dimension_semantics<parallel>], iteration_bounds = array<i64: 1>, scalar_prefetch = 0 : i64, scratch_operands = 3 : i64, tpu.core_type = #tpu.core_type<tc>, window_params = [{transform_indices = @transform_0, window_bounds = array<i64: 32, 16>}, {pipeline_mode = #tpu.pipeline_mode<synchronous>, transform_indices = @transform_1, window_bounds = array<i64: 16, 512>}, {pipeline_mode = #tpu.pipeline_mode<synchronous>, transform_indices = @transform_2, window_bounds = array<i64: 1, 512>}, {pipeline_mode = #tpu.pipeline_mode<synchronous>, transform_indices = @transform_3, window_bounds = array<i64: 512, 256>}, {pipeline_mode = #tpu.pipeline_mode<synchronous>, transform_indices = @transform_4, window_bounds = array<i64: 1, 256>}, {pipeline_mode = #tpu.pipeline_mode<synchronous>, transform_indices = @transform_5, window_bounds = array<i64: 1024, 512>}, {pipeline_mode = #tpu.pipeline_mode<synchronous>, transform_indices = @transform_6, window_bounds = array<i64: 1, 512>}, {pipeline_mode = #tpu.pipeline_mode<synchronous>, transform_indices = @transform_7, window_bounds = array<i64: 512, 1024>}, {pipeline_mode = #tpu.pipeline_mode<synchronous>, transform_indices = @transform_8, window_bounds = array<i64: 1, 1024>}, {pipeline_mode = #tpu.pipeline_mode<synchronous>, transform_indices = @transform_9, window_bounds = array<i64: 256, 512>}, {pipeline_mode = #tpu.pipeline_mode<synchronous>, transform_indices = @transform_10, window_bounds = array<i64: 1, 512>}, {pipeline_mode = #tpu.pipeline_mode<synchronous>, transform_indices = @transform_11, window_bounds = array<i64: 128, 128>}, {pipeline_mode = #tpu.pipeline_mode<synchronous>, transform_indices = @transform_12, window_bounds = array<i64: 1, 128>}, {transform_indices = @transform_13, window_bounds = array<i64: 8, 512>}, {transform_indices = @transform_14, window_bounds = array<i64: 128, 128>}]} {
    %c0 = arith.constant 0 : index
    %c0_0 = arith.constant 0 : index
    %0 = vector.load %arg1[%c0, %c0_0] : memref<32x16xbf16, #tpu.memory_space<vmem>>, vector<32x16xbf16>
    %c0_1 = arith.constant 0 : index
    %c0_2 = arith.constant 0 : index
    %1 = vector.load %arg2[%c0_1, %c0_2] : memref<16x512xbf16, #tpu.memory_space<vmem>>, vector<16x512xbf16>
    %cst = arith.constant dense<0.000000e+00> : vector<32x512xf32>
    %2 = tpu.matmul %0, %1, %cst {dimension_numbers = #tpu.dot_dimension_numbers<[1], [0], [0], [1], [0, 0, 1, 1], [], []>} : vector<32x16xbf16>, vector<16x512xbf16>, vector<32x512xf32> -> vector<32x512xf32>
    %c0_3 = arith.constant 0 : index
    %c0_4 = arith.constant 0 : index
    %3 = vector.load %arg3[%c0_3, %c0_4] : memref<1x512xf32, #tpu.memory_space<vmem>>, vector<1x512xf32>
    %4 = vector.broadcast %3 : vector<1x512xf32> to vector<32x512xf32>
    %5 = arith.addf %2, %4 : vector<32x512xf32>
    %cst_5 = arith.constant 0.000000e+00 : f32
    %6 = vector.broadcast %cst_5 : f32 to vector<32x512xf32>
    %7 = arith.maximumf %5, %6 : vector<32x512xf32>
    %8 = arith.truncf %7 : vector<32x512xf32> to vector<32x512xbf16>
    %c0_6 = arith.constant 0 : index
    %c0_7 = arith.constant 0 : index
    %9 = vector.load %arg4[%c0_6, %c0_7] : memref<512x256xbf16, #tpu.memory_space<vmem>>, vector<512x256xbf16>
    %cst_8 = arith.constant dense<0.000000e+00> : vector<32x256xf32>
    %10 = tpu.matmul %8, %9, %cst_8 {dimension_numbers = #tpu.dot_dimension_numbers<[1], [0], [0], [1], [0, 0, 1, 1], [], []>} : vector<32x512xbf16>, vector<512x256xbf16>, vector<32x256xf32> -> vector<32x256xf32>
    %c0_9 = arith.constant 0 : index
    %c0_10 = arith.constant 0 : index
    %11 = vector.load %arg5[%c0_9, %c0_10] : memref<1x256xf32, #tpu.memory_space<vmem>>, vector<1x256xf32>
    %12 = vector.broadcast %11 : vector<1x256xf32> to vector<32x256xf32>
    %13 = arith.addf %10, %12 : vector<32x256xf32>
    %cst_11 = arith.constant 0.000000e+00 : f32
    %14 = vector.broadcast %cst_11 : f32 to vector<32x256xf32>
    %15 = arith.maximumf %13, %14 : vector<32x256xf32>
    %16 = vector.extract_strided_slice %15 {offsets = [0, 0], sizes = [8, 256], strides = [1, 1]} : vector<32x256xf32> to vector<8x256xf32>
    %17 = arith.truncf %16 : vector<8x256xf32> to vector<8x256xbf16>
    %c0_12 = arith.constant 0 : index
    %c0_13 = arith.constant 0 : index
    %18 = vector.load %arg16[%c0_12, %c0_13] : memref<8x1024xbf16, #tpu.memory_space<vmem>>, vector<8x256xbf16>
    tpu.vector_store %arg16[%c0_12, %c0_13], %17 {strides = array<i32>} : memref<8x1024xbf16, #tpu.memory_space<vmem>>, vector<8x256xbf16>,
    %19 = vector.extract_strided_slice %15 {offsets = [8, 0], sizes = [8, 256], strides = [1, 1]} : vector<32x256xf32> to vector<8x256xf32>
    %20 = arith.truncf %19 : vector<8x256xf32> to vector<8x256xbf16>
    %c0_14 = arith.constant 0 : index
    %c256 = arith.constant 256 : index
    %21 = vector.load %arg16[%c0_14, %c256] : memref<8x1024xbf16, #tpu.memory_space<vmem>>, vector<8x256xbf16>
    tpu.vector_store %arg16[%c0_14, %c256], %20 {strides = array<i32>} : memref<8x1024xbf16, #tpu.memory_space<vmem>>, vector<8x256xbf16>,
    %22 = vector.extract_strided_slice %15 {offsets = [16, 0], sizes = [8, 256], strides = [1, 1]} : vector<32x256xf32> to vector<8x256xf32>
    %23 = arith.truncf %22 : vector<8x256xf32> to vector<8x256xbf16>
    %c0_15 = arith.constant 0 : index
    %c512 = arith.constant 512 : index
    %24 = vector.load %arg16[%c0_15, %c512] : memref<8x1024xbf16, #tpu.memory_space<vmem>>, vector<8x256xbf16>
    tpu.vector_store %arg16[%c0_15, %c512], %23 {strides = array<i32>} : memref<8x1024xbf16, #tpu.memory_space<vmem>>, vector<8x256xbf16>,
    %25 = vector.extract_strided_slice %15 {offsets = [24, 0], sizes = [8, 256], strides = [1, 1]} : vector<32x256xf32> to vector<8x256xf32>
    %26 = arith.truncf %25 : vector<8x256xf32> to vector<8x256xbf16>
    %c0_16 = arith.constant 0 : index
    %c768 = arith.constant 768 : index
    %27 = vector.load %arg16[%c0_16, %c768] : memref<8x1024xbf16, #tpu.memory_space<vmem>>, vector<8x256xbf16>
    tpu.vector_store %arg16[%c0_16, %c768], %26 {strides = array<i32>} : memref<8x1024xbf16, #tpu.memory_space<vmem>>, vector<8x256xbf16>,
    %c0_17 = arith.constant 0 : index
    %c0_18 = arith.constant 0 : index
    %28 = vector.load %arg16[%c0_17, %c0_18] : memref<8x1024xbf16, #tpu.memory_space<vmem>>, vector<8x1024xbf16>
    %c0_19 = arith.constant 0 : index
    %c0_20 = arith.constant 0 : index
    %29 = vector.load %arg6[%c0_19, %c0_20] : memref<1024x512xbf16, #tpu.memory_space<vmem>>, vector<1024x512xbf16>
    %cst_21 = arith.constant dense<0.000000e+00> : vector<8x512xf32>
    %30 = tpu.matmul %28, %29, %cst_21 {dimension_numbers = #tpu.dot_dimension_numbers<[1], [0], [0], [1], [0, 0, 1, 1], [], []>} : vector<8x1024xbf16>, vector<1024x512xbf16>, vector<8x512xf32> -> vector<8x512xf32>
    %c0_22 = arith.constant 0 : index
    %c0_23 = arith.constant 0 : index
    %31 = vector.load %arg7[%c0_22, %c0_23] : memref<1x512xf32, #tpu.memory_space<vmem>>, vector<1x512xf32>
    %32 = vector.broadcast %31 : vector<1x512xf32> to vector<8x512xf32>
    %33 = arith.addf %30, %32 : vector<8x512xf32>
    %cst_24 = arith.constant 0.000000e+00 : f32
    %34 = vector.broadcast %cst_24 : f32 to vector<8x512xf32>
    %35 = arith.maximumf %33, %34 : vector<8x512xf32>
    %c0_25 = arith.constant 0 : index
    %c0_26 = arith.constant 0 : index
    %36 = vector.load %arg14[%c0_25, %c0_26] : memref<8x512xf32, #tpu.memory_space<vmem>>, vector<8x512xf32>
    tpu.vector_store %arg14[%c0_25, %c0_26], %35 {strides = array<i32>} : memref<8x512xf32, #tpu.memory_space<vmem>>, vector<8x512xf32>,
    %37 = arith.truncf %35 : vector<8x512xf32> to vector<8x512xbf16>
    %c0_27 = arith.constant 0 : index
    %c0_28 = arith.constant 0 : index
    %38 = vector.load %arg8[%c0_27, %c0_28] : memref<512x1024xbf16, #tpu.memory_space<vmem>>, vector<512x1024xbf16>
    %cst_29 = arith.constant dense<0.000000e+00> : vector<8x1024xf32>
    %39 = tpu.matmul %37, %38, %cst_29 {dimension_numbers = #tpu.dot_dimension_numbers<[1], [0], [0], [1], [0, 0, 1, 1], [], []>} : vector<8x512xbf16>, vector<512x1024xbf16>, vector<8x1024xf32> -> vector<8x1024xf32>
    %c0_30 = arith.constant 0 : index
    %c0_31 = arith.constant 0 : index
    %40 = vector.load %arg9[%c0_30, %c0_31] : memref<1x1024xf32, #tpu.memory_space<vmem>>, vector<1x1024xf32>
    %41 = vector.broadcast %40 : vector<1x1024xf32> to vector<8x1024xf32>
    %42 = arith.addf %39, %41 : vector<8x1024xf32>
    %cst_32 = arith.constant 0.000000e+00 : f32
    %43 = vector.broadcast %cst_32 : f32 to vector<8x1024xf32>
    %44 = arith.maximumf %42, %43 : vector<8x1024xf32>
    %45 = vector.extract_strided_slice %44 {offsets = [0, 0], sizes = [8, 256], strides = [1, 1]} : vector<8x1024xf32> to vector<8x256xf32>
    %46 = arith.truncf %45 : vector<8x256xf32> to vector<8x256xbf16>
    %c0_33 = arith.constant 0 : index
    %c0_34 = arith.constant 0 : index
    %47 = vector.load %arg17[%c0_33, %c0_34] : memref<32x256xbf16, #tpu.memory_space<vmem>>, vector<8x256xbf16>
    tpu.vector_store %arg17[%c0_33, %c0_34], %46 {strides = array<i32>} : memref<32x256xbf16, #tpu.memory_space<vmem>>, vector<8x256xbf16>,
    %48 = vector.extract_strided_slice %44 {offsets = [0, 256], sizes = [8, 256], strides = [1, 1]} : vector<8x1024xf32> to vector<8x256xf32>
    %49 = arith.truncf %48 : vector<8x256xf32> to vector<8x256xbf16>
    %c8 = arith.constant 8 : index
    %c0_35 = arith.constant 0 : index
    %50 = vector.load %arg17[%c8, %c0_35] : memref<32x256xbf16, #tpu.memory_space<vmem>>, vector<8x256xbf16>
    tpu.vector_store %arg17[%c8, %c0_35], %49 {strides = array<i32>} : memref<32x256xbf16, #tpu.memory_space<vmem>>, vector<8x256xbf16>,
    %51 = vector.extract_strided_slice %44 {offsets = [0, 512], sizes = [8, 256], strides = [1, 1]} : vector<8x1024xf32> to vector<8x256xf32>
    %52 = arith.truncf %51 : vector<8x256xf32> to vector<8x256xbf16>
    %c16 = arith.constant 16 : index
    %c0_36 = arith.constant 0 : index
    %53 = vector.load %arg17[%c16, %c0_36] : memref<32x256xbf16, #tpu.memory_space<vmem>>, vector<8x256xbf16>
    tpu.vector_store %arg17[%c16, %c0_36], %52 {strides = array<i32>} : memref<32x256xbf16, #tpu.memory_space<vmem>>, vector<8x256xbf16>,
    %54 = vector.extract_strided_slice %44 {offsets = [0, 768], sizes = [8, 256], strides = [1, 1]} : vector<8x1024xf32> to vector<8x256xf32>
    %55 = arith.truncf %54 : vector<8x256xf32> to vector<8x256xbf16>
    %c24 = arith.constant 24 : index
    %c0_37 = arith.constant 0 : index
    %56 = vector.load %arg17[%c24, %c0_37] : memref<32x256xbf16, #tpu.memory_space<vmem>>, vector<8x256xbf16>
    tpu.vector_store %arg17[%c24, %c0_37], %55 {strides = array<i32>} : memref<32x256xbf16, #tpu.memory_space<vmem>>, vector<8x256xbf16>,
    %c0_38 = arith.constant 0 : index
    %c0_39 = arith.constant 0 : index
    %57 = vector.load %arg17[%c0_38, %c0_39] : memref<32x256xbf16, #tpu.memory_space<vmem>>, vector<32x256xbf16>
    %c0_40 = arith.constant 0 : index
    %c0_41 = arith.constant 0 : index
    %58 = vector.load %arg10[%c0_40, %c0_41] : memref<256x512xbf16, #tpu.memory_space<vmem>>, vector<256x512xbf16>
    %cst_42 = arith.constant dense<0.000000e+00> : vector<32x512xf32>
    %59 = tpu.matmul %57, %58, %cst_42 {dimension_numbers = #tpu.dot_dimension_numbers<[1], [0], [0], [1], [0, 0, 1, 1], [], []>} : vector<32x256xbf16>, vector<256x512xbf16>, vector<32x512xf32> -> vector<32x512xf32>
    %c0_43 = arith.constant 0 : index
    %c0_44 = arith.constant 0 : index
    %60 = vector.load %arg11[%c0_43, %c0_44] : memref<1x512xf32, #tpu.memory_space<vmem>>, vector<1x512xf32>
    %61 = vector.broadcast %60 : vector<1x512xf32> to vector<32x512xf32>
    %62 = arith.addf %59, %61 : vector<32x512xf32>
    %cst_45 = arith.constant 0.000000e+00 : f32
    %63 = vector.broadcast %cst_45 : f32 to vector<32x512xf32>
    %64 = arith.maximumf %62, %63 : vector<32x512xf32>
    %65 = vector.extract_strided_slice %64 {offsets = [0, 0], sizes = [32, 128], strides = [1, 1]} : vector<32x512xf32> to vector<32x128xf32>
    %66 = arith.truncf %65 : vector<32x128xf32> to vector<32x128xbf16>
    %c0_46 = arith.constant 0 : index
    %c0_47 = arith.constant 0 : index
    %67 = vector.load %arg18[%c0_46, %c0_47] : memref<128x128xbf16, #tpu.memory_space<vmem>>, vector<32x128xbf16>
    tpu.vector_store %arg18[%c0_46, %c0_47], %66 {strides = array<i32>} : memref<128x128xbf16, #tpu.memory_space<vmem>>, vector<32x128xbf16>,
    %68 = vector.extract_strided_slice %64 {offsets = [0, 128], sizes = [32, 128], strides = [1, 1]} : vector<32x512xf32> to vector<32x128xf32>
    %69 = arith.truncf %68 : vector<32x128xf32> to vector<32x128xbf16>
    %c32 = arith.constant 32 : index
    %c0_48 = arith.constant 0 : index
    %70 = vector.load %arg18[%c32, %c0_48] : memref<128x128xbf16, #tpu.memory_space<vmem>>, vector<32x128xbf16>
    tpu.vector_store %arg18[%c32, %c0_48], %69 {strides = array<i32>} : memref<128x128xbf16, #tpu.memory_space<vmem>>, vector<32x128xbf16>,
    %71 = vector.extract_strided_slice %64 {offsets = [0, 256], sizes = [32, 128], strides = [1, 1]} : vector<32x512xf32> to vector<32x128xf32>
    %72 = arith.truncf %71 : vector<32x128xf32> to vector<32x128xbf16>
    %c64 = arith.constant 64 : index
    %c0_49 = arith.constant 0 : index
    %73 = vector.load %arg18[%c64, %c0_49] : memref<128x128xbf16, #tpu.memory_space<vmem>>, vector<32x128xbf16>
    tpu.vector_store %arg18[%c64, %c0_49], %72 {strides = array<i32>} : memref<128x128xbf16, #tpu.memory_space<vmem>>, vector<32x128xbf16>,
    %74 = vector.extract_strided_slice %64 {offsets = [0, 384], sizes = [32, 128], strides = [1, 1]} : vector<32x512xf32> to vector<32x128xf32>
    %75 = arith.truncf %74 : vector<32x128xf32> to vector<32x128xbf16>
    %c96 = arith.constant 96 : index
    %c0_50 = arith.constant 0 : index
    %76 = vector.load %arg18[%c96, %c0_50] : memref<128x128xbf16, #tpu.memory_space<vmem>>, vector<32x128xbf16>
    tpu.vector_store %arg18[%c96, %c0_50], %75 {strides = array<i32>} : memref<128x128xbf16, #tpu.memory_space<vmem>>, vector<32x128xbf16>,
    %c0_51 = arith.constant 0 : index
    %c0_52 = arith.constant 0 : index
    %77 = vector.load %arg18[%c0_51, %c0_52] : memref<128x128xbf16, #tpu.memory_space<vmem>>, vector<128x128xbf16>
    %c0_53 = arith.constant 0 : index
    %c0_54 = arith.constant 0 : index
    %78 = vector.load %arg12[%c0_53, %c0_54] : memref<128x128xbf16, #tpu.memory_space<vmem>>, vector<128x128xbf16>
    %cst_55 = arith.constant dense<0.000000e+00> : vector<128x128xf32>
    %79 = tpu.matmul %77, %78, %cst_55 {dimension_numbers = #tpu.dot_dimension_numbers<[1], [0], [0], [1], [0, 0, 1, 1], [], []>} : vector<128x128xbf16>, vector<128x128xbf16>, vector<128x128xf32> -> vector<128x128xf32>
    %c0_56 = arith.constant 0 : index
    %c0_57 = arith.constant 0 : index
    %80 = vector.load %arg13[%c0_56, %c0_57] : memref<1x128xf32, #tpu.memory_space<vmem>>, vector<1x128xf32>
    %81 = vector.broadcast %80 : vector<1x128xf32> to vector<128x128xf32>
    %82 = arith.addf %79, %81 : vector<128x128xf32>
    %cst_58 = arith.constant 0.000000e+00 : f32
    %83 = vector.broadcast %cst_58 : f32 to vector<128x128xf32>
    %84 = arith.maximumf %82, %83 : vector<128x128xf32>
    %c0_59 = arith.constant 0 : index
    %c0_60 = arith.constant 0 : index
    %85 = vector.load %arg15[%c0_59, %c0_60] : memref<128x128xf32, #tpu.memory_space<vmem>>, vector<128x128xf32>
    tpu.vector_store %arg15[%c0_59, %c0_60], %84 {strides = array<i32>} : memref<128x128xf32, #tpu.memory_space<vmem>>, vector<128x128xf32>,
    return
  }
  func.func @transform_0(%arg0: i32) -> (i32, i32) {
    %c0_i32 = arith.constant 0 : i32
    %c0_i32_0 = arith.constant 0 : i32
    return %arg0, %c0_i32 : i32, i32
  }
  func.func @transform_1(%arg0: i32) -> (i32, i32) {
    %c0_i32 = arith.constant 0 : i32
    %c0_i32_0 = arith.constant 0 : i32
    %c0_i32_1 = arith.constant 0 : i32
    return %c0_i32, %c0_i32_0 : i32, i32
  }
  func.func @transform_2(%arg0: i32) -> (i32, i32) {
    %c0_i32 = arith.constant 0 : i32
    %c0_i32_0 = arith.constant 0 : i32
    %c0_i32_1 = arith.constant 0 : i32
    return %c0_i32, %c0_i32_0 : i32, i32
  }
  func.func @transform_3(%arg0: i32) -> (i32, i32) {
    %c0_i32 = arith.constant 0 : i32
    %c0_i32_0 = arith.constant 0 : i32
    %c0_i32_1 = arith.constant 0 : i32
    return %c0_i32, %c0_i32_0 : i32, i32
  }
  func.func @transform_4(%arg0: i32) -> (i32, i32) {
    %c0_i32 = arith.constant 0 : i32
    %c0_i32_0 = arith.constant 0 : i32
    %c0_i32_1 = arith.constant 0 : i32
    return %c0_i32, %c0_i32_0 : i32, i32
  }
  func.func @transform_5(%arg0: i32) -> (i32, i32) {
    %c0_i32 = arith.constant 0 : i32
    %c0_i32_0 = arith.constant 0 : i32
    %c0_i32_1 = arith.constant 0 : i32
    return %c0_i32, %c0_i32_0 : i32, i32
  }
  func.func @transform_6(%arg0: i32) -> (i32, i32) {
    %c0_i32 = arith.constant 0 : i32
    %c0_i32_0 = arith.constant 0 : i32
    %c0_i32_1 = arith.constant 0 : i32
    return %c0_i32, %c0_i32_0 : i32, i32
  }
  func.func @transform_7(%arg0: i32) -> (i32, i32) {
    %c0_i32 = arith.constant 0 : i32
    %c0_i32_0 = arith.constant 0 : i32
    %c0_i32_1 = arith.constant 0 : i32
    return %c0_i32, %c0_i32_0 : i32, i32
  }
  func.func @transform_8(%arg0: i32) -> (i32, i32) {
    %c0_i32 = arith.constant 0 : i32
    %c0_i32_0 = arith.constant 0 : i32
    %c0_i32_1 = arith.constant 0 : i32
    return %c0_i32, %c0_i32_0 : i32, i32
  }
  func.func @transform_9(%arg0: i32) -> (i32, i32) {
    %c0_i32 = arith.constant 0 : i32
    %c0_i32_0 = arith.constant 0 : i32
    %c0_i32_1 = arith.constant 0 : i32
    return %c0_i32, %c0_i32_0 : i32, i32
  }
  func.func @transform_10(%arg0: i32) -> (i32, i32) {
    %c0_i32 = arith.constant 0 : i32
    %c0_i32_0 = arith.constant 0 : i32
    %c0_i32_1 = arith.constant 0 : i32
    return %c0_i32, %c0_i32_0 : i32, i32
  }
  func.func @transform_11(%arg0: i32) -> (i32, i32) {
    %c0_i32 = arith.constant 0 : i32
    %c0_i32_0 = arith.constant 0 : i32
    %c0_i32_1 = arith.constant 0 : i32
    return %c0_i32, %c0_i32_0 : i32, i32
  }
  func.func @transform_12(%arg0: i32) -> (i32, i32) {
    %c0_i32 = arith.constant 0 : i32
    %c0_i32_0 = arith.constant 0 : i32
    %c0_i32_1 = arith.constant 0 : i32
    return %c0_i32, %c0_i32_0 : i32, i32
  }
  func.func @transform_13(%arg0: i32) -> (i32, i32) {
    %c0_i32 = arith.constant 0 : i32
    %c0_i32_0 = arith.constant 0 : i32
    return %arg0, %c0_i32 : i32, i32
  }
  func.func @transform_14(%arg0: i32) -> (i32, i32) {
    %c0_i32 = arith.constant 0 : i32
    %c0_i32_0 = arith.constant 0 : i32
    return %arg0, %c0_i32 : i32, i32
  }
}

</mosaic_0001>

<bundles_post_ra>
// kernel: stacked_autoencoder_forward.1
= control target key start
LH: loop header
LB: loop body
LE: loop exit
PB: predicated region body
PF: predicated region fallthrough
CT: control target
= control target key end

     0   :  { %20 = vsyncpa [#allocation6], 0  ;;  %s10090_s0 = inlined_call_operand.vmem [shape: bf16[32,16], index: 0, kind: input, shape index: {}]   ;;  %s10091_s1 = inlined_call_operand.hbm [shape: bf16[16,512], index: 1, kind: input, shape index: {}]   ;;  %s10092_s2 = inlined_call_operand.hbm [shape: f32[1,512], index: 2, kind: input, shape index: {}]   ;;  %s10093_s3 = inlined_call_operand.hbm [shape: bf16[512,256], index: 3, kind: input, shape index: {}]   ;;  %s10094_s4 = inlined_call_operand.hbm [shape: f32[1,256], index: 4, kind: input, shape index: {}]   ;;  %s10095_s5 = inlined_call_operand.hbm [shape: bf16[1024,512], index: 5, kind: input, shape index: {}]   ;;  %s10096_s6 = inlined_call_operand.hbm [shape: f32[1,512], index: 6, kind: input, shape index: {}]   ;;  %s10097_s7 = inlined_call_operand.hbm [shape: bf16[512,1024], index: 7, kind: input, shape index: {}]   ;;  %s10098_s8 = inlined_call_operand.hbm [shape: f32[1,1024], index: 8, kind: input, shape index: {}]   ;;  %s10099_s9 = inlined_call_operand.hbm [shape: bf16[256,512], index: 9, kind: input, shape index: {}]   ;;  %s10100_s10 = inlined_call_operand.hbm [shape: f32[1,512], index: 10, kind: input, shape index: {}]   ;;  %s10101_s11 = inlined_call_operand.hbm [shape: bf16[128,128], index: 11, kind: input, shape index: {}]   ;;  %s10102_s12 = inlined_call_operand.hbm [shape: f32[1,128], index: 12, kind: input, shape index: {}]   ;;  %s10103_s13 = inlined_call_operand.vmem [shape: f32[8,512], index: 13, kind: output, shape index: {0}]   ;;  %s10104_s14 = inlined_call_operand.vmem [shape: f32[128,128], index: 14, kind: output, shape index: {1}]  }
   0x1   :  { %21 = vsyncpa [#allocation8], 0 }
   0x2   :  { %22 = vsyncpa [#allocation11], 0 }
   0x3   :  { %23 = vsyncpa [#allocation14], 0 }
   0x4   :  { %24 = vsyncpa [#allocation17], 0 }
   0x5   :  { %25 = vsyncpa [#allocation20], 0  ;;  %s47_s15 = sshll.u32 %s10092_s2, 4  ;;  %s48_s15 = int_to_ptr.hbm [resolvable:$true] %s47_s15 }
   0x6   :  { %26 = vsyncpa [#allocation23], 0  ;;  %s9483_s16 = smov [#allocation7]   ;;  %s71_s20 = sshll.u32 %s10094_s4, 4  ;;  %s72_s20 = int_to_ptr.hbm [resolvable:$true] %s71_s20 }
   0x7   :  { %s49_s17 = sshll.u32 %s9483_s16, 4  ;;  %s9484_s21 = smov [#allocation10]   ;;  %s50_s17 = int_to_ptr.vmem [resolvable:$true] %s49_s17 }
   0x8   :  { %52 = dma.hbm_to_vmem [thread:$0]  %s48_s15, 64, %s50_s17, [#allocation8]  }
   0x9   :  { %s73_s22 = sshll.u32 %s9484_s21, 4  ;;  %s95_s25 = sshll.u32 %s10096_s6, 4  ;;  %s74_s22 = int_to_ptr.vmem [resolvable:$true] %s73_s22  ;;  %s96_s25 = int_to_ptr.hbm [resolvable:$true] %s95_s25 }
   0xa   :  { %76 = dma.hbm_to_vmem [thread:$0]  %s72_s20, 32, %s74_s22, [#allocation11]  }
   0xb   :  { %s119_s27 = sshll.u32 %s10098_s8, 4  ;;  %s9485_s28 = smov [#allocation13]   ;;  %s120_s27 = int_to_ptr.hbm [resolvable:$true] %s119_s27 }
   0xc   :  { %s97_s29 = sshll.u32 %s9485_s28, 4  ;;  %s9486_s4 = smov [#allocation16]   ;;  %s98_s29 = int_to_ptr.vmem [resolvable:$true] %s97_s29 }
   0xd   :  { %100 = dma.hbm_to_vmem [thread:$0]  %s96_s25, 64, %s98_s29, [#allocation14]  }
   0xe   :  { %s121_s30 = sshll.u32 %s9486_s4, 4  ;;  %s143_s17 = sshll.u32 %s10100_s10, 4  ;;  %s122_s30 = int_to_ptr.vmem [resolvable:$true] %s121_s30  ;;  %s144_s17 = int_to_ptr.hbm [resolvable:$true] %s143_s17 }
   0xf   :  { %124 = dma.hbm_to_vmem [thread:$0]  %s120_s27, 128, %s122_s30, [#allocation17]  }
  0x10   :  { %s33_s19 = sshll.u32 %s10091_s1, 4  ;;  %s9487_s20 = smov [#allocation19]   ;;  %s34_s19 = int_to_ptr.hbm [resolvable:$true] %s33_s19 }
  0x11   :  { %s145_s8 = sshll.u32 %s9487_s20, 4  ;;  %s9488_s21 = smov [#allocation5]   ;;  %s146_s8 = int_to_ptr.vmem [resolvable:$true] %s145_s8 }
  0x12   :  { %148 = dma.hbm_to_vmem [thread:$0]  %s144_s17, 64, %s146_s8, [#allocation20]  }
  0x13   :  { %s35_s22 = sshll.u32 %s9488_s21, 4  ;;  %s9489_s23 = smov 256   ;;  %s36_s22 = int_to_ptr.vmem [resolvable:$true] %s35_s22 }
  0x14   :  { %s9490_s24 = smov 16   ;;  %s57_s2 = sshll.u32 %s10093_s3, 4  ;;  %s58_s2 = int_to_ptr.hbm [resolvable:$true] %s57_s2 }
  0x15   :  { %41 = dma.hbm_to_vmem [thread:$0]  %s34_s19, 512, %s36_s22, [#allocation6], %s9489_s23, %s9489_s23, %s9490_s24  }
  0x16   :  { %s9491_s1 = smov [#allocation9]   ;;  %s81_s29 = sshll.u32 %s10095_s5, 4  ;;  %s82_s29 = int_to_ptr.hbm [resolvable:$true] %s81_s29 }
  0x17   :  { %s59_s26 = sshll.u32 %s9491_s1, 4  ;;  %s9492_s4 = smov 128   ;;  %s60_s26 = int_to_ptr.vmem [resolvable:$true] %s59_s26 }
  0x18   :  { %s9493_s30 = smov 8   ;;  %s9494_s15 = smov [#allocation12]  }
  0x19   :  { %65 = dma.hbm_to_vmem [thread:$0]  %s58_s2, 8192, %s60_s26, [#allocation8], %s9492_s4, %s9492_s4, %s9493_s30  }
  0x1a   :  { %s83_s16 = sshll.u32 %s9494_s15, 4  ;;  %s105_s18 = sshll.u32 %s10097_s7, 4  ;;  %s84_s16 = int_to_ptr.vmem [resolvable:$true] %s83_s16  ;;  %s106_s18 = int_to_ptr.hbm [resolvable:$true] %s105_s18 }
  0x1b   :  { %89 = dma.hbm_to_vmem [thread:$0]  %s82_s29, 32768, %s84_s16, [#allocation11], %s9489_s23, %s9489_s23, %s9490_s24  }
  0x1c   :  { %s9495_s3 = smov [#allocation15]   ;;  %s129_s8 = sshll.u32 %s10099_s9, 4  ;;  %s130_s8 = int_to_ptr.hbm [resolvable:$true] %s129_s8 }
  0x1d   :  { %s107_s19 = sshll.u32 %s9495_s3, 4  ;;  %s9496_s21 = smov 512   ;;  %s108_s19 = int_to_ptr.vmem [resolvable:$true] %s107_s19 }
  0x1e   :  { %s9497_s22 = smov 32   ;;  %s9498_s10 = smov [#allocation18]  }
  0x1f   :  { %113 = dma.hbm_to_vmem [thread:$0]  %s106_s18, 32768, %s108_s19, [#allocation14], %s9496_s21, %s9496_s21, %s9497_s22  }
  0x20   :  { %s131_s25 = sshll.u32 %s9498_s10, 4  ;;  %s153_s1 = sshll.u32 %s10101_s11, 4  ;;  %s132_s25 = int_to_ptr.vmem [resolvable:$true] %s131_s25  ;;  %s154_s1 = int_to_ptr.hbm [resolvable:$true] %s153_s1 }
  0x21   :  { %137 = dma.hbm_to_vmem [thread:$0]  %s130_s8, 8192, %s132_s25, [#allocation17], %s9489_s23, %s9489_s23, %s9490_s24  }
  0x22   :  { %s9499_s26 = smov [#allocation21]   ;;  %s167_s29 = sshll.u32 %s10102_s12, 4  ;;  %s168_s29 = int_to_ptr.hbm [resolvable:$true] %s167_s29 }
  0x23   :  { %s155_s27 = sshll.u32 %s9499_s26, 4  ;;  %s9500_s4 = smov 64   ;;  %s156_s27 = int_to_ptr.vmem [resolvable:$true] %s155_s27 }
  0x24   :  { %s9501_s30 = smov 4   ;;  %s9502_s15 = smov [#allocation22]  }
  0x25   :  { %161 = dma.hbm_to_vmem [thread:$0]  %s154_s1, 1024, %s156_s27, [#allocation20], %s9500_s4, %s9500_s4, %s9501_s30  }
  0x26   :  { %s169_s16 = sshll.u32 %s9502_s15, 4  ;;  %s170_s16 = int_to_ptr.vmem [resolvable:$true] %s169_s16 }
  0x27   :  { %172 = dma.hbm_to_vmem [thread:$0]  %s168_s29, 16, %s170_s16, [#allocation23]  }
  0x28   :  { %9469 = dma.done.wait [#allocation6], 512  }
  0x29   :  { %9470 = vsyncadd [#allocation6], 4294966784 }
  0x2a   :  { %9471 = dma.done.wait [#allocation8], 8256  }
  0x2b   :  { %9472 = vsyncadd [#allocation8], 4294959040 }
  0x2c   :  { %9473 = dma.done.wait [#allocation11], 32800  }
  0x2d   :  { %9474 = vsyncadd [#allocation11], 4294934496 }
  0x2e   :  { %9475 = dma.done.wait [#allocation14], 32832  }
  0x2f   :  { %9476 = vsyncadd [#allocation14], 4294934464 }
  0x30   :  { %9477 = dma.done.wait [#allocation17], 8320  }
  0x31   :  { %9478 = vsyncadd [#allocation17], 4294958976 }
  0x32   :  { %9479 = dma.done.wait [#allocation20], 1088  }
  0x33   :  { %9480 = vsyncadd [#allocation20], 4294966208 }
  0x34   :  { %9481 = dma.done.wait [#allocation23], 16  }
  0x35   :  { %9482 = vsyncadd [#allocation23], 4294967280  ;;  %v5783_v0 = vld [vmem:[#allocation5] sm:$0xf]  ;;  %v8449_v1 = vld [vmem:[#allocation5 + $0xc] sm:$0xf0] }
  0x36   :  { %v5791_v2 = vld [vmem:[#allocation5 + $0x8] sm:$0xf]  ;;  %v5784_v3 = vor.u32 %v8449_v1, %v5783_v0  ;;  %v8450_v4 = vld [vmem:[#allocation5 + $0x14] sm:$0xf0]  ;;  %v8448_v5 = vld [vmem:[#allocation5 + $0xc] sm:$0xf] }
  0x37   :  { %v5793_v6 = vld [vmem:[#allocation5 + $0x18] sm:$0xf0]  ;;  %v5792_v7 = vor.u32 %v8450_v4, %v5791_v2  ;;  %v8445_v9 = vld [vmem:[%s10090_s0] sm:$0xff]  ;;  %vm270_vm0 = vcmask 130048   ;;  %v5785_v11 = vld [vmem:[#allocation5 + $0x10] sm:$0xf0] }
  0x38   :  { %v5796_v8 = vor.u32 %v8448_v5, %v5793_v6  ;;  %v8447_v10 = vld [vmem:[#allocation5 + $0x4] sm:$0xf]  ;;  %284 = vmatpush.bf16.msra.mxu0 %v5784_v3  ;;  %v5863_v12 = vld [vmem:[#allocation9 + $0x70] sm:$0xf]  ;;  %v8466_v13 = vld [vmem:[#allocation9 + $0x74] sm:$0xf0] }
  0x39   :  { %322 = vmatpush.bf16.msra.mxu2 %v5792_v7  ;;  %v5788_v14 = vor.u32 %v8447_v10, %v5785_v11  ;;  %v5864_v15 = vor.u32 %v8466_v13, %v5863_v12  ;;  %v5855_v16 = vld [vmem:[#allocation9 + $0x60] sm:$0xf]  ;;  %v8464_v17 = vld [vmem:[#allocation9 + $0x64] sm:$0xf0]  ;;  %v5991_v18 = vld [vmem:[#allocation9 + $0x170] sm:$0xf] }
  0x3a   :  { %341 = vmatpush.bf16.msra.mxu3 %v5796_v8  ;;  %v8498_v19 = vld [vmem:[#allocation9 + $0x174] sm:$0xf0]  ;;  %v6055_v20 = vld [vmem:[#allocation9 + $0x1f0] sm:$0xf]  ;;  %v5983_v24 = vld [vmem:[#allocation9 + $0x160] sm:$0xf]  ;;  %v5856_v28 = vor.u32 %v8464_v17, %v5855_v16 }
  0x3b   :  { %v8514_v21 = vld [vmem:[#allocation9 + $0x1f4] sm:$0xf0]  ;;  %5797 = vmatmul.msk.bf16.vlgmr.msra.gmra.mxu0 %vm270_vm0, %v8445_v9  ;;  %303 = vmatpush.bf16.msra.mxu1 %v5788_v14  ;;  %v5992_v22 = vor.u32 %v8498_v19, %v5991_v18  ;;  %v8496_v25 = vld [vmem:[#allocation9 + $0x164] sm:$0xf0]  ;;  %v6047_v26 = vld [vmem:[#allocation9 + $0x1e0] sm:$0xf] }
  0x3c   :  { %v6056_v23 = vor.u32 %v8514_v21, %v6055_v20  ;;  %5801 = vmatmul.msk.bf16.vlgmr.msra.gmra.mxu2 %vm270_vm0, %v8445_v9  ;;  %v8512_v27 = vld [vmem:[#allocation9 + $0x1e4] sm:$0xf0]  ;;  %v5847_v29 = vld [vmem:[#allocation9 + $0x50] sm:$0xf]  ;;  %v5984_v30 = vor.u32 %v8496_v25, %v5983_v24  ;;  %v8462_v31 = vld [vmem:[#allocation9 + $0x54] sm:$0xf0] }
  0x3d   :  { %5803 = vmatmul.msk.bf16.vlgmr.msra.gmra.mxu3 %vm270_vm0, %v8445_v9  ;;  %805 = vmatpush.bf16.msrb.mxu2 %v5992_v22  ;;  %v6048_v32 = vor.u32 %v8512_v27, %v6047_v26  ;;  %v5975_v33 = vld [vmem:[#allocation9 + $0x150] sm:$0xf]  ;;  %v8494_v34 = vld [vmem:[#allocation9 + $0x154] sm:$0xf0]  ;;  %v5848_v37 = vor.u32 %v8462_v31, %v5847_v29  ;;  %v5839_v39 = vld [vmem:[#allocation9 + $0x40] sm:$0xf] }
  0x3e   :  { %5799 = vmatmul.msk.bf16.vlgmr.msra.gmra.mxu1 %vm270_vm0, %v8445_v9  ;;  %824 = vmatpush.bf16.msrb.mxu3 %v6056_v23  ;;  %v6039_v35 = vld [vmem:[#allocation9 + $0x1d0] sm:$0xf]  ;;  %v8510_v36 = vld [vmem:[#allocation9 + $0x1d4] sm:$0xf0]  ;;  %v5976_v38 = vor.u32 %v8494_v34, %v5975_v33  ;;  %v8460_v40 = vld [vmem:[#allocation9 + $0x44] sm:$0xf0] }
  0x3f   :  { %767 = vmatpush.bf16.msrb.mxu1 %v5864_v15  ;;  %v6040_v41 = vor.u32 %v8510_v36, %v6039_v35  ;;  %v5840_v42 = vor.u32 %v8460_v40, %v5839_v39  ;;  %v8446_v43 = vld [vmem:[%s10090_s0 + $0x8] sm:$0xff]  ;;  %v5831_v44 = vld [vmem:[#allocation9 + $0x30] sm:$0xf]  ;;  %v8458_v45 = vld [vmem:[#allocation9 + $0x34] sm:$0xf0] }
  0x40   :  { %v5832_v46 = vor.u32 %v8458_v45, %v5831_v44  ;;  %v5967_v47 = vld [vmem:[#allocation9 + $0x140] sm:$0xf]  ;;  %v8492_v48 = vld [vmem:[#allocation9 + $0x144] sm:$0xf0]  ;;  %v5959_v56 = vld [vmem:[#allocation9 + $0x130] sm:$0xf] }
  0x41   :  { %806 = vmatpush.bf16.msrb.mxu2 %v5984_v30  ;;  %v6031_v49 = vld [vmem:[#allocation9 + $0x1c0] sm:$0xf]  ;;  %v5968_v50 = vor.u32 %v8492_v48, %v5967_v47  ;;  %v8508_v51 = vld [vmem:[#allocation9 + $0x1c4] sm:$0xf0]  ;;  %v8490_v57 = vld [vmem:[#allocation9 + $0x134] sm:$0xf0] }
  0x42   :  { %825 = vmatpush.bf16.msrb.mxu3 %v6048_v32  ;;  %v6032_v52 = vor.u32 %v8508_v51, %v6031_v49  ;;  %v5823_v53 = vld [vmem:[#allocation9 + $0x20] sm:$0xf]  ;;  %v8456_v54 = vld [vmem:[#allocation9 + $0x24] sm:$0xf0]  ;;  %v6023_v58 = vld [vmem:[#allocation9 + $0x1b0] sm:$0xf]  ;;  %v5960_v59 = vor.u32 %v8490_v57, %v5959_v56 }
  0x43   :  { %768 = vmatpush.bf16.msrb.mxu1 %v5856_v28  ;;  %v5824_v55 = vor.u32 %v8456_v54, %v5823_v53  ;;  %v8506_v60 = vld [vmem:[#allocation9 + $0x1b4] sm:$0xf0]  ;;  %v5815_v62 = vld [vmem:[#allocation9 + $0x10] sm:$0xf]  ;;  %v5951_v1 = vld [vmem:[#allocation9 + $0x120] sm:$0xf] }
  0x44   :  { %v6024_v61 = vor.u32 %v8506_v60, %v6023_v58  ;;  %v8454_v63 = vld [vmem:[#allocation9 + $0x14] sm:$0xf0]  ;;  %v8488_v2 = vld [vmem:[#allocation9 + $0x124] sm:$0xf0]  ;;  %v6015_v3 = vld [vmem:[#allocation9 + $0x1a0] sm:$0xf] }
  0x45   :  { %807 = vmatpush.bf16.msrb.mxu2 %v5976_v38  ;;  %v5816_v0 = vor.u32 %v8454_v63, %v5815_v62  ;;  %v5952_v4 = vor.u32 %v8488_v2, %v5951_v1  ;;  %v8504_v5 = vld [vmem:[#allocation9 + $0x1a4] sm:$0xf0]  ;;  %v5807_v7 = vld [vmem:[#allocation9] sm:$0xf]  ;;  %v5943_v10 = vld [vmem:[#allocation9 + $0x110] sm:$0xf] }
  0x46   :  { %826 = vmatpush.bf16.msrb.mxu3 %v6040_v41  ;;  %v6016_v6 = vor.u32 %v8504_v5, %v6015_v3  ;;  %v8452_v8 = vld [vmem:[#allocation9 + $0x4] sm:$0xf0]  ;;  %v8486_v11 = vld [vmem:[#allocation9 + $0x114] sm:$0xf0]  ;;  %v6007_v12 = vld [vmem:[#allocation9 + $0x190] sm:$0xf] }
  0x47   :  { %769 = vmatpush.bf16.msrb.mxu1 %v5848_v37  ;;  %v5808_v9 = vor.u32 %v8452_v8, %v5807_v7  ;;  %v5944_v13 = vor.u32 %v8486_v11, %v5943_v10  ;;  %v8502_v14 = vld [vmem:[#allocation9 + $0x194] sm:$0xf0]  ;;  %v5927_v16 = vld [vmem:[#allocation9 + $0xf0] sm:$0xf]  ;;  %v5935_v19 = vld [vmem:[#allocation9 + $0x100] sm:$0xf] }
  0x48   :  { %v6008_v15 = vor.u32 %v8502_v14, %v6007_v12  ;;  %v8482_v17 = vld [vmem:[#allocation9 + $0xf4] sm:$0xf0]  ;;  %v8484_v20 = vld [vmem:[#allocation9 + $0x104] sm:$0xf0]  ;;  %v5999_v21 = vld [vmem:[#allocation9 + $0x180] sm:$0xf] }
  0x49   :  { %808 = vmatpush.bf16.msrb.mxu2 %v5968_v50  ;;  %v5928_v18 = vor.u32 %v8482_v17, %v5927_v16  ;;  %v5936_v22 = vor.u32 %v8484_v20, %v5935_v19  ;;  %v8500_v23 = vld [vmem:[#allocation9 + $0x184] sm:$0xf0]  ;;  %v5919_v25 = vld [vmem:[#allocation9 + $0xe0] sm:$0xf]  ;;  %v8465_v28 = vld [vmem:[#allocation9 + $0x74] sm:$0xf] }
  0x4a   :  { %827 = vmatpush.bf16.msrb.mxu3 %v6032_v52  ;;  %v6000_v24 = vor.u32 %v8500_v23, %v5999_v21  ;;  %v8480_v26 = vld [vmem:[#allocation9 + $0xe4] sm:$0xf0]  ;;  %v5865_v29 = vld [vmem:[#allocation9 + $0x78] sm:$0xf0]  ;;  %v8513_v30 = vld [vmem:[#allocation9 + $0x1f4] sm:$0xf] }
  0x4b   :  { %770 = vmatpush.bf16.msrb.mxu1 %v5840_v42  ;;  %5798 = vmatmul.msk.bf16.gmra.mxu0 %vm270_vm0, %v8446_v43  ;;  %v5920_v27 = vor.u32 %v8480_v26, %v5919_v25  ;;  %v5868_v31 = vor.u32 %v8465_v28, %v5865_v29  ;;  %v6057_v32 = vld [vmem:[#allocation9 + $0x1f8] sm:$0xf0]  ;;  %v5911_v34 = vld [vmem:[#allocation9 + $0xd0] sm:$0xf]  ;;  %v8478_v35 = vld [vmem:[#allocation9 + $0xd4] sm:$0xf0] }
  0x4c   :  { %5802 = vmatmul.msk.bf16.gmra.mxu2 %vm270_vm0, %v8446_v43  ;;  %v6060_v33 = vor.u32 %v8513_v30, %v6057_v32  ;;  %v5912_v36 = vor.u32 %v8478_v35, %v5911_v34  ;;  %v8463_v37 = vld [vmem:[#allocation9 + $0x64] sm:$0xf]  ;;  %v5857_v38 = vld [vmem:[#allocation9 + $0x68] sm:$0xf0]  ;;  %v8476_v44 = vld [vmem:[#allocation9 + $0xc4] sm:$0xf0] }
  0x4d   :  { %5804 = vmatmul.msk.bf16.gmra.mxu3 %vm270_vm0, %v8446_v43  ;;  %809 = vmatpush.bf16.msrb.mxu2 %v5960_v59  ;;  %v8511_v39 = vld [vmem:[#allocation9 + $0x1e4] sm:$0xf]  ;;  %v5860_v40 = vor.u32 %v8463_v37, %v5857_v38  ;;  %v6049_v41 = vld [vmem:[#allocation9 + $0x1e8] sm:$0xf0]  ;;  %v5849_v47 = vld [vmem:[#allocation9 + $0x58] sm:$0xf0] }
  0x4e   :  { %5800 = vmatmul.msk.bf16.gmra.mxu1 %vm270_vm0, %v8446_v43  ;;  %828 = vmatpush.bf16.msrb.mxu3 %v6024_v61  ;;  %v6052_v42 = vor.u32 %v8511_v39, %v6049_v41  ;;  %v5903_v43 = vld [vmem:[#allocation9 + $0xc0] sm:$0xf]  ;;  %v8509_v48 = vld [vmem:[#allocation9 + $0x1d4] sm:$0xf]  ;;  %v9637_v49 = vld [vmem:[#allocation7] sm:$0xf] }
  0x4f   :  { %771 = vmatpush.bf16.msrb.mxu1 %v5832_v46  ;;  %v5904_v45 = vor.u32 %v8476_v44, %v5903_v43  ;;  %v8461_v46 = vld [vmem:[#allocation9 + $0x54] sm:$0xf]  ;;  %v6041_v51 = vld [vmem:[#allocation9 + $0x1d8] sm:$0xf0]  ;;  %v9640_v52 = vperm.slane %v9637_v49, 0  ;;  %v9644_v10 = vperm.slane %v9637_v49, 3 }
  0x50   :  { %v5852_v50 = vor.u32 %v8461_v46, %v5849_v47  ;;  %v6044_v53 = vor.u32 %v8509_v48, %v6041_v51  ;;  %v5895_v54 = vld [vmem:[#allocation9 + $0xb0] sm:$0xf]  ;;  %v8459_v58 = vld [vmem:[#allocation9 + $0x44] sm:$0xf]  ;;  %v5841_v59 = vld [vmem:[#allocation9 + $0x48] sm:$0xf0] }
  0x51   :  { %810 = vmatpush.bf16.msrb.mxu2 %v5952_v4  ;;  %v8507_v60 = vld [vmem:[#allocation9 + $0x1c4] sm:$0xf]  ;;  %v5844_v61 = vor.u32 %v8459_v58, %v5841_v59  ;;  %v6033_v62 = vld [vmem:[#allocation9 + $0x1c8] sm:$0xf0]  ;;  %v5887_v1 = vld [vmem:[#allocation9 + $0xa0] sm:$0xf] }
  0x52   :  { %829 = vmatpush.bf16.msrb.mxu3 %v6016_v6  ;;  %v8472_v2 = vld [vmem:[#allocation9 + $0xa4] sm:$0xf0]  ;;  %v8457_v4 = vld [vmem:[#allocation9 + $0x34] sm:$0xf]  ;;  %v5833_v5 = vld [vmem:[#allocation9 + $0x38] sm:$0xf0] }
  0x53   :  { %772 = vmatpush.bf16.msrb.mxu1 %v5824_v55  ;;  %v8474_v55 = vld [vmem:[#allocation9 + $0xb4] sm:$0xf0]  ;;  %v5888_v3 = vor.u32 %v8472_v2, %v5887_v1  ;;  %v8505_v6 = vld [vmem:[#allocation9 + $0x1b4] sm:$0xf]  ;;  %v5836_v7 = vor.u32 %v8457_v4, %v5833_v5  ;;  %v6025_v8 = vld [vmem:[#allocation9 + $0x1b8] sm:$0xf0] }
  0x54   :  { %v5896_v56 = vor.u32 %v8474_v55, %v5895_v54  ;;  %v6028_v11 = vor.u32 %v8505_v6, %v6025_v8  ;;  %v5879_v12 = vld [vmem:[#allocation9 + $0x90] sm:$0xf]  ;;  %v8455_v17 = vld [vmem:[#allocation9 + $0x24] sm:$0xf]  ;;  %v5871_v23 = vld [vmem:[#allocation9 + $0x80] sm:$0xf] }
  0x55   :  { %811 = vmatpush.bf16.msrb.mxu2 %v5944_v13  ;;  %v8470_v13 = vld [vmem:[#allocation9 + $0x94] sm:$0xf0]  ;;  %v8503_v19 = vld [vmem:[#allocation9 + $0x1a4] sm:$0xf]  ;;  %v8453_v28 = vld [vmem:[#allocation9 + $0x14] sm:$0xf] }
  0x56   :  { %830 = vmatpush.bf16.msrb.mxu3 %v6008_v15  ;;  %v5880_v16 = vor.u32 %v8470_v13, %v5879_v12  ;;  %v5817_v29 = vld [vmem:[#allocation9 + $0x18] sm:$0xf0]  ;;  %v8501_v30 = vld [vmem:[#allocation9 + $0x194] sm:$0xf]  ;;  %v5809_v46 = vld [vmem:[#allocation9 + $0x8] sm:$0xf0] }
  0x57   :  { %773 = vmatpush.bf16.msrb.mxu1 %v5816_v0  ;;  %v6036_v0 = vor.u32 %v8507_v60, %v6033_v62  ;;  %v5820_v35 = vor.u32 %v8453_v28, %v5817_v29  ;;  %v5929_v41 = vld [vmem:[#allocation9 + $0xf8] sm:$0xf0]  ;;  %v8499_v47 = vld [vmem:[#allocation9 + $0x184] sm:$0xf]  ;;  %v6001_v54 = vld [vmem:[#allocation9 + $0x188] sm:$0xf0] }
  0x58   :  { %v8479_v55 = vld [vmem:[#allocation9 + $0xe4] sm:$0xf]  ;;  %v8497_v1 = vld [vmem:[#allocation9 + $0x174] sm:$0xf]  ;;  %v5993_v2 = vld [vmem:[#allocation9 + $0x178] sm:$0xf0] }
  0x59   :  { %812 = vmatpush.bf16.msrb.mxu2 %v5936_v22  ;;  %v6017_v22 = vld [vmem:[#allocation9 + $0x1a8] sm:$0xf0]  ;;  %v5996_v4 = vor.u32 %v8497_v1, %v5993_v2  ;;  %v8477_v5 = vld [vmem:[#allocation9 + $0xd4] sm:$0xf]  ;;  %v5913_v6 = vld [vmem:[#allocation9 + $0xd8] sm:$0xf0] }
  0x5a   :  { %831 = vmatpush.bf16.msrb.mxu3 %v6000_v24  ;;  %v8468_v24 = vld [vmem:[#allocation9 + $0x84] sm:$0xf0]  ;;  %v6020_v26 = vor.u32 %v8503_v19, %v6017_v22  ;;  %v5985_v12 = vld [vmem:[#allocation9 + $0x168] sm:$0xf0]  ;;  %v8475_v13 = vld [vmem:[#allocation9 + $0xc4] sm:$0xf] }
  0x5b   :  { %774 = vmatpush.bf16.msrb.mxu1 %v5808_v9  ;;  %v8473_v29 = vld [vmem:[#allocation9 + $0xb4] sm:$0xf] }
  0x5c   :  { %v8485_v2 = vld [vmem:[#allocation9 + $0x114] sm:$0xf] }
  0x5d   :  { %843 = vmatpush.bf16.msra.mxu2 %v5868_v31  ;;  %v9648_v31 = vperm.slane %v9637_v49, 2 }
  0x5e   :  { %900 = vmatpush.bf16.msra.mxu3 %v6060_v33  ;;  %v6009_v33 = vld [vmem:[#allocation9 + $0x198] sm:$0xf0] }
  0x5f   :  { %786 = vmatpush.bf16.msra.mxu1 %v5928_v18  ;;  %v5825_v18 = vld [vmem:[#allocation9 + $0x28] sm:$0xf0] }
  0x60   :  { %v5828_v21 = vor.u32 %v8455_v17, %v5825_v18  ;;  %v8493_v17 = vld [vmem:[#allocation9 + $0x154] sm:$0xf]  ;;  %v5977_v18 = vld [vmem:[#allocation9 + $0x158] sm:$0xf0] }
  0x61   :  { %844 = vmatpush.bf16.msra.mxu2 %v5860_v40  ;;  %v8481_v40 = vld [vmem:[#allocation9 + $0xf4] sm:$0xf] }
  0x62   :  { %901 = vmatpush.bf16.msra.mxu3 %v6052_v42  ;;  %v5932_v44 = vor.u32 %v8481_v40, %v5929_v41  ;;  %v5889_v41 = vld [vmem:[#allocation9 + $0xa8] sm:$0xf0] }
  0x63   :  { %787 = vmatpush.bf16.msra.mxu1 %v5920_v27  ;;  %v5872_v27 = vor.u32 %v8468_v24, %v5871_v23  ;;  %v5980_v23 = vor.u32 %v8493_v17, %v5977_v18  ;;  %v6175_v17 = vld [vmem:[#allocation12 + $0xe0] sm:$0xf]  ;;  %v8545_v18 = vld [vmem:[#allocation12 + $0xec] sm:$0xf0] }
  0x65   :  { %845 = vmatpush.bf16.msra.mxu2 %v5852_v50 }
  0x66   :  { %902 = vmatpush.bf16.msra.mxu3 %v6044_v53 }
  0x67   :  { %788 = vmatpush.bf16.msra.mxu1 %v5912_v36  ;;  %v6012_v36 = vor.u32 %v8501_v30, %v6009_v33  ;;  %v5897_v30 = vld [vmem:[#allocation9 + $0xb8] sm:$0xf0] }
  0x69   :  { %846 = vmatpush.bf16.msra.mxu2 %v5844_v61 }
  0x6a   :  { %903 = vmatpush.bf16.msra.mxu3 %v6036_v0 }
  0x6b   :  { %789 = vmatpush.bf16.msra.mxu1 %v5904_v45  ;;  %v8451_v45 = vld [vmem:[#allocation9 + $0x4] sm:$0xf] }
  0x6c   :  { %v5812_v53 = vor.u32 %v8451_v45, %v5809_v46 }
  0x6d   :  { %847 = vmatpush.bf16.msra.mxu2 %v5836_v7 }
  0x6e   :  { %904 = vmatpush.bf16.msra.mxu3 %v6028_v11  ;;  %v8495_v11 = vld [vmem:[#allocation9 + $0x164] sm:$0xf] }
  0x6f   :  { %790 = vmatpush.bf16.msra.mxu1 %v5896_v56  ;;  %v5921_v56 = vld [vmem:[#allocation9 + $0xe8] sm:$0xf0] }
  0x70   :  { %v5924_v58 = vor.u32 %v8479_v55, %v5921_v56  ;;  %v8469_v56 = vld [vmem:[#allocation9 + $0x94] sm:$0xf] }
  0x71   :  { %848 = vmatpush.bf16.msra.mxu2 %v5828_v21 }
  0x72   :  { %905 = vmatpush.bf16.msra.mxu3 %v6020_v26 }
  0x73   :  { %791 = vmatpush.bf16.msra.mxu1 %v5888_v3 }
  0x75   :  { %849 = vmatpush.bf16.msra.mxu2 %v5820_v35  ;;  %v5969_v35 = vld [vmem:[#allocation9 + $0x148] sm:$0xf0] }
  0x76   :  { %906 = vmatpush.bf16.msra.mxu3 %v6012_v36  ;;  %v8471_v36 = vld [vmem:[#allocation9 + $0xa4] sm:$0xf] }
  0x77   :  { %792 = vmatpush.bf16.msra.mxu1 %v5880_v16  ;;  %v5905_v16 = vld [vmem:[#allocation9 + $0xc8] sm:$0xf0] }
  0x78   :  { %v5908_v21 = vor.u32 %v8475_v13, %v5905_v16 }
  0x79   :  { %850 = vmatpush.bf16.msra.mxu2 %v5812_v53  ;;  %v5961_v53 = vld [vmem:[#allocation9 + $0x138] sm:$0xf0] }
  0x7b   :  { %793 = vmatpush.bf16.msra.mxu1 %v5872_v27  ;;  %v233_v27 = vperm.slane %v9637_v49, 1 }
  0xb8   :  { %v286_v57 = vpop.f32.mrf.mxu0 }
  0xb9   :  { %v287_v63 = vadd.f32 %v286_v57, %v9640_v52  ;;  %v6004_v57 = vor.u32 %v8499_v47, %v6001_v54 }
  0xbb   :  { %v353_v9 = vmax.f32 %v287_v63, 0.0  ;;  %v305_v62 = vpop.f32.mrf.mxu1  ;;  %907 = vmatpush.bf16.msra.mxu3 %v6004_v57  ;;  %v5881_v57 = vld [vmem:[#allocation9 + $0x98] sm:$0xf0] }
  0xbf   :  { %v324_v14 = vpop.f32.mrf.mxu2 }
  0xc0   :  { %v343_v15 = vpop.f32.mrf.mxu3  ;;  %v288_v20 = vpop.f32.mrf.mxu0  ;;  %v325_v38 = vadd.f32 %v324_v14, %v9648_v31 }
  0xc1   :  { %v289_v25 = vadd.f32 %v288_v20, %v9640_v52  ;;  %v344_v32 = vadd.f32 %v343_v15, %v9644_v10  ;;  %v5988_v15 = vor.u32 %v8495_v11, %v5985_v12 }
  0xc2   :  { %v355_v59 = vmax.f32 %v325_v38, 0.0 }
  0xc3   :  { %v357_v34 = vmax.f32 %v289_v25, 0.0  ;;  %v356_v39 = vmax.f32 %v344_v32, 0.0  ;;  %v307_v25 = vpop.f32.mrf.mxu1 }
  0xc5   :  { %v9651_v37 = vpack.c.bf16 %v357_v34, %v353_v9  ;;  %v5916_v9 = vor.u32 %v8477_v5, %v5913_v6  ;;  %v8491_v34 = vld [vmem:[#allocation9 + $0x144] sm:$0xf] }
  0xc6   :  { %v5972_v49 = vor.u32 %v8491_v34, %v5969_v35 }
  0xc7   :  { %v326_v42 = vpop.f32.mrf.mxu2  ;;  %775 = vmatmul.bf16.vlgmr.msrb.gmra.mxu1 %v9651_v37 }
  0xc8   :  { %v345_v43 = vpop.f32.mrf.mxu3  ;;  %v327_v48 = vadd.f32 %v326_v42, %v9648_v31  ;;  %v291_v51 = vpop.f32.mrf.mxu0  ;;  %862 = vmatpush.bf16.msrb.mxu1 %v5932_v44  ;;  %v306_v42 = vadd.f32 %v305_v62, %v233_v27  ;;  %v5892_v44 = vor.u32 %v8471_v36, %v5889_v41  ;;  %v5873_v62 = vld [vmem:[#allocation9 + $0x88] sm:$0xf0]  ;;  %v8565_v41 = vld [vmem:[#allocation12 + $0x18c] sm:$0xf0] }
  0xc9   :  { %v346_v50 = vadd.f32 %v345_v43, %v9644_v10  ;;  %v292_v3 = vadd.f32 %v291_v51, %v9640_v52  ;;  %v308_v43 = vadd.f32 %v307_v25, %v233_v27  ;;  %v8489_v51 = vld [vmem:[#allocation9 + $0x134] sm:$0xf] }
  0xca   :  { %v359_v60 = vmax.f32 %v327_v48, 0.0  ;;  %v354_v54 = vmax.f32 %v306_v42, 0.0  ;;  %v6415_v42 = vld [vmem:[#allocation12 + $0x2c0] sm:$0xf] }
  0xcb   :  { %v360_v61 = vmax.f32 %v346_v50, 0.0  ;;  %v361_v19 = vmax.f32 %v292_v3, 0.0  ;;  %v358_v55 = vmax.f32 %v308_v43, 0.0  ;;  %v5945_v3 = vld [vmem:[#allocation9 + $0x118] sm:$0xf0] }
  0xcc   :  { %v9657_v63 = vpack.c.bf16 %v359_v60, %v355_v59  ;;  %863 = vmatpush.bf16.msrb.mxu1 %v5924_v58  ;;  %v8487_v58 = vld [vmem:[#allocation9 + $0x124] sm:$0xf]  ;;  %v5884_v59 = vor.u32 %v8469_v56, %v5881_v57  ;;  %v5953_v60 = vld [vmem:[#allocation9 + $0x128] sm:$0xf0]  ;;  %v5948_v6 = vor.u32 %v8485_v2, %v5945_v3  ;;  %v8605_v43 = vld [vmem:[#allocation12 + $0x2cc] sm:$0xf0] }
  0xcd   :  { %v9659_v0 = vpack.c.bf16 %v360_v61, %v356_v39  ;;  %v8467_v61 = vld [vmem:[#allocation9 + $0x84] sm:$0xf]  ;;  %v5956_v1 = vor.u32 %v8487_v58, %v5953_v60  ;;  %v370_v5 = vpack.c.bf16 %v358_v55, %v354_v54  ;;  %v8601_v55 = vld [vmem:[#allocation12 + $0x2ac] sm:$0xf0] }
  0xce   :  { %813 = vmatmul.bf16.vlgmr.msrb.gmra.mxu2 %v9657_v63  ;;  %v6399_v54 = vld [vmem:[#allocation12 + $0x2a0] sm:$0xf]  ;;  %v8673_v57 = vld [vmem:[#allocation12 + $0x4ec] sm:$0xf0] }
  0xcf   :  { %832 = vmatmul.bf16.vlgmr.msrb.gmra.mxu3 %v9659_v0  ;;  %v329_v7 = vpop.f32.mrf.mxu2  ;;  %881 = vmatpush.bf16.msrb.mxu2 %v5996_v4  ;;  %v5876_v4 = vor.u32 %v8467_v61, %v5873_v62  ;;  %v6687_v56 = vld [vmem:[#allocation12 + $0x4e0] sm:$0xf]  ;;  %v8525_v61 = vld [vmem:[#allocation12 + $0x4c] sm:$0xf0] }
  0xd0   :  { %v348_v8 = vpop.f32.mrf.mxu3  ;;  %v293_v14 = vpop.f32.mrf.mxu0  ;;  %864 = vmatpush.bf16.msrb.mxu1 %v5916_v9  ;;  %v330_v28 = vadd.f32 %v329_v7, %v9648_v31  ;;  %v8483_v7 = vld [vmem:[#allocation9 + $0x104] sm:$0xf]  ;;  %v8557_v2 = vld [vmem:[#allocation12 + $0x14c] sm:$0xf0] }
  0xd1   :  { %v294_v20 = vadd.f32 %v293_v14, %v9640_v52  ;;  %v349_v24 = vadd.f32 %v348_v8, %v9644_v10  ;;  %v5900_v52 = vor.u32 %v8473_v29, %v5897_v30  ;;  %v5937_v8 = vld [vmem:[#allocation9 + $0x108] sm:$0xf0]  ;;  %v6271_v29 = vld [vmem:[#allocation12 + $0x1a0] sm:$0xf] }
  0xd2   :  { %v363_v45 = vmax.f32 %v330_v28, 0.0  ;;  %v5940_v11 = vor.u32 %v8483_v7, %v5937_v8  ;;  %v8537_v28 = vld [vmem:[#allocation12 + $0xac] sm:$0xf0]  ;;  %v6095_v60 = vld [vmem:[#allocation12 + $0x40] sm:$0xf] }
  0xd3   :  { %v365_v22 = vmax.f32 %v294_v20, 0.0  ;;  %882 = vmatpush.bf16.msrb.mxu2 %v5988_v15  ;;  %v364_v38 = vmax.f32 %v349_v24, 0.0  ;;  %v6176_v20 = vor.u32 %v8545_v18, %v6175_v17  ;;  %v6287_v24 = vld [vmem:[#allocation12 + $0x1c0] sm:$0xf]  ;;  %v8669_v8 = vld [vmem:[#allocation12 + $0x4cc] sm:$0xf0] }
  0xd4   :  { %865 = vmatpush.bf16.msrb.mxu1 %v5908_v21  ;;  %v8577_v21 = vld [vmem:[#allocation12 + $0x1ec] sm:$0xf0]  ;;  %v6223_v62 = vld [vmem:[#allocation12 + $0x140] sm:$0xf] }
  0xd5   :  { %v9666_v26 = vpack.c.bf16 %v365_v22, %v361_v19  ;;  %v6303_v19 = vld [vmem:[#allocation12 + $0x1e0] sm:$0xf]  ;;  %2513 = vmatpush.bf16.msrb.mxu3 %v6176_v20  ;;  %v8593_v18 = vld [vmem:[#allocation12 + $0x26c] sm:$0xf0] }
  0xd6   :  { %v6383_v3 = vld [vmem:[#allocation12 + $0x280] sm:$0xf] }
  0xd7   :  { %v331_v32 = vpop.f32.mrf.mxu2  ;;  %780 = vmatmul.bf16.gmra.mxu1 %v9666_v26  ;;  %883 = vmatpush.bf16.msrb.mxu2 %v5980_v23  ;;  %v8541_v23 = vld [vmem:[#allocation12 + $0xcc] sm:$0xf0]  ;;  %v6671_v7 = vld [vmem:[#allocation12 + $0x4c0] sm:$0xf] }
  0xd8   :  { %v350_v33 = vpop.f32.mrf.mxu3  ;;  %v332_v39 = vadd.f32 %v331_v32, %v9648_v31  ;;  %866 = vmatpush.bf16.msrb.mxu1 %v5900_v52  ;;  %v5964_v31 = vor.u32 %v8489_v51, %v5961_v53  ;;  %v8569_v32 = vld [vmem:[#allocation12 + $0x1ac] sm:$0xf0]  ;;  %v6367_v17 = vld [vmem:[#allocation12 + $0x260] sm:$0xf] }
  0xd9   :  { %v351_v40 = vadd.f32 %v350_v33, %v9644_v10  ;;  %v310_v10 = vpop.f32.mrf.mxu1  ;;  %v6431_v33 = vld [vmem:[#allocation12 + $0x2e0] sm:$0xf]  ;;  %v8609_v52 = vld [vmem:[#allocation12 + $0x2ec] sm:$0xf0]  ;;  %v6272_v34 = vor.u32 %v8569_v32, %v6271_v29  ;;  %v6368_v20 = vor.u32 %v8593_v18, %v6367_v17 }
  0xda   :  { %v367_v46 = vmax.f32 %v332_v39, 0.0  ;;  %v311_v12 = vadd.f32 %v310_v10, %v233_v27  ;;  %v6432_v35 = vor.u32 %v8609_v52, %v6431_v33  ;;  %v8533_v39 = vld [vmem:[#allocation12 + $0x8c] sm:$0xf0]  ;;  %v6400_v10 = vor.u32 %v8601_v55, %v6399_v54  ;;  %v6639_v33 = vld [vmem:[#allocation12 + $0x480] sm:$0xf] }
  0xdb   :  { %v368_v47 = vmax.f32 %v351_v40, 0.0  ;;  %884 = vmatpush.bf16.msrb.mxu2 %v5972_v49  ;;  %v6255_v40 = vld [vmem:[#allocation12 + $0x180] sm:$0xf]  ;;  %v8561_v53 = vld [vmem:[#allocation12 + $0x16c] sm:$0xf0] }
  0xdc   :  { %v375_v48 = vpack.c.bf16 %v367_v46, %v363_v45  ;;  %867 = vmatpush.bf16.msrb.mxu1 %v5892_v44  ;;  %v362_v14 = vmax.f32 %v311_v12, 0.0  ;;  %v6256_v44 = vor.u32 %v8565_v41, %v6255_v40  ;;  %v6416_v45 = vor.u32 %v8605_v43, %v6415_v42  ;;  %v6079_v12 = vld [vmem:[#allocation12 + $0x20] sm:$0xf]  ;;  %v8589_v29 = vld [vmem:[#allocation12 + $0x24c] sm:$0xf0] }
  0xdd   :  { %v376_v50 = vpack.c.bf16 %v368_v47, %v364_v38  ;;  %v6127_v38 = vld [vmem:[#allocation12 + $0x80] sm:$0xf]  ;;  %v8661_v52 = vld [vmem:[#allocation12 + $0x48c] sm:$0xf0] }
  0xde   :  { %818 = vmatmul.bf16.gmra.mxu2 %v375_v48  ;;  %v6128_v49 = vor.u32 %v8533_v39, %v6127_v38  ;;  %v6111_v47 = vld [vmem:[#allocation12 + $0x60] sm:$0xf]  ;;  %v8641_v38 = vld [vmem:[#allocation12 + $0x3ec] sm:$0xf0] }
  0xdf   :  { %837 = vmatmul.bf16.gmra.mxu3 %v376_v50  ;;  %885 = vmatpush.bf16.msrb.mxu2 %v5964_v31  ;;  %v6815_v39 = vld [vmem:[#allocation12 + $0x5e0] sm:$0xf]  ;;  %v8705_v40 = vld [vmem:[#allocation12 + $0x5ec] sm:$0xf0] }
  0xe0   :  { %868 = vmatpush.bf16.msrb.mxu1 %v5884_v59  ;;  %v6688_v59 = vor.u32 %v8673_v57, %v6687_v56  ;;  %v6816_v42 = vor.u32 %v8705_v40, %v6815_v39  ;;  %v6335_v43 = vld [vmem:[#allocation12 + $0x220] sm:$0xf]  ;;  %v8729_v39 = vld [vmem:[#allocation12 + $0x6ac] sm:$0xf0] }
  0xe1   :  { %v312_v9 = vpop.f32.mrf.mxu1  ;;  %v6799_v55 = vld [vmem:[#allocation12 + $0x5c0] sm:$0xf] }
  0xe2   :  { %v313_v13 = vadd.f32 %v312_v9, %v233_v27  ;;  %2565 = vmatpush.bf16.msrb.mxu0 %v6688_v59  ;;  %v6672_v9 = vor.u32 %v8669_v8, %v6671_v7  ;;  %v6319_v59 = vld [vmem:[#allocation12 + $0x200] sm:$0xf]  ;;  %v8697_v7 = vld [vmem:[#allocation12 + $0x5ac] sm:$0xf0] }
  0xe3   :  { %886 = vmatpush.bf16.msrb.mxu2 %v5956_v1  ;;  %v6096_v1 = vor.u32 %v8525_v61, %v6095_v60  ;;  %v8581_v60 = vld [vmem:[#allocation12 + $0x20c] sm:$0xf0]  ;;  %v6607_v61 = vld [vmem:[#allocation12 + $0x440] sm:$0xf] }
  0xe4   :  { %869 = vmatpush.bf16.msrb.mxu1 %v5876_v4  ;;  %v366_v15 = vmax.f32 %v313_v13, 0.0  ;;  %v8597_v4 = vld [vmem:[#allocation12 + $0x28c] sm:$0xf0]  ;;  %v6943_v8 = vld [vmem:[#allocation12 + $0x6e0] sm:$0xf] }
  0xe5   :  { %v8521_v13 = vld [vmem:[#allocation12 + $0x2c] sm:$0xf0]  ;;  %v6511_v18 = vld [vmem:[#allocation12 + $0x380] sm:$0xf] }
  0xe6   :  { %v374_v16 = vpack.c.bf16 %v366_v15, %v362_v14  ;;  %v6207_v14 = vld [vmem:[#allocation12 + $0x120] sm:$0xf]  ;;  %2566 = vmatpush.bf16.msrb.mxu0 %v6672_v9  ;;  %v6080_v15 = vor.u32 %v8521_v13, %v6079_v12  ;;  %v8737_v12 = vld [vmem:[#allocation12 + $0x6ec] sm:$0xf0] }
  0xe7   :  { %794 = vmatmul.bf16.vlgmr.msra.gmra.mxu1 %v370_v5  ;;  %887 = vmatpush.bf16.msrb.mxu2 %v5948_v6  ;;  %v6384_v6 = vor.u32 %v8597_v4, %v6383_v3  ;;  %v8633_v3 = vld [vmem:[#allocation12 + $0x3ac] sm:$0xf0] }
  0xeb   :  { %888 = vmatpush.bf16.msrb.mxu2 %v5940_v11 }
  0xee   :  { %851 = vmatmul.bf16.vlgmr.msra.gmra.mxu2 %v9651_v37  ;;  %v6304_v37 = vor.u32 %v8577_v21, %v6303_v19  ;;  %v6655_v21 = vld [vmem:[#allocation12 + $0x4a0] sm:$0xf] }
  0xef   :  { %908 = vmatmul.bf16.vlgmr.msra.gmra.mxu3 %v9659_v0  ;;  %v6159_v0 = vld [vmem:[#allocation12 + $0xc0] sm:$0xf]  ;;  %2539 = vmatpush.bf16.msra.mxu2 %v6432_v35  ;;  %v6640_v35 = vor.u32 %v8661_v52, %v6639_v33 }
  0xf0   :  { %2526 = vmatpush.bf16.msra.mxu1 %v6304_v37  ;;  %v6160_v25 = vor.u32 %v8541_v23, %v6159_v0  ;;  %v8665_v37 = vld [vmem:[#allocation12 + $0x4ac] sm:$0xf0]  ;;  %v6751_v33 = vld [vmem:[#allocation12 + $0x560] sm:$0xf] }
  0xf1   :  { %v6656_v23 = vor.u32 %v8665_v37, %v6655_v21  ;;  %v8693_v37 = vld [vmem:[#allocation12 + $0x58c] sm:$0xf0] }
  0xf2   :  { %2514 = vmatpush.bf16.msrb.mxu3 %v6160_v25  ;;  %v8517_v25 = vld [vmem:[#allocation12 + $0xc] sm:$0xf0] }
  0xf3   :  { %2540 = vmatpush.bf16.msra.mxu2 %v6416_v45  ;;  %2567 = vmatpush.bf16.msrb.mxu0 %v6656_v23  ;;  %v6623_v45 = vld [vmem:[#allocation12 + $0x460] sm:$0xf] }
  0xf4   :  { %v6927_v23 = vld [vmem:[#allocation12 + $0x6c0] sm:$0xf] }
  0xf7   :  { %799 = vmatmul.bf16.gmra.mxu1 %v374_v16  ;;  %2541 = vmatpush.bf16.msra.mxu2 %v6400_v10 }
  0xf8   :  { %2568 = vmatpush.bf16.msrb.mxu0 %v6640_v35  ;;  %v8689_v35 = vld [vmem:[#allocation12 + $0x56c] sm:$0xf0] }
  0xf9   :  { %v6752_v40 = vor.u32 %v8689_v35, %v6751_v33  ;;  %v8713_v33 = vld [vmem:[#allocation12 + $0x62c] sm:$0xf0] }
  0xfb   :  { %2542 = vmatpush.bf16.msra.mxu2 %v6384_v6  ;;  %v6783_v6 = vld [vmem:[#allocation12 + $0x5a0] sm:$0xf] }
  0xfc   :  { %v6784_v9 = vor.u32 %v8697_v7, %v6783_v6  ;;  %v6879_v6 = vld [vmem:[#allocation12 + $0x660] sm:$0xf]  ;;  %v8721_v7 = vld [vmem:[#allocation12 + $0x66c] sm:$0xf0] }
  0xfe   :  { %856 = vmatmul.bf16.gmra.mxu2 %v9666_v26  ;;  %v8573_v26 = vld [vmem:[#allocation12 + $0x1cc] sm:$0xf0] }
  0xff   :  { %913 = vmatmul.bf16.gmra.mxu3 %v376_v50  ;;  %v6288_v27 = vor.u32 %v8573_v26, %v6287_v24  ;;  %v6239_v50 = vld [vmem:[#allocation12 + $0x160] sm:$0xf]  ;;  %2543 = vmatpush.bf16.msra.mxu2 %v6368_v20 }
 0x100   :  { %v6240_v31 = vor.u32 %v8561_v53, %v6239_v50  ;;  %v6063_v24 = vld [vmem:[#allocation12] sm:$0xf] }
 0x101   :  { %2527 = vmatpush.bf16.msra.mxu1 %v6288_v27  ;;  %v6191_v26 = vld [vmem:[#allocation12 + $0x100] sm:$0xf]  ;;  %v6064_v27 = vor.u32 %v8517_v25, %v6063_v24 }
 0x102   :  { %v6543_v50 = vld [vmem:[#allocation12 + $0x3c0] sm:$0xf] }
 0x103   :  { %v6767_v20 = vld [vmem:[#allocation12 + $0x580] sm:$0xf] }
 0x104   :  { %v6768_v25 = vor.u32 %v8693_v37, %v6767_v20  ;;  %v6703_v20 = vld [vmem:[#allocation12 + $0x500] sm:$0xf]  ;;  %v8677_v37 = vld [vmem:[#allocation12 + $0x50c] sm:$0xf0] }
 0x105   :  { %2528 = vmatpush.bf16.msra.mxu1 %v6272_v34  ;;  %v6559_v34 = vld [vmem:[#allocation12 + $0x3e0] sm:$0xf] }
 0x106   :  { %v6560_v41 = vor.u32 %v8641_v38, %v6559_v34  ;;  %v6911_v38 = vld [vmem:[#allocation12 + $0x6a0] sm:$0xf] }
 0x107   :  { %870 = vmatmul.bf16.vlgmr.msrb.gmra.mxu1 %v370_v5  ;;  %v6224_v5 = vor.u32 %v8557_v2, %v6223_v62  ;;  %v6320_v62 = vor.u32 %v8581_v60, %v6319_v59  ;;  %v6527_v2 = vld [vmem:[#allocation12 + $0x3a0] sm:$0xf]  ;;  %v8539_v59 = vld [vmem:[#allocation12 + $0xc4] sm:$0xf]  ;;  %v6161_v60 = vld [vmem:[#allocation12 + $0xd0] sm:$0xf0] }
 0x109   :  { %2529 = vmatpush.bf16.msra.mxu1 %v6256_v44  ;;  %v8585_v44 = vld [vmem:[#allocation12 + $0x22c] sm:$0xf0] }
 0x10d   :  { %2530 = vmatpush.bf16.msra.mxu1 %v6240_v31  ;;  %v8701_v31 = vld [vmem:[#allocation12 + $0x5cc] sm:$0xf0] }
 0x10e   :  { %889 = vmatmul.bf16.vlgmr.msrb.gmra.mxu2 %v9657_v63  ;;  %v6143_v63 = vld [vmem:[#allocation12 + $0xa0] sm:$0xf]  ;;  %v6800_v56 = vor.u32 %v8701_v31, %v6799_v55 }
 0x10f   :  { %v6144_v30 = vor.u32 %v8537_v28, %v6143_v63  ;;  %v8549_v63 = vld [vmem:[#allocation12 + $0x10c] sm:$0xf0]  ;;  %v6351_v28 = vld [vmem:[#allocation12 + $0x240] sm:$0xf] }
 0x110   :  { %v6352_v32 = vor.u32 %v8589_v29, %v6351_v28  ;;  %v8645_v28 = vld [vmem:[#allocation12 + $0x40c] sm:$0xf0] }
 0x111   :  { %2515 = vmatpush.bf16.msrb.mxu3 %v6144_v30  ;;  %2531 = vmatpush.bf16.msra.mxu1 %v6224_v5  ;;  %v6192_v30 = vor.u32 %v8549_v63, %v6191_v26  ;;  %v6528_v5 = vor.u32 %v8633_v3, %v6527_v2  ;;  %v8733_v26 = vld [vmem:[#allocation12 + $0x6cc] sm:$0xf0]  ;;  %v6575_v63 = vld [vmem:[#allocation12 + $0x400] sm:$0xf] }
 0x112   :  { %2544 = vmatpush.bf16.msra.mxu2 %v6352_v32  ;;  %v6576_v29 = vor.u32 %v8645_v28, %v6575_v63  ;;  %v8625_v32 = vld [vmem:[#allocation12 + $0x36c] sm:$0xf0]  ;;  %v6719_v3 = vld [vmem:[#allocation12 + $0x520] sm:$0xf]  ;;  %v6129_v63 = vld [vmem:[#allocation12 + $0x90] sm:$0xf0] }
 0x113   :  { %v8617_v2 = vld [vmem:[#allocation12 + $0x32c] sm:$0xf0] }
 0x115   :  { %2516 = vmatpush.bf16.msrb.mxu3 %v6128_v49 }
 0x117   :  { %875 = vmatmul.bf16.gmra.mxu1 %v374_v16  ;;  %v8553_v16 = vld [vmem:[#allocation12 + $0x12c] sm:$0xf0] }
 0x118   :  { %v6208_v19 = vor.u32 %v8553_v16, %v6207_v14  ;;  %v6944_v14 = vor.u32 %v8737_v12, %v6943_v8  ;;  %v8649_v16 = vld [vmem:[#allocation12 + $0x42c] sm:$0xf0]  ;;  %v8535_v12 = vld [vmem:[#allocation12 + $0xa4] sm:$0xf] }
 0x11a   :  { %2532 = vmatpush.bf16.msra.mxu1 %v6208_v19  ;;  %v8629_v19 = vld [vmem:[#allocation12 + $0x38c] sm:$0xf0] }
 0x11b   :  { %v6512_v21 = vor.u32 %v8629_v19, %v6511_v18  ;;  %v6447_v18 = vld [vmem:[#allocation12 + $0x300] sm:$0xf]  ;;  %v8613_v19 = vld [vmem:[#allocation12 + $0x30c] sm:$0xf0] }
 0x11e   :  { %894 = vmatmul.bf16.gmra.mxu2 %v375_v48  ;;  %v8529_v48 = vld [vmem:[#allocation12 + $0x6c] sm:$0xf0]  ;;  %2533 = vmatpush.bf16.msra.mxu1 %v6192_v30  ;;  %v6495_v30 = vld [vmem:[#allocation12 + $0x360] sm:$0xf] }
 0x11f   :  { %v6112_v51 = vor.u32 %v8529_v48, %v6111_v47  ;;  %v6336_v47 = vor.u32 %v8585_v44, %v6335_v43  ;;  %v8657_v48 = vld [vmem:[#allocation12 + $0x46c] sm:$0xf0]  ;;  %v6496_v34 = vor.u32 %v8625_v32, %v6495_v30  ;;  %v6177_v43 = vld [vmem:[#allocation12 + $0xf0] sm:$0xf0]  ;;  %v6847_v32 = vld [vmem:[#allocation12 + $0x620] sm:$0xf] }
 0x120   :  { %v6624_v53 = vor.u32 %v8657_v48, %v6623_v45  ;;  %v8621_v48 = vld [vmem:[#allocation12 + $0x34c] sm:$0xf0]  ;;  %v6848_v35 = vor.u32 %v8713_v33, %v6847_v32 }
 0x121   :  { %2517 = vmatpush.bf16.msrb.mxu3 %v6112_v51  ;;  %v8637_v51 = vld [vmem:[#allocation12 + $0x3cc] sm:$0xf0]  ;;  %2545 = vmatpush.bf16.msra.mxu2 %v6336_v47  ;;  %v6479_v47 = vld [vmem:[#allocation12 + $0x340] sm:$0xf] }
 0x122   :  { %2578 = vmatpush.bf16.msrb.mxu1 %v6816_v42  ;;  %v6544_v54 = vor.u32 %v8637_v51, %v6543_v50  ;;  %2569 = vmatpush.bf16.msrb.mxu0 %v6624_v53  ;;  %v8543_v42 = vld [vmem:[#allocation12 + $0xe4] sm:$0xf]  ;;  %v6735_v50 = vld [vmem:[#allocation12 + $0x540] sm:$0xf]  ;;  %v6480_v51 = vor.u32 %v8621_v48, %v6479_v47  ;;  %v8685_v53 = vld [vmem:[#allocation12 + $0x54c] sm:$0xf0] }
 0x123   :  { %v6180_v45 = vor.u32 %v8543_v42, %v6177_v43  ;;  %v6736_v31 = vor.u32 %v8685_v53, %v6735_v50  ;;  %v6831_v43 = vld [vmem:[#allocation12 + $0x600] sm:$0xf]  ;;  %v8523_v50 = vld [vmem:[#allocation12 + $0x44] sm:$0xf] }
 0x125   :  { %2518 = vmatpush.bf16.msrb.mxu3 %v6096_v1  ;;  %v8653_v1 = vld [vmem:[#allocation12 + $0x44c] sm:$0xf0]  ;;  %2546 = vmatpush.bf16.msra.mxu2 %v6320_v62  ;;  %v6164_v62 = vor.u32 %v8539_v59, %v6161_v60  ;;  %v6081_v59 = vld [vmem:[#allocation12 + $0x30] sm:$0xf0] }
 0x126   :  { %2579 = vmatpush.bf16.msrb.mxu1 %v6800_v56  ;;  %v6608_v4 = vor.u32 %v8653_v1, %v6607_v61  ;;  %v8725_v56 = vld [vmem:[#allocation12 + $0x68c] sm:$0xf0]  ;;  %v6463_v1 = vld [vmem:[#allocation12 + $0x320] sm:$0xf] }
 0x128   :  { %2570 = vmatpush.bf16.msrb.mxu0 %v6608_v4  ;;  %v6464_v4 = vor.u32 %v8617_v2, %v6463_v1  ;;  %v8515_v2 = vld [vmem:[#allocation12 + $0x4] sm:$0xf] }
 0x129   :  { %2519 = vmatpush.bf16.msrb.mxu3 %v6080_v15  ;;  %v6591_v15 = vld [vmem:[#allocation12 + $0x420] sm:$0xf]  ;;  %2591 = vmatpush.bf16.msrb.mxu2 %v6944_v14  ;;  %v6145_v14 = vld [vmem:[#allocation12 + $0xb0] sm:$0xf0] }
 0x12a   :  { %v6592_v17 = vor.u32 %v8649_v16, %v6591_v15  ;;  %2580 = vmatpush.bf16.msrb.mxu1 %v6784_v9  ;;  %v6880_v9 = vor.u32 %v8721_v7, %v6879_v6 }
 0x12c   :  { %2571 = vmatpush.bf16.msrb.mxu0 %v6592_v17  ;;  %v6148_v17 = vor.u32 %v8535_v12, %v6145_v14 }
 0x12d   :  { %2520 = vmatpush.bf16.msrb.mxu3 %v6064_v27  ;;  %v6928_v27 = vor.u32 %v8733_v26, %v6927_v23  ;;  %v6863_v23 = vld [vmem:[#allocation12 + $0x640] sm:$0xf]  ;;  %v8717_v26 = vld [vmem:[#allocation12 + $0x64c] sm:$0xf0] }
 0x12e   :  { %2581 = vmatpush.bf16.msrb.mxu1 %v6768_v25  ;;  %v6704_v25 = vor.u32 %v8677_v37, %v6703_v20  ;;  %v7071_v37 = vld [vmem:[#allocation12 + $0x7e0] sm:$0xf] }
 0x12f   :  { %2592 = vmatpush.bf16.msrb.mxu2 %v6928_v27  ;;  %v8531_v27 = vld [vmem:[#allocation12 + $0x84] sm:$0xf] }
 0x130   :  { %2572 = vmatpush.bf16.msrb.mxu0 %v6576_v29  ;;  %v6864_v29 = vor.u32 %v8717_v26, %v6863_v23  ;;  %v6132_v30 = vor.u32 %v8531_v27, %v6129_v63  ;;  %v8575_v26 = vld [vmem:[#allocation12 + $0x1e4] sm:$0xf]  ;;  %v6305_v27 = vld [vmem:[#allocation12 + $0x1f0] sm:$0xf0] }
 0x131   :  { %2552 = vmatpush.bf16.msra.mxu3 %v6560_v41  ;;  %v6912_v41 = vor.u32 %v8729_v39, %v6911_v38  ;;  %v6113_v38 = vld [vmem:[#allocation12 + $0x70] sm:$0xf0]  ;;  %v441_v39 = vld [vmem:[#allocation10] sm:$0x3] }
 0x132   :  { %2582 = vmatpush.bf16.msrb.mxu1 %v6752_v40  ;;  %v9715_v47 = vperm.slane %v441_v39, 0  ;;  %v9722_v1 = vperm.slane %v441_v39, 1 }
 0x133   :  { %2593 = vmatpush.bf16.msrb.mxu2 %v6912_v41 }
 0x134   :  { %2617 = vmatpush.bf16.msra.mxu0 %v6180_v45  ;;  %v8709_v45 = vld [vmem:[#allocation12 + $0x60c] sm:$0xf0] }
 0x135   :  { %2553 = vmatpush.bf16.msra.mxu3 %v6544_v54  ;;  %v6895_v54 = vld [vmem:[#allocation12 + $0x680] sm:$0xf]  ;;  %v6832_v48 = vor.u32 %v8709_v45, %v6831_v43  ;;  %v8571_v43 = vld [vmem:[#allocation12 + $0x1c4] sm:$0xf]  ;;  %v6289_v45 = vld [vmem:[#allocation12 + $0x1d0] sm:$0xf0] }
 0x136   :  { %v6896_v61 = vor.u32 %v8725_v56, %v6895_v54  ;;  %2583 = vmatpush.bf16.msrb.mxu1 %v6736_v31  ;;  %v8519_v56 = vld [vmem:[#allocation12 + $0x24] sm:$0xf] }
 0x138   :  { %2594 = vmatpush.bf16.msrb.mxu2 %v6896_v61  ;;  %2618 = vmatpush.bf16.msra.mxu0 %v6164_v62  ;;  %v6084_v61 = vor.u32 %v8519_v56, %v6081_v59 }
 0x139   :  { %2554 = vmatpush.bf16.msra.mxu3 %v6528_v5  ;;  %v8681_v5 = vld [vmem:[#allocation12 + $0x52c] sm:$0xf0] }
 0x13a   :  { %v6720_v8 = vor.u32 %v8681_v5, %v6719_v3  ;;  %v6065_v3 = vld [vmem:[#allocation12 + $0x10] sm:$0xf0] }
 0x13b   :  { %v6068_v5 = vor.u32 %v8515_v2, %v6065_v3  ;;  %v8607_v3 = vld [vmem:[#allocation12 + $0x2e4] sm:$0xf] }
 0x13c   :  { %2584 = vmatpush.bf16.msrb.mxu1 %v6720_v8  ;;  %2595 = vmatpush.bf16.msrb.mxu2 %v6880_v9 }
 0x13d   :  { %2555 = vmatpush.bf16.msra.mxu3 %v6512_v21  ;;  %v6448_v21 = vor.u32 %v8613_v19, %v6447_v18  ;;  %2619 = vmatpush.bf16.msra.mxu0 %v6148_v17 }
 0x140   :  { %2585 = vmatpush.bf16.msrb.mxu1 %v6704_v25  ;;  %2596 = vmatpush.bf16.msrb.mxu2 %v6864_v29  ;;  %v8769_v25 = vld [vmem:[#allocation12 + $0x7ec] sm:$0xf0] }
 0x141   :  { %2556 = vmatpush.bf16.msra.mxu3 %v6496_v34  ;;  %v8527_v34 = vld [vmem:[#allocation12 + $0x64] sm:$0xf]  ;;  %2620 = vmatpush.bf16.msra.mxu0 %v6132_v30  ;;  %v7072_v33 = vor.u32 %v8769_v25, %v7071_v37 }
 0x142   :  { %v6116_v41 = vor.u32 %v8527_v34, %v6113_v38  ;;  %v6308_v34 = vor.u32 %v8575_v26, %v6305_v27  ;;  %v8559_v25 = vld [vmem:[#allocation12 + $0x164] sm:$0xf] }
 0x144   :  { %v9677_v22 = vpop.f32.mrf.mxu1  ;;  %2597 = vmatpush.bf16.msrb.mxu2 %v6848_v35  ;;  %v7055_v35 = vld [vmem:[#allocation12 + $0x7c0] sm:$0xf] }
 0x145   :  { %2557 = vmatpush.bf16.msra.mxu3 %v6480_v51  ;;  %2621 = vmatpush.bf16.msra.mxu0 %v6116_v41  ;;  %v6097_v51 = vld [vmem:[#allocation12 + $0x50] sm:$0xf0]  ;;  %v777_v31 = vadd.f32 %v9677_v22, %v9715_v47  ;;  %v8765_v41 = vld [vmem:[#allocation12 + $0x7cc] sm:$0xf0] }
 0x146   :  { %v6100_v53 = vor.u32 %v8523_v50, %v6097_v51  ;;  %v7056_v51 = vor.u32 %v8765_v41, %v7055_v35 }
 0x148   :  { %2598 = vmatpush.bf16.msrb.mxu2 %v6832_v48 }
 0x149   :  { %2558 = vmatpush.bf16.msra.mxu3 %v6464_v4  ;;  %2622 = vmatpush.bf16.msra.mxu0 %v6100_v53  ;;  %v6292_v53 = vor.u32 %v8571_v43, %v6289_v45 }
 0x14c   :  { %v9679_v36 = vpop.f32.mrf.mxu1 }
 0x14d   :  { %2559 = vmatpush.bf16.msra.mxu3 %v6448_v21  ;;  %2623 = vmatpush.bf16.msra.mxu0 %v6084_v61  ;;  %v779_v7 = vadd.f32 %v9679_v36, %v9715_v47  ;;  %v8761_v61 = vld [vmem:[#allocation12 + $0x7ac] sm:$0xf0] }
 0x151   :  { %v9681_v46 = vpop.f32.mrf.mxu2  ;;  %2624 = vmatpush.bf16.msra.mxu0 %v6068_v5 }
 0x152   :  { %v9693_v57 = vpop.f32.mrf.mxu3 }
 0x154   :  { %v9683_v58 = vpop.f32.mrf.mxu1 }
 0x155   :  { %v782_v36 = vadd.f32 %v9683_v58, %v9715_v47 }
 0x159   :  { %v9685_v11 = vpop.f32.mrf.mxu2 }
 0x15a   :  { %v9699_v52 = vpop.f32.mrf.mxu3 }
 0x15c   :  { %v9687_v0 = vpop.f32.mrf.mxu1 }
 0x161   :  { %v9689_v49 = vpop.f32.mrf.mxu2 }
 0x162   :  { %v9705_v15 = vpop.f32.mrf.mxu3 }
 0x164   :  { %v9691_v10 = vpop.f32.mrf.mxu1 }
 0x165   :  { %v796_v62 = vadd.f32 %v9691_v10, %v777_v31  ;;  %v784_v31 = vadd.f32 %v9687_v0, %v9715_v47  ;;  %v7023_v0 = vld [vmem:[#allocation12 + $0x780] sm:$0xf] }
 0x167   :  { %v815_v6 = vadd.f32 %v9681_v46, %v796_v62  ;;  %v6273_v62 = vld [vmem:[#allocation12 + $0x1b0] sm:$0xf0] }
 0x169   :  { %v9695_v13 = vpop.f32.mrf.mxu2  ;;  %v834_v14 = vadd.f32 %v9693_v57, %v815_v6 }
 0x16a   :  { %v9713_v42 = vpop.f32.mrf.mxu3 }
 0x16b   :  { %v919_v20 = vmax.f32 %v834_v14, 0.0  ;;  %v8757_v14 = vld [vmem:[#allocation12 + $0x78c] sm:$0xf0] }
 0x16c   :  { %v9697_v24 = vpop.f32.mrf.mxu1  ;;  %v7024_v37 = vor.u32 %v8757_v14, %v7023_v0  ;;  %v6369_v0 = vld [vmem:[#allocation12 + $0x270] sm:$0xf0] }
 0x16d   :  { %v798_v9 = vadd.f32 %v9697_v24, %v779_v7  ;;  %v6657_v14 = vld [vmem:[#allocation12 + $0x4b0] sm:$0xf0] }
 0x16f   :  { %v817_v19 = vadd.f32 %v9685_v11, %v798_v9 }
 0x171   :  { %v9701_v44 = vpop.f32.mrf.mxu2  ;;  %v836_v57 = vadd.f32 %v9699_v52, %v817_v19 }
 0x172   :  { %v909_v4 = vpop.f32.mrf.mxu3  ;;  %v853_v22 = vadd.f32 %v9701_v44, %v9722_v1 }
 0x173   :  { %v921_v48 = vmax.f32 %v836_v57, 0.0 }
 0x174   :  { %v9703_v55 = vpop.f32.mrf.mxu1 }
 0x175   :  { %v801_v11 = vadd.f32 %v9703_v55, %v782_v36 }
 0x177   :  { %v820_v52 = vadd.f32 %v9689_v49, %v801_v11  ;;  %v8567_v49 = vld [vmem:[#allocation12 + $0x1a4] sm:$0xf]  ;;  %v6241_v11 = vld [vmem:[#allocation12 + $0x170] sm:$0xf0] }
 0x178   :  { %v6276_v9 = vor.u32 %v8567_v49, %v6273_v62  ;;  %v6244_v41 = vor.u32 %v8559_v25, %v6241_v11  ;;  %v8667_v49 = vld [vmem:[#allocation12 + $0x4c4] sm:$0xf]  ;;  %v6673_v62 = vld [vmem:[#allocation12 + $0x4d0] sm:$0xf0] }
 0x179   :  { %v9707_v16 = vpop.f32.mrf.mxu2  ;;  %v839_v5 = vadd.f32 %v9705_v15, %v820_v52  ;;  %v8639_v25 = vld [vmem:[#allocation12 + $0x3e4] sm:$0xf] }
 0x17a   :  { %v855_v46 = vadd.f32 %v9707_v16, %v9722_v1  ;;  %v911_v21 = vpop.f32.mrf.mxu3 }
 0x17b   :  { %v923_v15 = vmax.f32 %v839_v5, 0.0  ;;  %v6975_v5 = vld [vmem:[#allocation12 + $0x720] sm:$0xf] }
 0x17c   :  { %v9709_v28 = vpop.f32.mrf.mxu1 }
 0x17d   :  { %v803_v6 = vadd.f32 %v9709_v28, %v784_v31  ;;  %v8595_v31 = vld [vmem:[#allocation12 + $0x284] sm:$0xf] }
 0x17f   :  { %v822_v28 = vadd.f32 %v9695_v13, %v803_v6  ;;  %v8599_v13 = vld [vmem:[#allocation12 + $0x2a4] sm:$0xf]  ;;  %v8745_v6 = vld [vmem:[#allocation12 + $0x72c] sm:$0xf0] }
 0x181   :  { %v9711_v40 = vpop.f32.mrf.mxu2 }
 0x182   :  { %v858_v55 = vadd.f32 %v9711_v40, %v9722_v1  ;;  %v914_v2 = vpop.f32.mrf.mxu3 }
 0x184   :  { %v871_v54 = vpop.f32.mrf.mxu1 }
 0x185   :  { %v872_v8 = vadd.f32 %v871_v54, %v853_v22  ;;  %v7039_v54 = vld [vmem:[#allocation12 + $0x7a0] sm:$0xf] }
 0x189   :  { %v9719_v60 = vpop.f32.mrf.mxu2 }
 0x18a   :  { %v916_v35 = vpop.f32.mrf.mxu3 }
 0x18c   :  { %v873_v10 = vpop.f32.mrf.mxu1 }
 0x18d   :  { %v874_v23 = vadd.f32 %v873_v10, %v855_v46  ;;  %v6417_v46 = vld [vmem:[#allocation12 + $0x2d0] sm:$0xf0] }
 0x191   :  { %v890_v12 = vpop.f32.mrf.mxu2 }
 0x192   :  { %v891_v17 = vadd.f32 %v890_v12, %v872_v8  ;;  %v7040_v8 = vor.u32 %v8761_v61, %v7039_v54  ;;  %v6225_v54 = vld [vmem:[#allocation12 + $0x150] sm:$0xf0] }
 0x194   :  { %v910_v18 = vadd.f32 %v909_v4, %v891_v17  ;;  %v876_v16 = vpop.f32.mrf.mxu1  ;;  %v6433_v4 = vld [vmem:[#allocation12 + $0x2f0] sm:$0xf0]  ;;  %v8563_v17 = vld [vmem:[#allocation12 + $0x184] sm:$0xf] }
 0x195   :  { %v877_v56 = vadd.f32 %v876_v16, %v858_v55  ;;  %v6436_v12 = vor.u32 %v8607_v3, %v6433_v4 }
 0x196   :  { %v920_v44 = vmax.f32 %v910_v18, 0.0  ;;  %v6257_v18 = vld [vmem:[#allocation12 + $0x190] sm:$0xf0] }
 0x197   :  { %v6260_v36 = vor.u32 %v8563_v17, %v6257_v18  ;;  %v6976_v17 = vor.u32 %v8745_v6, %v6975_v5  ;;  %v6959_v18 = vld [vmem:[#allocation12 + $0x700] sm:$0xf] }
 0x198   :  { %v927_v24 = vpack.c.bf16 %v920_v44, %v919_v20  ;;  %v8603_v20 = vld [vmem:[#allocation12 + $0x2c4] sm:$0xf]  ;;  %v860_v44 = vadd.f32 %v9719_v60, %v9722_v1  ;;  %v841_v60 = vadd.f32 %v9713_v42, %v822_v28  ;;  %v6991_v42 = vld [vmem:[#allocation12 + $0x740] sm:$0xf] }
 0x199   :  { %v892_v63 = vpop.f32.mrf.mxu2  ;;  %v6420_v57 = vor.u32 %v8603_v20, %v6417_v46  ;;  %v8547_v28 = vld [vmem:[#allocation12 + $0x104] sm:$0xf] }
 0x19a   :  { %v1209_v29 = vunpack.c.l.b16 %v927_v24  ;;  %v1210_v30 = vunpack.c.h.b16 %v927_v24  ;;  %v893_v32 = vadd.f32 %v892_v63, %v874_v23  ;;  %v7007_v23 = vld [vmem:[#allocation12 + $0x760] sm:$0xf]  ;;  %v8753_v24 = vld [vmem:[#allocation12 + $0x76c] sm:$0xf0] }
 0x19c   :  { %v912_v38 = vadd.f32 %v911_v21, %v893_v32  ;;  %v9738_v39 = vpack.c.b16 %v1209_v29, %v1209_v29  ;;  %v9740_v58 = vpack.c.b16 %v1210_v30, %v1210_v30  ;;  %v878_v19 = vpop.f32.mrf.mxu1  ;;  %v6401_v29 = vld [vmem:[#allocation12 + $0x2b0] sm:$0xf0] }
 0x19d   :  { %v879_v26 = vadd.f32 %v878_v19, %v860_v44  ;;  %v6404_v43 = vor.u32 %v8599_v13, %v6401_v29  ;;  %v6193_v44 = vld [vmem:[#allocation12 + $0x110] sm:$0xf0] }
 0x19e   :  { %v922_v50 = vmax.f32 %v912_v38, 0.0  ;;  %2521 = vmatmul.bf16.vlgmr.msrb.gmra.mxu3 %v9738_v39  ;;  %2534 = vmatmul.bf16.vlgmr.msra.gmra.mxu1 %v9740_v58  ;;  %v7008_v38 = vor.u32 %v8753_v24, %v7007_v23  ;;  %v8659_v23 = vld [vmem:[#allocation12 + $0x484] sm:$0xf]  ;;  %v6641_v24 = vld [vmem:[#allocation12 + $0x490] sm:$0xf0]  ;;  %v6196_v11 = vor.u32 %v8547_v28, %v6193_v44 }
 0x19f   :  { %2604 = vmatpush.bf16.msrb.mxu3 %v7072_v33  ;;  %2630 = vmatpush.bf16.msra.mxu1 %v6308_v34  ;;  %v8671_v33 = vld [vmem:[#allocation12 + $0x4e4] sm:$0xf]  ;;  %v6689_v34 = vld [vmem:[#allocation12 + $0x4f0] sm:$0xf0] }
 0x1a0   :  { %v929_v59 = vpack.c.bf16 %v922_v50, %v921_v48  ;;  %v8749_v50 = vld [vmem:[#allocation12 + $0x74c] sm:$0xf0]  ;;  %v6577_v28 = vld [vmem:[#allocation12 + $0x410] sm:$0xf0] }
 0x1a1   :  { %v895_v40 = vpop.f32.mrf.mxu2 }
 0x1a2   :  { %v896_v22 = vadd.f32 %v895_v40, %v877_v56  ;;  %v1211_v7 = vunpack.c.l.b16 %v929_v59  ;;  %v1212_v63 = vunpack.c.h.b16 %v929_v59  ;;  %v6385_v56 = vld [vmem:[#allocation12 + $0x290] sm:$0xf0]  ;;  %v925_v59 = vmax.f32 %v841_v60, 0.0 }
 0x1a3   :  { %2605 = vmatpush.bf16.msrb.mxu3 %v7056_v51  ;;  %2631 = vmatpush.bf16.msra.mxu1 %v6292_v53  ;;  %v8555_v51 = vld [vmem:[#allocation12 + $0x144] sm:$0xf]  ;;  %v6692_v53 = vor.u32 %v8671_v33, %v6689_v34  ;;  %v6388_v4 = vor.u32 %v8595_v31, %v6385_v56  ;;  %v6625_v34 = vld [vmem:[#allocation12 + $0x470] sm:$0xf0] }
 0x1a4   :  { %v915_v47 = vadd.f32 %v914_v2, %v896_v22  ;;  %v9751_v10 = vpack.c.b16 %v1211_v7, %v1211_v7  ;;  %v9758_v48 = vpack.c.b16 %v1212_v63, %v1212_v63  ;;  %v6992_v2 = vor.u32 %v8749_v50, %v6991_v42  ;;  %v8551_v22 = vld [vmem:[#allocation12 + $0x124] sm:$0xf]  ;;  %v6817_v63 = vld [vmem:[#allocation12 + $0x5f0] sm:$0xf0] }
 0x1a5   :  { %v6228_v3 = vor.u32 %v8555_v51, %v6225_v54  ;;  %v6676_v7 = vor.u32 %v8667_v49, %v6673_v62  ;;  %v8579_v50 = vld [vmem:[#allocation12 + $0x204] sm:$0xf]  ;;  %v6321_v54 = vld [vmem:[#allocation12 + $0x210] sm:$0xf0] }
 0x1a6   :  { %v924_v21 = vmax.f32 %v915_v47, 0.0  ;;  %2547 = vmatmul.bf16.vlgmr.msra.gmra.mxu2 %v9751_v10  ;;  %v8651_v31 = vld [vmem:[#allocation12 + $0x444] sm:$0xf]  ;;  %v6609_v56 = vld [vmem:[#allocation12 + $0x450] sm:$0xf0] }
 0x1a7   :  { %2606 = vmatpush.bf16.msrb.mxu3 %v7040_v8  ;;  %2632 = vmatpush.bf16.msra.mxu1 %v6276_v9  ;;  %v6209_v8 = vld [vmem:[#allocation12 + $0x130] sm:$0xf0]  ;;  %v8591_v9 = vld [vmem:[#allocation12 + $0x264] sm:$0xf]  ;;  %v6612_v5 = vor.u32 %v8651_v31, %v6609_v56 }
 0x1a8   :  { %v931_v27 = vpack.c.bf16 %v924_v21, %v923_v15  ;;  %2643 = vmatpush.bf16.msra.mxu2 %v6436_v12  ;;  %v8663_v12 = vld [vmem:[#allocation12 + $0x4a4] sm:$0xf]  ;;  %v6212_v20 = vor.u32 %v8551_v22, %v6209_v8  ;;  %v6372_v46 = vor.u32 %v8591_v9, %v6369_v0  ;;  %v8741_v15 = vld [vmem:[#allocation12 + $0x70c] sm:$0xf0]  ;;  %v6529_v49 = vld [vmem:[#allocation12 + $0x3b0] sm:$0xf0] }
 0x1a9   :  { %v897_v30 = vpop.f32.mrf.mxu2  ;;  %v6660_v21 = vor.u32 %v8663_v12, %v6657_v14  ;;  %v8695_v62 = vld [vmem:[#allocation12 + $0x5a4] sm:$0xf]  ;;  %v6769_v14 = vld [vmem:[#allocation12 + $0x590] sm:$0xf0] }
 0x1aa   :  { %v1213_v1 = vunpack.c.l.b16 %v931_v27  ;;  %v1214_v32 = vunpack.c.h.b16 %v931_v27  ;;  %v898_v16 = vadd.f32 %v897_v30, %v879_v26  ;;  %v6561_v26 = vld [vmem:[#allocation12 + $0x3f0] sm:$0xf0]  ;;  %v6960_v27 = vor.u32 %v8741_v15, %v6959_v18  ;;  %v8647_v22 = vld [vmem:[#allocation12 + $0x424] sm:$0xf] }
 0x1ab   :  { %2607 = vmatpush.bf16.msrb.mxu3 %v7024_v37  ;;  %2633 = vmatpush.bf16.msra.mxu1 %v6260_v36  ;;  %v8587_v37 = vld [vmem:[#allocation12 + $0x244] sm:$0xf]  ;;  %v6353_v36 = vld [vmem:[#allocation12 + $0x250] sm:$0xf0]  ;;  %v6644_v30 = vor.u32 %v8659_v23, %v6641_v24  ;;  %v6564_v60 = vor.u32 %v8639_v25, %v6561_v26 }
 0x1ac   :  { %v917_v45 = vadd.f32 %v916_v35, %v898_v16  ;;  %2644 = vmatpush.bf16.msra.mxu2 %v6420_v57  ;;  %v9760_v52 = vpack.c.b16 %v1213_v1, %v1213_v1  ;;  %v9762_v55 = vpack.c.b16 %v1214_v32, %v1214_v32  ;;  %v8703_v57 = vld [vmem:[#allocation12 + $0x5e4] sm:$0xf]  ;;  %v6356_v13 = vor.u32 %v8587_v37, %v6353_v36  ;;  %v6337_v32 = vld [vmem:[#allocation12 + $0x230] sm:$0xf0] }
 0x1ad   :  { %v8583_v1 = vld [vmem:[#allocation12 + $0x224] sm:$0xf]  ;;  %v6820_v33 = vor.u32 %v8703_v57, %v6817_v63  ;;  %v6929_v18 = vld [vmem:[#allocation12 + $0x6d0] sm:$0xf0]  ;;  %v8546_v57 = vld [vmem:[#allocation12 + $0xf4] sm:$0xf0] }
 0x1ae   :  { %v926_v61 = vmax.f32 %v917_v45, 0.0  ;;  %2560 = vmatmul.bf16.vlgmr.msra.gmra.mxu3 %v9758_v48  ;;  %2573 = vmatmul.bf16.vlgmr.msrb.gmra.mxu0 %v9760_v52  ;;  %v8655_v16 = vld [vmem:[#allocation12 + $0x464] sm:$0xf]  ;;  %v6340_v42 = vor.u32 %v8583_v1, %v6337_v32  ;;  %v6497_v36 = vld [vmem:[#allocation12 + $0x370] sm:$0xf0] }
 0x1af   :  { %2586 = vmatmul.bf16.vlgmr.msrb.gmra.mxu1 %v9762_v55  ;;  %2608 = vmatpush.bf16.msrb.mxu3 %v7008_v38  ;;  %v8635_v35 = vld [vmem:[#allocation12 + $0x3c4] sm:$0xf]  ;;  %v6545_v38 = vld [vmem:[#allocation12 + $0x3d0] sm:$0xf0]  ;;  %v6628_v51 = vor.u32 %v8655_v16, %v6625_v34 }
 0x1b0   :  { %v933_v40 = vpack.c.bf16 %v926_v61, %v925_v59  ;;  %2634 = vmatpush.bf16.msra.mxu1 %v6244_v41  ;;  %2645 = vmatpush.bf16.msra.mxu2 %v6404_v43  ;;  %v8699_v41 = vld [vmem:[#allocation12 + $0x5c4] sm:$0xf]  ;;  %v6801_v43 = vld [vmem:[#allocation12 + $0x5d0] sm:$0xf0] }
 0x1b1   :  { %2669 = vmatpush.bf16.msrb.mxu0 %v6692_v53  ;;  %v6548_v53 = vor.u32 %v8635_v35, %v6545_v38  ;;  %v6804_v59 = vor.u32 %v8699_v41, %v6801_v43  ;;  %v8631_v61 = vld [vmem:[#allocation12 + $0x3a4] sm:$0xf]  ;;  %v6753_v24 = vld [vmem:[#allocation12 + $0x570] sm:$0xf0]  ;;  %v6167_v35 = vld [vmem:[#allocation12 + $0xc8] sm:$0xf] }
 0x1b2   :  { %v1215_v47 = vunpack.c.l.b16 %v933_v40  ;;  %v1216_v29 = vunpack.c.h.b16 %v933_v40  ;;  %v8735_v40 = vld [vmem:[#allocation12 + $0x6e4] sm:$0xf]  ;;  %v6532_v6 = vor.u32 %v8631_v61, %v6529_v49  ;;  %v6913_v26 = vld [vmem:[#allocation12 + $0x6b0] sm:$0xf0]  ;;  %v8542_v38 = vld [vmem:[#allocation12 + $0xd4] sm:$0xf0] }
 0x1b3   :  { %2609 = vmatpush.bf16.msrb.mxu3 %v6992_v2  ;;  %v6785_v2 = vld [vmem:[#allocation12 + $0x5b0] sm:$0xf0]  ;;  %v8627_v0 = vld [vmem:[#allocation12 + $0x384] sm:$0xf]  ;;  %v6151_v61 = vld [vmem:[#allocation12 + $0xa8] sm:$0xf] }
 0x1b4   :  { %2635 = vmatpush.bf16.msra.mxu1 %v6228_v3  ;;  %2646 = vmatpush.bf16.msra.mxu2 %v6388_v4  ;;  %v9767_v19 = vpack.c.b16 %v1215_v47, %v1215_v47  ;;  %v9770_v45 = vpack.c.b16 %v1216_v29, %v1216_v29  ;;  %v6945_v3 = vld [vmem:[#allocation12 + $0x6f0] sm:$0xf0]  ;;  %v6324_v4 = vor.u32 %v8579_v50, %v6321_v54  ;;  %v8691_v12 = vld [vmem:[#allocation12 + $0x584] sm:$0xf]  ;;  %v8538_v49 = vld [vmem:[#allocation12 + $0xb4] sm:$0xf0] }
 0x1b5   :  { %2670 = vmatpush.bf16.msrb.mxu0 %v6676_v7  ;;  %v6593_v7 = vld [vmem:[#allocation12 + $0x430] sm:$0xf0]  ;;  %v6788_v8 = vor.u32 %v8695_v62, %v6785_v2  ;;  %v6948_v9 = vor.u32 %v8735_v40, %v6945_v3  ;;  %v8643_v15 = vld [vmem:[#allocation12 + $0x404] sm:$0xf]  ;;  %v6772_v44 = vor.u32 %v8691_v12, %v6769_v14  ;;  %v6168_v54 = vor.u32 %v8542_v38, %v6167_v35  ;;  %v6439_v35 = vld [vmem:[#allocation12 + $0x2e8] sm:$0xf] }
 0x1b6   :  { %2599 = vmatmul.bf16.vlgmr.msrb.gmra.mxu2 %v9767_v19  ;;  %v6513_v47 = vld [vmem:[#allocation12 + $0x390] sm:$0xf0]  ;;  %v8623_v37 = vld [vmem:[#allocation12 + $0x364] sm:$0xf]  ;;  %v6580_v63 = vor.u32 %v8643_v15, %v6577_v28  ;;  %v8610_v38 = vld [vmem:[#allocation12 + $0x2f4] sm:$0xf0] }
 0x1b7   :  { %2610 = vmatpush.bf16.msrb.mxu3 %v6976_v17  ;;  %v8731_v17 = vld [vmem:[#allocation12 + $0x6c4] sm:$0xf]  ;;  %v6737_v16 = vld [vmem:[#allocation12 + $0x550] sm:$0xf0] }
 0x1b8   :  { %2636 = vmatpush.bf16.msra.mxu1 %v6212_v20  ;;  %2647 = vmatpush.bf16.msra.mxu2 %v6372_v46  ;;  %v6596_v20 = vor.u32 %v8647_v22, %v6593_v7  ;;  %v6516_v46 = vor.u32 %v8627_v0, %v6513_v47  ;;  %v8687_v23 = vld [vmem:[#allocation12 + $0x564] sm:$0xf]  ;;  %v6897_v34 = vld [vmem:[#allocation12 + $0x690] sm:$0xf0]  ;;  %v6152_v22 = vor.u32 %v8538_v49, %v6151_v61  ;;  %v8534_v0 = vld [vmem:[#allocation12 + $0x94] sm:$0xf0] }
 0x1b9   :  { %2671 = vmatpush.bf16.msrb.mxu0 %v6660_v21  ;;  %v6932_v21 = vor.u32 %v8731_v17, %v6929_v18  ;;  %v8727_v25 = vld [vmem:[#allocation12 + $0x6a4] sm:$0xf]  ;;  %v6721_v31 = vld [vmem:[#allocation12 + $0x530] sm:$0xf0]  ;;  %v6311_v17 = vld [vmem:[#allocation12 + $0x1e8] sm:$0xf] }
 0x1ba   :  { %v6916_v29 = vor.u32 %v8727_v25, %v6913_v26  ;;  %v8683_v1 = vld [vmem:[#allocation12 + $0x544] sm:$0xf]  ;;  %v7073_v12 = vld [vmem:[#allocation12 + $0x7f0] sm:$0xf0]  ;;  %v8578_v18 = vld [vmem:[#allocation12 + $0x1f4] sm:$0xf0] }
 0x1bb   :  { %2611 = vmatpush.bf16.msrb.mxu3 %v6960_v27  ;;  %v6183_v27 = vld [vmem:[#allocation12 + $0xe8] sm:$0xf]  ;;  %v6740_v43 = vor.u32 %v8683_v1, %v6737_v16  ;;  %v8615_v50 = vld [vmem:[#allocation12 + $0x324] sm:$0xf]  ;;  %v7057_v25 = vld [vmem:[#allocation12 + $0x7d0] sm:$0xf0] }
 0x1bc   :  { %2637 = vmatpush.bf16.msra.mxu1 %v6196_v11  ;;  %2648 = vmatpush.bf16.msra.mxu2 %v6356_v13  ;;  %v6500_v11 = vor.u32 %v8623_v37, %v6497_v36  ;;  %v6756_v13 = vor.u32 %v8687_v23, %v6753_v24  ;;  %v6184_v32 = vor.u32 %v8546_v57, %v6183_v27  ;;  %v8719_v56 = vld [vmem:[#allocation12 + $0x664] sm:$0xf]  ;;  %v6119_v37 = vld [vmem:[#allocation12 + $0x68] sm:$0xf]  ;;  %v8530_v23 = vld [vmem:[#allocation12 + $0x74] sm:$0xf0] }
 0x1bd   :  { %2672 = vmatpush.bf16.msrb.mxu0 %v6644_v30  ;;  %v8619_v30 = vld [vmem:[#allocation12 + $0x344] sm:$0xf]  ;;  %v6312_v36 = vor.u32 %v8578_v18, %v6311_v17  ;;  %v6295_v26 = vld [vmem:[#allocation12 + $0x1c8] sm:$0xf]  ;;  %v8574_v27 = vld [vmem:[#allocation12 + $0x1d4] sm:$0xf0] }
 0x1be   :  { %2612 = vmatmul.bf16.vlgmr.msrb.gmra.mxu3 %v9770_v45  ;;  %2625 = vmatmul.bf16.vlgmr.msra.gmra.mxu0 %v9738_v39  ;;  %v8611_v2 = vld [vmem:[#allocation12 + $0x304] sm:$0xf]  ;;  %v6296_v1 = vor.u32 %v8574_v27, %v6295_v26  ;;  %v7041_v16 = vld [vmem:[#allocation12 + $0x7b0] sm:$0xf0]  ;;  %v8566_v61 = vld [vmem:[#allocation12 + $0x194] sm:$0xf0] }
 0x1bf   :  { %2656 = vmatpush.bf16.msra.mxu3 %v6564_v60  ;;  %2638 = vmatmul.bf16.vlgmr.msra.gmra.mxu1 %v9740_v58  ;;  %v6481_v60 = vld [vmem:[#allocation12 + $0x350] sm:$0xf0]  ;;  %v8715_v7 = vld [vmem:[#allocation12 + $0x644] sm:$0xf]  ;;  %v6423_v49 = vld [vmem:[#allocation12 + $0x2c8] sm:$0xf] }
 0x1c0   :  { %2682 = vmatpush.bf16.msrb.mxu1 %v6820_v33  ;;  %2649 = vmatpush.bf16.msra.mxu2 %v6340_v42  ;;  %v8723_v33 = vld [vmem:[#allocation12 + $0x684] sm:$0xf]  ;;  %v6484_v41 = vor.u32 %v8619_v30, %v6481_v60  ;;  %v6103_v30 = vld [vmem:[#allocation12 + $0x48] sm:$0xf]  ;;  %v8526_v60 = vld [vmem:[#allocation12 + $0x54] sm:$0xf0] }
 0x1c1   :  { %2673 = vmatpush.bf16.msrb.mxu0 %v6628_v51  ;;  %v6900_v42 = vor.u32 %v8723_v33, %v6897_v34  ;;  %v6465_v51 = vld [vmem:[#allocation12 + $0x330] sm:$0xf0]  ;;  %v8767_v47 = vld [vmem:[#allocation12 + $0x7e4] sm:$0xf]  ;;  %v6279_v33 = vld [vmem:[#allocation12 + $0x1a8] sm:$0xf] }
 0x1c2   :  { %v6468_v62 = vor.u32 %v8615_v50, %v6465_v51  ;;  %v7076_v28 = vor.u32 %v8767_v47, %v7073_v12  ;;  %v8763_v24 = vld [vmem:[#allocation12 + $0x7c4] sm:$0xf]  ;;  %v8570_v34 = vld [vmem:[#allocation12 + $0x1b4] sm:$0xf0]  ;;  %v6087_v50 = vld [vmem:[#allocation12 + $0x28] sm:$0xf] }
 0x1c3   :  { %2657 = vmatpush.bf16.msra.mxu3 %v6548_v53  ;;  %v8679_v53 = vld [vmem:[#allocation12 + $0x524] sm:$0xf]  ;;  %v8522_v51 = vld [vmem:[#allocation12 + $0x34] sm:$0xf0]  ;;  %v6695_v12 = vld [vmem:[#allocation12 + $0x4e8] sm:$0xf] }
 0x1c4   :  { %2683 = vmatpush.bf16.msrb.mxu1 %v6804_v59  ;;  %2650 = vmatpush.bf16.msra.mxu2 %v6324_v4  ;;  %v6881_v59 = vld [vmem:[#allocation12 + $0x670] sm:$0xf0]  ;;  %v6724_v40 = vor.u32 %v8679_v53, %v6721_v31  ;;  %v6280_v53 = vor.u32 %v8570_v34, %v6279_v33  ;;  %v8755_v31 = vld [vmem:[#allocation12 + $0x784] sm:$0xf]  ;;  %v8602_v47 = vld [vmem:[#allocation12 + $0x2b4] sm:$0xf0] }
 0x1c5   :  { %2674 = vmatpush.bf16.msrb.mxu0 %v6612_v5  ;;  %v6884_v3 = vor.u32 %v8719_v56, %v6881_v59  ;;  %v6449_v4 = vld [vmem:[#allocation12 + $0x310] sm:$0xf0]  ;;  %v8675_v5 = vld [vmem:[#allocation12 + $0x504] sm:$0xf]  ;;  %v6263_v59 = vld [vmem:[#allocation12 + $0x188] sm:$0xf] }
 0x1c6   :  { %v6452_v14 = vor.u32 %v8611_v2, %v6449_v4  ;;  %v7025_v56 = vld [vmem:[#allocation12 + $0x790] sm:$0xf0]  ;;  %v6088_v2 = vor.u32 %v8522_v51, %v6087_v50  ;;  %v8518_v4 = vld [vmem:[#allocation12 + $0x14] sm:$0xf0]  ;;  %v8739_v34 = vld [vmem:[#allocation12 + $0x704] sm:$0xf] }
 0x1c7   :  { %2658 = vmatpush.bf16.msra.mxu3 %v6532_v6  ;;  %2651 = vmatmul.bf16.vlgmr.msra.gmra.mxu2 %v9751_v10  ;;  %v6705_v6 = vld [vmem:[#allocation12 + $0x510] sm:$0xf0]  ;;  %v6359_v51 = vld [vmem:[#allocation12 + $0x248] sm:$0xf] }
 0x1c8   :  { %2684 = vmatpush.bf16.msrb.mxu1 %v6788_v8  ;;  %2695 = vmatpush.bf16.msrb.mxu2 %v6948_v9  ;;  %v6865_v8 = vld [vmem:[#allocation12 + $0x650] sm:$0xf0]  ;;  %v6135_v9 = vld [vmem:[#allocation12 + $0x88] sm:$0xf] }
 0x1c9   :  { %2675 = vmatpush.bf16.msrb.mxu0 %v6596_v20  ;;  %v6708_v20 = vor.u32 %v8675_v5, %v6705_v6  ;;  %v6136_v15 = vor.u32 %v8534_v0, %v6135_v9  ;;  %v6264_v5 = vor.u32 %v8566_v61, %v6263_v59  ;;  %v8562_v9 = vld [vmem:[#allocation12 + $0x174] sm:$0xf0]  ;;  %v6407_v0 = vld [vmem:[#allocation12 + $0x2a8] sm:$0xf] }
 0x1ca   :  { %v8642_v59 = vld [vmem:[#allocation12 + $0x3f4] sm:$0xf0] }
 0x1cb   :  { %2659 = vmatpush.bf16.msra.mxu3 %v6516_v46  ;;  %v6868_v46 = vor.u32 %v8715_v7, %v6865_v8  ;;  %v7009_v7 = vld [vmem:[#allocation12 + $0x770] sm:$0xf0]  ;;  %v6247_v8 = vld [vmem:[#allocation12 + $0x168] sm:$0xf] }
 0x1cc   :  { %2685 = vmatpush.bf16.msrb.mxu1 %v6772_v44  ;;  %2696 = vmatpush.bf16.msrb.mxu2 %v6932_v21  ;;  %v8711_v44 = vld [vmem:[#allocation12 + $0x624] sm:$0xf]  ;;  %v6849_v21 = vld [vmem:[#allocation12 + $0x630] sm:$0xf0] }
 0x1cd   :  { %2676 = vmatpush.bf16.msrb.mxu0 %v6580_v63  ;;  %v6852_v57 = vor.u32 %v8711_v44, %v6849_v21  ;;  %v8707_v63 = vld [vmem:[#allocation12 + $0x604] sm:$0xf]  ;;  %v6231_v44 = vld [vmem:[#allocation12 + $0x148] sm:$0xf] }
 0x1cf   :  { %2660 = vmatpush.bf16.msra.mxu3 %v6500_v11  ;;  %v6120_v11 = vor.u32 %v8530_v23, %v6119_v37  ;;  %v8558_v37 = vld [vmem:[#allocation12 + $0x154] sm:$0xf0] }
 0x1d0   :  { %2686 = vmatpush.bf16.msrb.mxu1 %v6756_v13  ;;  %2697 = vmatpush.bf16.msrb.mxu2 %v6916_v29  ;;  %v7060_v13 = vor.u32 %v8763_v24, %v7057_v25  ;;  %v6833_v29 = vld [vmem:[#allocation12 + $0x610] sm:$0xf0]  ;;  %v8598_v23 = vld [vmem:[#allocation12 + $0x294] sm:$0xf0]  ;;  %v6679_v24 = vld [vmem:[#allocation12 + $0x4c8] sm:$0xf]  ;;  %v6232_v27 = vor.u32 %v8558_v37, %v6231_v44 }
 0x1d1   :  { %2721 = vmatpush.bf16.msra.mxu0 %v6184_v32  ;;  %v8759_v32 = vld [vmem:[#allocation12 + $0x7a4] sm:$0xf]  ;;  %v8670_v25 = vld [vmem:[#allocation12 + $0x4d4] sm:$0xf0] }
 0x1d2   :  { %2677 = vmatmul.bf16.vlgmr.msrb.gmra.mxu0 %v9760_v52  ;;  %v8634_v37 = vld [vmem:[#allocation12 + $0x3b4] sm:$0xf0] }
 0x1d3   :  { %2661 = vmatpush.bf16.msra.mxu3 %v6484_v41  ;;  %v6836_v41 = vor.u32 %v8707_v63, %v6833_v29  ;;  %v8743_v63 = vld [vmem:[#allocation12 + $0x724] sm:$0xf]  ;;  %v6680_v29 = vor.u32 %v8670_v25, %v6679_v24  ;;  %v6951_v24 = vld [vmem:[#allocation12 + $0x6e8] sm:$0xf]  ;;  %v8738_v25 = vld [vmem:[#allocation12 + $0x6f4] sm:$0xf0] }
 0x1d4   :  { %2687 = vmatpush.bf16.msrb.mxu1 %v6740_v43  ;;  %2698 = vmatpush.bf16.msrb.mxu2 %v6900_v42  ;;  %v6104_v43 = vor.u32 %v8526_v60, %v6103_v30  ;;  %v7044_v42 = vor.u32 %v8759_v32, %v7041_v16  ;;  %v8554_v30 = vld [vmem:[#allocation12 + $0x134] sm:$0xf0]  ;;  %v6375_v60 = vld [vmem:[#allocation12 + $0x268] sm:$0xf] }
 0x1d5   :  { %2722 = vmatpush.bf16.msra.mxu0 %v6168_v54  ;;  %v6440_v54 = vor.u32 %v8610_v38, %v6439_v35  ;;  %v6663_v32 = vld [vmem:[#allocation12 + $0x4a8] sm:$0xf]  ;;  %v8666_v16 = vld [vmem:[#allocation12 + $0x4b4] sm:$0xf0] }
 0x1d6   :  { %v6664_v50 = vor.u32 %v8666_v16, %v6663_v32  ;;  %v8694_v32 = vld [vmem:[#allocation12 + $0x594] sm:$0xf0]  ;;  %v6935_v16 = vld [vmem:[#allocation12 + $0x6c8] sm:$0xf] }
 0x1d7   :  { %2662 = vmatpush.bf16.msra.mxu3 %v6468_v62  ;;  %v8606_v62 = vld [vmem:[#allocation12 + $0x2d4] sm:$0xf0] }
 0x1d8   :  { %2688 = vmatpush.bf16.msrb.mxu1 %v6724_v40  ;;  %2699 = vmatpush.bf16.msrb.mxu2 %v6884_v3  ;;  %v7028_v40 = vor.u32 %v8755_v31, %v7025_v56  ;;  %v6071_v3 = vld [vmem:[#allocation12 + $0x8] sm:$0xf]  ;;  %v6424_v6 = vor.u32 %v8606_v62, %v6423_v49  ;;  %v8662_v31 = vld [vmem:[#allocation12 + $0x494] sm:$0xf0] }
 0x1d9   :  { %2723 = vmatpush.bf16.msra.mxu0 %v6152_v22  ;;  %v8751_v22 = vld [vmem:[#allocation12 + $0x764] sm:$0xf]  ;;  %v6072_v17 = vor.u32 %v8518_v4, %v6071_v3  ;;  %v6567_v56 = vld [vmem:[#allocation12 + $0x3e8] sm:$0xf]  ;;  %v8706_v62 = vld [vmem:[#allocation12 + $0x5f4] sm:$0xf0] }
 0x1da   :  { %v7012_v18 = vor.u32 %v8751_v22, %v7009_v7  ;;  %v6823_v49 = vld [vmem:[#allocation12 + $0x5e8] sm:$0xf]  ;;  %v6568_v4 = vor.u32 %v8642_v59, %v6567_v56  ;;  %v8730_v56 = vld [vmem:[#allocation12 + $0x6b4] sm:$0xf0]  ;;  %v8544_v59 = vld [vmem:[#allocation12 + $0xec] sm:$0xf] }
 0x1db   :  { %2663 = vmatpush.bf16.msra.mxu3 %v6452_v14  ;;  %v8674_v14 = vld [vmem:[#allocation12 + $0x4f4] sm:$0xf0]  ;;  %v6631_v22 = vld [vmem:[#allocation12 + $0x468] sm:$0xf]  ;;  %v6824_v7 = vor.u32 %v8706_v62, %v6823_v49 }
 0x1dc   :  { %2689 = vmatpush.bf16.msrb.mxu1 %v6708_v20  ;;  %2700 = vmatpush.bf16.msrb.mxu2 %v6868_v46  ;;  %v6248_v20 = vor.u32 %v8562_v9, %v6247_v8  ;;  %v6408_v46 = vor.u32 %v8602_v47, %v6407_v0  ;;  %v6696_v21 = vor.u32 %v8674_v14, %v6695_v12  ;;  %v8658_v8 = vld [vmem:[#allocation12 + $0x474] sm:$0xf0]  ;;  %v6551_v9 = vld [vmem:[#allocation12 + $0x3c8] sm:$0xf] }
 0x1dd   :  { %2724 = vmatpush.bf16.msra.mxu0 %v6136_v15  ;;  %v8747_v15 = vld [vmem:[#allocation12 + $0x744] sm:$0xf]  ;;  %v8638_v0 = vld [vmem:[#allocation12 + $0x3d4] sm:$0xf0]  ;;  %v6807_v47 = vld [vmem:[#allocation12 + $0x5c8] sm:$0xf] }
 0x1de   :  { %2664 = vmatmul.bf16.vlgmr.msra.gmra.mxu3 %v9758_v48  ;;  %v8702_v12 = vld [vmem:[#allocation12 + $0x5d4] sm:$0xf0] }
 0x1df   :  { %2708 = vmatpush.bf16.msrb.mxu3 %v7076_v28  ;;  %2690 = vmatmul.bf16.vlgmr.msrb.gmra.mxu1 %v9762_v55  ;;  %v6993_v28 = vld [vmem:[#allocation12 + $0x750] sm:$0xf0]  ;;  %v6808_v44 = vor.u32 %v8702_v12, %v6807_v47 }
 0x1e0   :  { %2734 = vmatpush.bf16.msra.mxu1 %v6312_v36  ;;  %2701 = vmatpush.bf16.msrb.mxu2 %v6852_v57  ;;  %v6391_v36 = vld [vmem:[#allocation12 + $0x288] sm:$0xf]  ;;  %v6996_v26 = vor.u32 %v8747_v15, %v6993_v28  ;;  %v8654_v28 = vld [vmem:[#allocation12 + $0x454] sm:$0xf0] }
 0x1e1   :  { %2725 = vmatpush.bf16.msra.mxu0 %v6120_v11  ;;  %v6392_v57 = vor.u32 %v8598_v23, %v6391_v36  ;;  %v6977_v11 = vld [vmem:[#allocation12 + $0x730] sm:$0xf0]  ;;  %v6615_v15 = vld [vmem:[#allocation12 + $0x448] sm:$0xf]  ;;  %v8698_v23 = vld [vmem:[#allocation12 + $0x5b4] sm:$0xf0] }
 0x1e2   :  { %v6980_v33 = vor.u32 %v8743_v63, %v6977_v11  ;;  %v6791_v36 = vld [vmem:[#allocation12 + $0x5a8] sm:$0xf]  ;;  %v8650_v11 = vld [vmem:[#allocation12 + $0x434] sm:$0xf0] }
 0x1e3   :  { %2709 = vmatpush.bf16.msrb.mxu3 %v7060_v13  ;;  %v6215_v13 = vld [vmem:[#allocation12 + $0x128] sm:$0xf] }
 0x1e4   :  { %2735 = vmatpush.bf16.msra.mxu1 %v6296_v1  ;;  %2702 = vmatpush.bf16.msrb.mxu2 %v6836_v41  ;;  %v8594_v1 = vld [vmem:[#allocation12 + $0x274] sm:$0xf0]  ;;  %v6216_v35 = vor.u32 %v8554_v30, %v6215_v13  ;;  %v6961_v41 = vld [vmem:[#allocation12 + $0x710] sm:$0xf0]  ;;  %v6599_v63 = vld [vmem:[#allocation12 + $0x428] sm:$0xf]  ;;  %v6792_v13 = vor.u32 %v8698_v23, %v6791_v36 }
 0x1e5   :  { %2726 = vmatpush.bf16.msra.mxu0 %v6104_v43  ;;  %v6376_v38 = vor.u32 %v8594_v1, %v6375_v60  ;;  %v6199_v43 = vld [vmem:[#allocation12 + $0x108] sm:$0xf]  ;;  %v6964_v61 = vor.u32 %v8739_v34, %v6961_v41  ;;  %v8630_v60 = vld [vmem:[#allocation12 + $0x394] sm:$0xf0]  ;;  %v6600_v34 = vor.u32 %v8650_v11, %v6599_v63 }
 0x1e6   :  { %v6519_v30 = vld [vmem:[#allocation12 + $0x388] sm:$0xf]  ;;  %v8646_v41 = vld [vmem:[#allocation12 + $0x414] sm:$0xf0] }
 0x1e7   :  { %2710 = vmatpush.bf16.msrb.mxu3 %v7044_v42  ;;  %2703 = vmatmul.bf16.vlgmr.msrb.gmra.mxu2 %v9767_v19  ;;  %v8550_v42 = vld [vmem:[#allocation12 + $0x114] sm:$0xf0]  ;;  %v6775_v1 = vld [vmem:[#allocation12 + $0x588] sm:$0xf] }
 0x1e8   :  { %2736 = vmatpush.bf16.msra.mxu1 %v6280_v53  ;;  %2747 = vmatpush.bf16.msra.mxu2 %v6440_v54  ;;  %v8590_v53 = vld [vmem:[#allocation12 + $0x254] sm:$0xf0]  ;;  %v6647_v54 = vld [vmem:[#allocation12 + $0x488] sm:$0xf] }
 0x1e9   :  { %2727 = vmatpush.bf16.msra.mxu0 %v6088_v2  ;;  %v6200_v2 = vor.u32 %v8550_v42, %v6199_v43  ;;  %v6648_v3 = vor.u32 %v8662_v31, %v6647_v54  ;;  %v6776_v43 = vor.u32 %v8694_v32, %v6775_v1  ;;  %v8690_v54 = vld [vmem:[#allocation12 + $0x574] sm:$0xf0]  ;;  %v6919_v31 = vld [vmem:[#allocation12 + $0x6a8] sm:$0xf] }
 0x1ea   :  { %v6455_v23 = vld [vmem:[#allocation12 + $0x308] sm:$0xf]  ;;  %v8770_v1 = vld [vmem:[#allocation12 + $0x7f4] sm:$0xf0] }
 0x1eb   :  { %2711 = vmatpush.bf16.msrb.mxu3 %v7028_v40  ;;  %v6360_v40 = vor.u32 %v8590_v53, %v6359_v51  ;;  %v8626_v51 = vld [vmem:[#allocation12 + $0x374] sm:$0xf0]  ;;  %v6759_v53 = vld [vmem:[#allocation12 + $0x568] sm:$0xf] }
 0x1ec   :  { %2737 = vmatpush.bf16.msra.mxu1 %v6264_v5  ;;  %2748 = vmatpush.bf16.msra.mxu2 %v6424_v6  ;;  %v6343_v5 = vld [vmem:[#allocation12 + $0x228] sm:$0xf]  ;;  %v8586_v6 = vld [vmem:[#allocation12 + $0x234] sm:$0xf0] }
 0x1ed   :  { %2728 = vmatpush.bf16.msra.mxu0 %v6072_v17  ;;  %v6344_v14 = vor.u32 %v8586_v6, %v6343_v5  ;;  %v6327_v17 = vld [vmem:[#allocation12 + $0x208] sm:$0xf] }
 0x1ee   :  { %v6743_v5 = vld [vmem:[#allocation12 + $0x548] sm:$0xf] }
 0x1ef   :  { %2712 = vmatpush.bf16.msrb.mxu3 %v7012_v18  ;;  %v6632_v18 = vor.u32 %v8658_v8, %v6631_v22  ;;  %v8686_v22 = vld [vmem:[#allocation12 + $0x554] sm:$0xf0]  ;;  %v6871_v11 = vld [vmem:[#allocation12 + $0x648] sm:$0xf] }
 0x1f0   :  { %2738 = vmatpush.bf16.msra.mxu1 %v6248_v20  ;;  %2749 = vmatpush.bf16.msra.mxu2 %v6408_v46  ;;  %v6552_v20 = vor.u32 %v8638_v0, %v6551_v9  ;;  %v8582_v46 = vld [vmem:[#allocation12 + $0x214] sm:$0xf0]  ;;  %v8540_v9 = vld [vmem:[#allocation12 + $0xcc] sm:$0xf]  ;;  %v6169_v0 = vld [vmem:[#allocation12 + $0xd8] sm:$0xf0]  ;;  %v6744_v12 = vor.u32 %v8686_v22, %v6743_v5 }
 0x1f1   :  { %2773 = vmatpush.bf16.msrb.mxu0 %v6696_v21  ;;  %v6535_v21 = vld [vmem:[#allocation12 + $0x3a8] sm:$0xf]  ;;  %v8726_v8 = vld [vmem:[#allocation12 + $0x694] sm:$0xf0] }
 0x1f2   :  { %2729 = vmatmul.bf16.vlgmr.msra.gmra.mxu0 %v9738_v39  ;;  %v8762_v22 = vld [vmem:[#allocation12 + $0x7b4] sm:$0xf0] }
 0x1f3   :  { %2713 = vmatpush.bf16.msrb.mxu3 %v6996_v26  ;;  %v6328_v26 = vor.u32 %v8582_v46, %v6327_v17  ;;  %v6471_v17 = vld [vmem:[#allocation12 + $0x328] sm:$0xf]  ;;  %v6172_v46 = vor.u32 %v8540_v9, %v6169_v0  ;;  %v8608_v9 = vld [vmem:[#allocation12 + $0x2ec] sm:$0xf]  ;;  %v6441_v0 = vld [vmem:[#allocation12 + $0x2f8] sm:$0xf0] }
 0x1f4   :  { %2739 = vmatpush.bf16.msra.mxu1 %v6232_v27  ;;  %2750 = vmatpush.bf16.msra.mxu2 %v6392_v57  ;;  %v6616_v27 = vor.u32 %v8654_v28, %v6615_v15  ;;  %v6536_v57 = vor.u32 %v8634_v37, %v6535_v21  ;;  %v8682_v15 = vld [vmem:[#allocation12 + $0x534] sm:$0xf0]  ;;  %v6887_v28 = vld [vmem:[#allocation12 + $0x668] sm:$0xf]  ;;  %v8536_v21 = vld [vmem:[#allocation12 + $0xac] sm:$0xf] }
 0x1f5   :  { %2774 = vmatpush.bf16.msrb.mxu0 %v6680_v29  ;;  %v6952_v29 = vor.u32 %v8738_v25, %v6951_v24  ;;  %v6153_v37 = vld [vmem:[#allocation12 + $0xb8] sm:$0xf0] }
 0x1f6   :  { %v6156_v63 = vor.u32 %v8536_v21, %v6153_v37  ;;  %v8564_v21 = vld [vmem:[#allocation12 + $0x18c] sm:$0xf]  ;;  %v6265_v37 = vld [vmem:[#allocation12 + $0x198] sm:$0xf0] }
 0x1f7   :  { %2714 = vmatpush.bf16.msrb.mxu3 %v6980_v33  ;;  %v8734_v33 = vld [vmem:[#allocation12 + $0x6d4] sm:$0xf0] }
 0x1f8   :  { %2740 = vmatpush.bf16.msra.mxu1 %v6216_v35  ;;  %2751 = vmatpush.bf16.msra.mxu2 %v6376_v38  ;;  %v6520_v35 = vor.u32 %v8630_v60, %v6519_v30  ;;  %v6583_v38 = vld [vmem:[#allocation12 + $0x408] sm:$0xf]  ;;  %v6936_v42 = vor.u32 %v8734_v33, %v6935_v16  ;;  %v6137_v30 = vld [vmem:[#allocation12 + $0x98] sm:$0xf0]  ;;  %v8576_v16 = vld [vmem:[#allocation12 + $0x1ec] sm:$0xf] }
 0x1f9   :  { %2775 = vmatpush.bf16.msrb.mxu0 %v6664_v50  ;;  %v6503_v50 = vld [vmem:[#allocation12 + $0x368] sm:$0xf]  ;;  %v6584_v49 = vor.u32 %v8646_v41, %v6583_v38  ;;  %v6313_v33 = vld [vmem:[#allocation12 + $0x1f8] sm:$0xf0] }
 0x1fa   :  { %v6504_v62 = vor.u32 %v8626_v51, %v6503_v50  ;;  %v7079_v60 = vld [vmem:[#allocation12 + $0x7e8] sm:$0xf]  ;;  %v8528_v50 = vld [vmem:[#allocation12 + $0x6c] sm:$0xf]  ;;  %v6316_v51 = vor.u32 %v8576_v16, %v6313_v33  ;;  %v6697_v33 = vld [vmem:[#allocation12 + $0x4f8] sm:$0xf0] }
 0x1fb   :  { %2715 = vmatpush.bf16.msrb.mxu3 %v6964_v61  ;;  %v6185_v61 = vld [vmem:[#allocation12 + $0xf8] sm:$0xf0]  ;;  %v7080_v41 = vor.u32 %v8770_v1, %v7079_v60  ;;  %v8600_v1 = vld [vmem:[#allocation12 + $0x2ac] sm:$0xf] }
 0x1fc   :  { %2741 = vmatpush.bf16.msra.mxu1 %v6200_v2  ;;  %2752 = vmatpush.bf16.msra.mxu2 %v6360_v40  ;;  %v6760_v2 = vor.u32 %v8690_v54, %v6759_v53  ;;  %v6920_v40 = vor.u32 %v8730_v56, %v6919_v31  ;;  %v6188_v6 = vor.u32 %v8544_v59, %v6185_v61  ;;  %v6121_v53 = vld [vmem:[#allocation12 + $0x78] sm:$0xf0]  ;;  %v7063_v54 = vld [vmem:[#allocation12 + $0x7c8] sm:$0xf]  ;;  %v8766_v31 = vld [vmem:[#allocation12 + $0x7d4] sm:$0xf0] }
 0x1fd   :  { %2776 = vmatpush.bf16.msrb.mxu0 %v6648_v3  ;;  %v6487_v3 = vld [vmem:[#allocation12 + $0x348] sm:$0xf]  ;;  %v8572_v56 = vld [vmem:[#allocation12 + $0x1cc] sm:$0xf]  ;;  %v6297_v59 = vld [vmem:[#allocation12 + $0x1d8] sm:$0xf0] }
 0x1fe   :  { %2716 = vmatmul.bf16.vlgmr.msrb.gmra.mxu3 %v9770_v45  ;;  %v6300_v5 = vor.u32 %v8572_v56, %v6297_v59  ;;  %v6249_v60 = vld [vmem:[#allocation12 + $0x178] sm:$0xf0]  ;;  %v8672_v16 = vld [vmem:[#allocation12 + $0x4ec] sm:$0xf] }
 0x1ff   :  { %2760 = vmatpush.bf16.msra.mxu3 %v6568_v4  ;;  %2742 = vmatmul.bf16.vlgmr.msra.gmra.mxu1 %v9740_v58  ;;  %v8622_v4 = vld [vmem:[#allocation12 + $0x354] sm:$0xf0]  ;;  %v6393_v56 = vld [vmem:[#allocation12 + $0x298] sm:$0xf0]  ;;  %v8668_v59 = vld [vmem:[#allocation12 + $0x4cc] sm:$0xf] }
 0x200   :  { %2786 = vmatpush.bf16.msrb.mxu1 %v6824_v7  ;;  %2753 = vmatpush.bf16.msra.mxu2 %v6344_v14  ;;  %v6903_v7 = vld [vmem:[#allocation12 + $0x688] sm:$0xf]  ;;  %v6488_v47 = vor.u32 %v8622_v4, %v6487_v3  ;;  %v8524_v3 = vld [vmem:[#allocation12 + $0x4c] sm:$0xf]  ;;  %v6105_v4 = vld [vmem:[#allocation12 + $0x58] sm:$0xf0] }
 0x201   :  { %2777 = vmatpush.bf16.msrb.mxu0 %v6632_v18  ;;  %v6904_v14 = vor.u32 %v8726_v8, %v6903_v7  ;;  %v8618_v18 = vld [vmem:[#allocation12 + $0x334] sm:$0xf0]  ;;  %v8568_v7 = vld [vmem:[#allocation12 + $0x1ac] sm:$0xf]  ;;  %v6281_v8 = vld [vmem:[#allocation12 + $0x1b8] sm:$0xf0] }
 0x202   :  { %v6472_v36 = vor.u32 %v8618_v18, %v6471_v17  ;;  %v8520_v18 = vld [vmem:[#allocation12 + $0x2c] sm:$0xf] }
 0x203   :  { %2761 = vmatpush.bf16.msra.mxu3 %v6552_v20  ;;  %v6727_v20 = vld [vmem:[#allocation12 + $0x528] sm:$0xf] }
 0x204   :  { %2787 = vmatpush.bf16.msrb.mxu1 %v6808_v44  ;;  %2754 = vmatpush.bf16.msra.mxu2 %v6328_v26  ;;  %v8722_v44 = vld [vmem:[#allocation12 + $0x674] sm:$0xf0]  ;;  %v6728_v24 = vor.u32 %v8682_v15, %v6727_v20  ;;  %v6089_v20 = vld [vmem:[#allocation12 + $0x38] sm:$0xf0]  ;;  %v6444_v15 = vor.u32 %v8608_v9, %v6441_v0  ;;  %v8592_v9 = vld [vmem:[#allocation12 + $0x26c] sm:$0xf] }
 0x205   :  { %2778 = vmatpush.bf16.msrb.mxu0 %v6616_v27  ;;  %v6888_v25 = vor.u32 %v8722_v44, %v6887_v28  ;;  %v8614_v26 = vld [vmem:[#allocation12 + $0x314] sm:$0xf0]  ;;  %v6711_v27 = vld [vmem:[#allocation12 + $0x508] sm:$0xf]  ;;  %v6377_v0 = vld [vmem:[#allocation12 + $0x278] sm:$0xf0] }
 0x206   :  { %v6456_v32 = vor.u32 %v8614_v26, %v6455_v23  ;;  %v7031_v28 = vld [vmem:[#allocation12 + $0x788] sm:$0xf]  ;;  %v8758_v44 = vld [vmem:[#allocation12 + $0x794] sm:$0xf0]  ;;  %v6425_v23 = vld [vmem:[#allocation12 + $0x2d8] sm:$0xf0] }
 0x207   :  { %2762 = vmatpush.bf16.msra.mxu3 %v6536_v57  ;;  %2755 = vmatmul.bf16.vlgmr.msra.gmra.mxu2 %v9751_v10  ;;  %v8678_v57 = vld [vmem:[#allocation12 + $0x514] sm:$0xf0]  ;;  %v8516_v26 = vld [vmem:[#allocation12 + $0xc] sm:$0xf] }
 0x208   :  { %2788 = vmatpush.bf16.msrb.mxu1 %v6792_v13  ;;  %2799 = vmatpush.bf16.msrb.mxu2 %v6952_v29  ;;  %v8718_v13 = vld [vmem:[#allocation12 + $0x654] sm:$0xf0]  ;;  %v8532_v29 = vld [vmem:[#allocation12 + $0x8c] sm:$0xf] }
 0x209   :  { %2779 = vmatpush.bf16.msrb.mxu0 %v6600_v34  ;;  %v6712_v34 = vor.u32 %v8678_v57, %v6711_v27  ;;  %v6140_v38 = vor.u32 %v8532_v29, %v6137_v30  ;;  %v6073_v27 = vld [vmem:[#allocation12 + $0x18] sm:$0xf0]  ;;  %v6268_v57 = vor.u32 %v8564_v21, %v6265_v37  ;;  %v8560_v29 = vld [vmem:[#allocation12 + $0x16c] sm:$0xf]  ;;  %v8742_v21 = vld [vmem:[#allocation12 + $0x714] sm:$0xf0] }
 0x20a   :  { %v8548_v37 = vld [vmem:[#allocation12 + $0x10c] sm:$0xf] }
 0x20b   :  { %2763 = vmatpush.bf16.msra.mxu3 %v6520_v35  ;;  %v6872_v35 = vor.u32 %v8718_v13, %v6871_v11  ;;  %v7015_v11 = vld [vmem:[#allocation12 + $0x768] sm:$0xf]  ;;  %v8754_v13 = vld [vmem:[#allocation12 + $0x774] sm:$0xf0] }
 0x20c   :  { %2789 = vmatpush.bf16.msrb.mxu1 %v6776_v43  ;;  %2800 = vmatpush.bf16.msrb.mxu2 %v6936_v42  ;;  %v6855_v43 = vld [vmem:[#allocation12 + $0x628] sm:$0xf]  ;;  %v8714_v42 = vld [vmem:[#allocation12 + $0x634] sm:$0xf0] }
 0x20d   :  { %2780 = vmatpush.bf16.msrb.mxu0 %v6584_v49  ;;  %v6856_v61 = vor.u32 %v8714_v42, %v6855_v43  ;;  %v6839_v49 = vld [vmem:[#allocation12 + $0x608] sm:$0xf] }
 0x20e   :  { %v6999_v42 = vld [vmem:[#allocation12 + $0x748] sm:$0xf] }
 0x20f   :  { %2764 = vmatpush.bf16.msra.mxu3 %v6504_v62  ;;  %v6124_v62 = vor.u32 %v8528_v50, %v6121_v53  ;;  %v8750_v50 = vld [vmem:[#allocation12 + $0x754] sm:$0xf0]  ;;  %v6700_v53 = vor.u32 %v8672_v16, %v6697_v33 }
 0x210   :  { %2790 = vmatpush.bf16.msrb.mxu1 %v6760_v2  ;;  %2801 = vmatpush.bf16.msrb.mxu2 %v6920_v40  ;;  %v7064_v2 = vor.u32 %v8766_v31, %v7063_v54  ;;  %v8710_v40 = vld [vmem:[#allocation12 + $0x614] sm:$0xf0]  ;;  %v6233_v54 = vld [vmem:[#allocation12 + $0x158] sm:$0xf0]  ;;  %v8596_v31 = vld [vmem:[#allocation12 + $0x28c] sm:$0xf] }
 0x211   :  { %2825 = vmatpush.bf16.msra.mxu0 %v6188_v6  ;;  %v7047_v6 = vld [vmem:[#allocation12 + $0x7a8] sm:$0xf] }
 0x212   :  { %2781 = vmatmul.bf16.vlgmr.msrb.gmra.mxu0 %v9760_v52 }
 0x213   :  { %2765 = vmatpush.bf16.msra.mxu3 %v6488_v47  ;;  %v6840_v47 = vor.u32 %v8710_v40, %v6839_v49  ;;  %v9792_v49 = vld [vmem:[#allocation13] sm:$0xf]  ;;  %v6396_v40 = vor.u32 %v8596_v31, %v6393_v56  ;;  %v6809_v31 = vld [vmem:[#allocation12 + $0x5d8] sm:$0xf0] }
 0x214   :  { %2791 = vmatpush.bf16.msrb.mxu1 %v6744_v12  ;;  %2802 = vmatpush.bf16.msrb.mxu2 %v6904_v14  ;;  %v6108_v12 = vor.u32 %v8524_v3, %v6105_v4  ;;  %v7048_v14 = vor.u32 %v8762_v22, %v7047_v6  ;;  %v6983_v3 = vld [vmem:[#allocation12 + $0x728] sm:$0xf]  ;;  %v8746_v4 = vld [vmem:[#allocation12 + $0x734] sm:$0xf0] }
 0x215   :  { %2826 = vmatpush.bf16.msra.mxu0 %v6172_v46  ;;  %v6284_v46 = vor.u32 %v8568_v7, %v6281_v8  ;;  %v6217_v8 = vld [vmem:[#allocation12 + $0x138] sm:$0xf0] }
 0x217   :  { %2766 = vmatpush.bf16.msra.mxu3 %v6472_v36  ;;  %v8604_v36 = vld [vmem:[#allocation12 + $0x2cc] sm:$0xf] }
 0x218   :  { %2792 = vmatpush.bf16.msrb.mxu1 %v6728_v24  ;;  %2803 = vmatpush.bf16.msrb.mxu2 %v6888_v25  ;;  %v6092_v24 = vor.u32 %v8520_v18, %v6089_v20  ;;  %v7032_v25 = vor.u32 %v8758_v44, %v7031_v28  ;;  %v6984_v18 = vor.u32 %v8746_v4, %v6983_v3  ;;  %v6329_v3 = vld [vmem:[#allocation12 + $0x218] sm:$0xf0] }
 0x219   :  { %2827 = vmatpush.bf16.msra.mxu0 %v6156_v63  ;;  %v6428_v63 = vor.u32 %v8604_v36, %v6425_v23  ;;  %v6380_v28 = vor.u32 %v8592_v9, %v6377_v0  ;;  %v6201_v36 = vld [vmem:[#allocation12 + $0x118] sm:$0xf0]  ;;  %v8736_v0 = vld [vmem:[#allocation12 + $0x6ec] sm:$0xf] }
 0x21a   :  { %v6617_v4 = vld [vmem:[#allocation12 + $0x458] sm:$0xf0] }
 0x21b   :  { %2767 = vmatpush.bf16.msra.mxu3 %v6456_v32  ;;  %v9787_v17 = vpop.f32.mrf.mxu1  ;;  %v6409_v32 = vld [vmem:[#allocation12 + $0x2b8] sm:$0xf0] }
 0x21c   :  { %2793 = vmatpush.bf16.msrb.mxu1 %v6712_v34  ;;  %2804 = vmatpush.bf16.msrb.mxu2 %v6872_v35  ;;  %v6076_v34 = vor.u32 %v8516_v26, %v6073_v27  ;;  %v7016_v35 = vor.u32 %v8754_v13, %v7015_v11  ;;  %v6412_v43 = vor.u32 %v8600_v1, %v6409_v32  ;;  %v6649_v27 = vld [vmem:[#allocation12 + $0x498] sm:$0xf0]  ;;  %v8704_v13 = vld [vmem:[#allocation12 + $0x5ec] sm:$0xf] }
 0x21d   :  { %2828 = vmatpush.bf16.msra.mxu0 %v6140_v38  ;;  %v6793_v9 = vld [vmem:[#allocation12 + $0x5b8] sm:$0xf0] }
 0x21e   :  { %2768 = vmatmul.bf16.vlgmr.msra.gmra.mxu3 %v9758_v48 }
 0x21f   :  { %2812 = vmatpush.bf16.msrb.mxu3 %v7080_v41  ;;  %2794 = vmatmul.bf16.vlgmr.msrb.gmra.mxu1 %v9762_v55  ;;  %v6252_v41 = vor.u32 %v8560_v29, %v6249_v60  ;;  %v6825_v29 = vld [vmem:[#allocation12 + $0x5f8] sm:$0xf0]  ;;  %v6204_v60 = vor.u32 %v8548_v37, %v6201_v36 }
 0x220   :  { %2838 = vmatpush.bf16.msra.mxu1 %v6316_v51  ;;  %2805 = vmatpush.bf16.msrb.mxu2 %v6856_v61  ;;  %v8556_v51 = vld [vmem:[#allocation12 + $0x14c] sm:$0xf]  ;;  %v6681_v61 = vld [vmem:[#allocation12 + $0x4d8] sm:$0xf0] }
 0x221   :  { %2829 = vmatpush.bf16.msra.mxu0 %v6124_v62  ;;  %v9790_v30 = vpop.f32.mrf.mxu3  ;;  %v7000_v62 = vor.u32 %v8750_v50, %v6999_v42  ;;  %v6684_v6 = vor.u32 %v8668_v59, %v6681_v61  ;;  %v6633_v42 = vld [vmem:[#allocation12 + $0x478] sm:$0xf0]  ;;  %v8636_v50 = vld [vmem:[#allocation12 + $0x3cc] sm:$0xf] }
 0x223   :  { %2813 = vmatpush.bf16.msrb.mxu3 %v7064_v2  ;;  %v2537_v38 = vpop.f32.mrf.mxu1  ;;  %v6236_v2 = vor.u32 %v8556_v51, %v6233_v54  ;;  %v6553_v51 = vld [vmem:[#allocation12 + $0x3d8] sm:$0xf0]  ;;  %v8700_v54 = vld [vmem:[#allocation12 + $0x5cc] sm:$0xf] }
 0x224   :  { %2839 = vmatpush.bf16.msra.mxu1 %v6300_v5  ;;  %2806 = vmatpush.bf16.msrb.mxu2 %v6840_v47  ;;  %v8552_v5 = vld [vmem:[#allocation12 + $0x12c] sm:$0xf]  ;;  %v1197_v47 = vperm.slane %v9792_v49, 0  ;;  %v6345_v38 = vld [vmem:[#allocation12 + $0x238] sm:$0xf0] }
 0x225   :  { %2830 = vmatpush.bf16.msra.mxu0 %v6108_v12  ;;  %v8664_v12 = vld [vmem:[#allocation12 + $0x4ac] sm:$0xf] }
 0x226   :  { %v2523_v26 = vadd.f32 %v9790_v30, %v1197_v47  ;;  %v6953_v47 = vld [vmem:[#allocation12 + $0x6f8] sm:$0xf0] }
 0x227   :  { %2814 = vmatpush.bf16.msrb.mxu3 %v7048_v14  ;;  %2807 = vmatmul.bf16.vlgmr.msrb.gmra.mxu2 %v9767_v19  ;;  %v6665_v14 = vld [vmem:[#allocation12 + $0x4b8] sm:$0xf0] }
 0x228   :  { %2840 = vmatpush.bf16.msra.mxu1 %v6284_v46  ;;  %2851 = vmatpush.bf16.msra.mxu2 %v6444_v15  ;;  %v6967_v46 = vld [vmem:[#allocation12 + $0x708] sm:$0xf]  ;;  %v6220_v15 = vor.u32 %v8552_v5, %v6217_v8  ;;  %v6668_v23 = vor.u32 %v8664_v12, %v6665_v14  ;;  %v2536_v30 = vadd.f32 %v9787_v17, %v2523_v26  ;;  %v8652_v17 = vld [vmem:[#allocation12 + $0x44c] sm:$0xf]  ;;  %v6537_v8 = vld [vmem:[#allocation12 + $0x3b8] sm:$0xf0] }
 0x229   :  { %2831 = vmatpush.bf16.msra.mxu0 %v6092_v24  ;;  %v2524_v22 = vpop.f32.mrf.mxu3  ;;  %v2548_v7 = vpop.f32.mrf.mxu2  ;;  %v8588_v24 = vld [vmem:[#allocation12 + $0x24c] sm:$0xf]  ;;  %v6968_v11 = vor.u32 %v8742_v21, %v6967_v46  ;;  %v6620_v14 = vor.u32 %v8652_v17, %v6617_v4  ;;  %v6601_v21 = vld [vmem:[#allocation12 + $0x438] sm:$0xf0] }
 0x22a   :  { %v2549_v56 = vadd.f32 %v2548_v7, %v2536_v30  ;;  %v8632_v22 = vld [vmem:[#allocation12 + $0x3ac] sm:$0xf] }
 0x22b   :  { %2815 = vmatpush.bf16.msrb.mxu3 %v7032_v25  ;;  %v9796_v20 = vpop.f32.mrf.mxu0  ;;  %v8660_v25 = vld [vmem:[#allocation12 + $0x48c] sm:$0xf] }
 0x22c   :  { %2841 = vmatpush.bf16.msra.mxu1 %v6268_v57  ;;  %2852 = vmatpush.bf16.msra.mxu2 %v6428_v63  ;;  %v9798_v44 = vpop.f32.mrf.mxu1  ;;  %v8640_v57 = vld [vmem:[#allocation12 + $0x3ec] sm:$0xf]  ;;  %v6569_v63 = vld [vmem:[#allocation12 + $0x3f8] sm:$0xf0]  ;;  %v6652_v32 = vor.u32 %v8660_v25, %v6649_v27 }
 0x22d   :  { %2832 = vmatpush.bf16.msra.mxu0 %v6076_v34  ;;  %v6572_v16 = vor.u32 %v8640_v57, %v6569_v63  ;;  %v8696_v7 = vld [vmem:[#allocation12 + $0x5ac] sm:$0xf]  ;;  %v6777_v25 = vld [vmem:[#allocation12 + $0x598] sm:$0xf0] }
 0x22e   :  { %v6796_v36 = vor.u32 %v8696_v7, %v6793_v9  ;;  %v8732_v26 = vld [vmem:[#allocation12 + $0x6cc] sm:$0xf]  ;;  %v6937_v27 = vld [vmem:[#allocation12 + $0x6d8] sm:$0xf0] }
 0x22f   :  { %2816 = vmatpush.bf16.msrb.mxu3 %v7016_v35  ;;  %v8584_v35 = vld [vmem:[#allocation12 + $0x22c] sm:$0xf] }
 0x230   :  { %2842 = vmatpush.bf16.msra.mxu1 %v6252_v41  ;;  %2853 = vmatpush.bf16.msra.mxu2 %v6412_v43  ;;  %v8656_v41 = vld [vmem:[#allocation12 + $0x46c] sm:$0xf]  ;;  %v6828_v43 = vor.u32 %v8704_v13, %v6825_v29  ;;  %v6348_v59 = vor.u32 %v8584_v35, %v6345_v38  ;;  %v6761_v35 = vld [vmem:[#allocation12 + $0x578] sm:$0xf0] }
 0x231   :  { %2877 = vmatpush.bf16.msrb.mxu0 %v6700_v53  ;;  %v2550_v33 = vpop.f32.mrf.mxu2  ;;  %v2561_v34 = vpop.f32.mrf.mxu3  ;;  %v8644_v29 = vld [vmem:[#allocation12 + $0x40c] sm:$0xf] }
 0x232   :  { %2833 = vmatmul.bf16.vlgmr.msra.gmra.mxu0 %v9738_v39  ;;  %v6361_v39 = vld [vmem:[#allocation12 + $0x258] sm:$0xf0]  ;;  %v2562_v5 = vadd.f32 %v2561_v34, %v2549_v56  ;;  %v8688_v34 = vld [vmem:[#allocation12 + $0x56c] sm:$0xf] }
 0x233   :  { %2817 = vmatpush.bf16.msrb.mxu3 %v7000_v62  ;;  %v6364_v1 = vor.u32 %v8588_v24, %v6361_v39  ;;  %v2576_v53 = vpop.f32.mrf.mxu0  ;;  %v8580_v62 = vld [vmem:[#allocation12 + $0x20c] sm:$0xf]  ;;  %v6505_v33 = vld [vmem:[#allocation12 + $0x378] sm:$0xf0] }
 0x234   :  { %2843 = vmatpush.bf16.msra.mxu1 %v6236_v2  ;;  %2854 = vmatpush.bf16.msra.mxu2 %v6396_v40  ;;  %v2589_v61 = vpop.f32.mrf.mxu1  ;;  %v6636_v2 = vor.u32 %v8656_v41, %v6633_v42  ;;  %v6556_v40 = vor.u32 %v8636_v50, %v6553_v51  ;;  %v6332_v12 = vor.u32 %v8580_v62, %v6329_v3  ;;  %v8628_v24 = vld [vmem:[#allocation12 + $0x38c] sm:$0xf]  ;;  %v6921_v41 = vld [vmem:[#allocation12 + $0x6b8] sm:$0xf0]  ;;  %v8831_v42 = vld [vmem:[#allocation15 + $0x1dc] sm:$0xf0] }
 0x235   :  { %2878 = vmatpush.bf16.msrb.mxu0 %v6684_v6  ;;  %v6812_v6 = vor.u32 %v8700_v54, %v6809_v31  ;;  %v2575_v37 = vadd.f32 %v9796_v20, %v2562_v5  ;;  %v8692_v39 = vld [vmem:[#allocation12 + $0x58c] sm:$0xf]  ;;  %v6585_v20 = vld [vmem:[#allocation12 + $0x418] sm:$0xf0] }
 0x236   :  { %v8728_v38 = vld [vmem:[#allocation12 + $0x6ac] sm:$0xf]  ;;  %v6588_v50 = vor.u32 %v8644_v29, %v6585_v20  ;;  %v6489_v61 = vld [vmem:[#allocation12 + $0x358] sm:$0xf0]  ;;  %v8807_v20 = vld [vmem:[#allocation15 + $0x11c] sm:$0xf0] }
 0x237   :  { %2818 = vmatpush.bf16.msrb.mxu3 %v6984_v18  ;;  %v6540_v18 = vor.u32 %v8632_v22, %v6537_v8  ;;  %v6924_v31 = vor.u32 %v8728_v38, %v6921_v41  ;;  %v6905_v3 = vld [vmem:[#allocation12 + $0x698] sm:$0xf0]  ;;  %v8823_v22 = vld [vmem:[#allocation15 + $0x19c] sm:$0xf0] }
 0x238   :  { %2844 = vmatpush.bf16.msra.mxu1 %v6220_v15  ;;  %2855 = vmatpush.bf16.msra.mxu2 %v6380_v28  ;;  %v8648_v28 = vld [vmem:[#allocation12 + $0x42c] sm:$0xf]  ;;  %v6873_v29 = vld [vmem:[#allocation12 + $0x658] sm:$0xf0] }
 0x239   :  { %2879 = vmatpush.bf16.msrb.mxu0 %v6668_v23  ;;  %v2563_v46 = vpop.f32.mrf.mxu3  ;;  %v2600_v15 = vpop.f32.mrf.mxu2  ;;  %v6956_v23 = vor.u32 %v8736_v0, %v6953_v47  ;;  %v8616_v0 = vld [vmem:[#allocation12 + $0x32c] sm:$0xf]  ;;  %v6473_v47 = vld [vmem:[#allocation12 + $0x338] sm:$0xf0] }
 0x23a   :  { %v8720_v46 = vld [vmem:[#allocation12 + $0x66c] sm:$0xf] }
 0x23b   :  { %2819 = vmatpush.bf16.msrb.mxu3 %v6968_v11  ;;  %v9805_v57 = vpop.f32.mrf.mxu0  ;;  %v6604_v11 = vor.u32 %v8648_v28, %v6601_v21  ;;  %v7247_v28 = vld [vmem:[#allocation15 + $0x140] sm:$0xf] }
 0x23c   :  { %2845 = vmatpush.bf16.msra.mxu1 %v6204_v60  ;;  %2856 = vmatpush.bf16.msra.mxu2 %v6364_v1  ;;  %v9807_v63 = vpop.f32.mrf.mxu1  ;;  %v2588_v60 = vadd.f32 %v9798_v44, %v2575_v37  ;;  %v6780_v1 = vor.u32 %v8692_v39, %v6777_v25  ;;  %v6764_v44 = vor.u32 %v8688_v34, %v6761_v35  ;;  %v8815_v21 = vld [vmem:[#allocation15 + $0x15c] sm:$0xf0]  ;;  %v6457_v25 = vld [vmem:[#allocation12 + $0x318] sm:$0xf0] }
 0x23d   :  { %2880 = vmatpush.bf16.msrb.mxu0 %v6652_v32  ;;  %v6940_v32 = vor.u32 %v8732_v26, %v6937_v27  ;;  %v6476_v37 = vor.u32 %v8616_v0, %v6473_v47  ;;  %v8676_v26 = vld [vmem:[#allocation12 + $0x50c] sm:$0xf]  ;;  %v6713_v27 = vld [vmem:[#allocation12 + $0x518] sm:$0xf0]  ;;  %v8895_v34 = vld [vmem:[#allocation15 + $0x3dc] sm:$0xf0] }
 0x23e   :  { %2820 = vmatmul.bf16.vlgmr.msrb.gmra.mxu3 %v9770_v45  ;;  %v2601_v30 = vadd.f32 %v2600_v15, %v2588_v60  ;;  %v6889_v15 = vld [vmem:[#allocation12 + $0x678] sm:$0xf0]  ;;  %v8768_v60 = vld [vmem:[#allocation12 + $0x7ec] sm:$0xf]  ;;  %v6716_v35 = vor.u32 %v8676_v26, %v6713_v27  ;;  %v7439_v27 = vld [vmem:[#allocation15 + $0x2c0] sm:$0xf] }
 0x23f   :  { %2864 = vmatpush.bf16.msra.mxu3 %v6572_v16  ;;  %2846 = vmatmul.bf16.vlgmr.msra.gmra.mxu1 %v9740_v58  ;;  %v6521_v58 = vld [vmem:[#allocation12 + $0x398] sm:$0xf0]  ;;  %v8624_v16 = vld [vmem:[#allocation12 + $0x36c] sm:$0xf] }
 0x240   :  { %2890 = vmatpush.bf16.msrb.mxu1 %v6828_v43  ;;  %2857 = vmatpush.bf16.msra.mxu2 %v6348_v59  ;;  %v6524_v13 = vor.u32 %v8628_v24, %v6521_v58  ;;  %v7311_v43 = vld [vmem:[#allocation15 + $0x1c0] sm:$0xf]  ;;  %v6508_v51 = vor.u32 %v8624_v16, %v6505_v33  ;;  %v8620_v59 = vld [vmem:[#allocation12 + $0x34c] sm:$0xf]  ;;  %v6892_v58 = vor.u32 %v8720_v46, %v6889_v15  ;;  %v7033_v15 = vld [vmem:[#allocation12 + $0x798] sm:$0xf0] }
 0x241   :  { %2881 = vmatpush.bf16.msrb.mxu0 %v6636_v2  ;;  %v2602_v53 = vpop.f32.mrf.mxu2  ;;  %v2613_v54 = vpop.f32.mrf.mxu3  ;;  %v7312_v62 = vor.u32 %v8831_v42, %v7311_v43  ;;  %v6745_v2 = vld [vmem:[#allocation12 + $0x558] sm:$0xf0]  ;;  %v6492_v8 = vor.u32 %v8620_v59, %v6489_v61  ;;  %v7567_v33 = vld [vmem:[#allocation15 + $0x3c0] sm:$0xf]  ;;  %v8712_v43 = vld [vmem:[#allocation12 + $0x62c] sm:$0xf] }
 0x242   :  { %v2614_v56 = vadd.f32 %v2613_v54, %v2601_v30  ;;  %v6857_v42 = vld [vmem:[#allocation12 + $0x638] sm:$0xf0]  ;;  %v8799_v53 = vld [vmem:[#allocation15 + $0xdc] sm:$0xf0]  ;;  %v8764_v54 = vld [vmem:[#allocation12 + $0x7cc] sm:$0xf] }
 0x243   :  { %2865 = vmatpush.bf16.msra.mxu3 %v6556_v40  ;;  %v8724_v40 = vld [vmem:[#allocation12 + $0x68c] sm:$0xf]  ;;  %v2628_v4 = vpop.f32.mrf.mxu0  ;;  %v6860_v59 = vor.u32 %v8712_v43, %v6857_v42  ;;  %v8783_v46 = vld [vmem:[#allocation15 + $0x5c] sm:$0xf0]  ;;  %v7017_v26 = vld [vmem:[#allocation12 + $0x778] sm:$0xf0] }
 0x244   :  { %2891 = vmatpush.bf16.msrb.mxu1 %v6812_v6  ;;  %2858 = vmatpush.bf16.msra.mxu2 %v6332_v12  ;;  %v9811_v17 = vmax.f32 %v2614_v56, 0.0  ;;  %v2641_v5 = vpop.f32.mrf.mxu1  ;;  %v7279_v6 = vld [vmem:[#allocation15 + $0x180] sm:$0xf]  ;;  %v6908_v9 = vor.u32 %v8724_v40, %v6905_v3  ;;  %v8680_v12 = vld [vmem:[#allocation12 + $0x52c] sm:$0xf] }
 0x245   :  { %2882 = vmatpush.bf16.msrb.mxu0 %v6620_v14  ;;  %v7280_v14 = vor.u32 %v8823_v22, %v7279_v6  ;;  %v8887_v56 = vld [vmem:[#allocation15 + $0x39c] sm:$0xf0]  ;;  %v6841_v40 = vld [vmem:[#allocation12 + $0x618] sm:$0xf0]  ;;  %v8760_v6 = vld [vmem:[#allocation12 + $0x7ac] sm:$0xf] }
 0x246   :  { %2933 = vst [vmem:[%s10103_s13] sm:$0xff] %v9811_v17  ;;  %v7151_v3 = vld [vmem:[#allocation15 + $0x80] sm:$0xf]  ;;  %v7049_v22 = vld [vmem:[#allocation12 + $0x7b8] sm:$0xf0]  ;;  %v8744_v42 = vld [vmem:[#allocation12 + $0x72c] sm:$0xf] }
 0x247   :  { %2866 = vmatpush.bf16.msra.mxu3 %v6540_v18  ;;  %2859 = vmatmul.bf16.vlgmr.msra.gmra.mxu2 %v9751_v10  ;;  %v8684_v10 = vld [vmem:[#allocation12 + $0x54c] sm:$0xf]  ;;  %v6729_v18 = vld [vmem:[#allocation12 + $0x538] sm:$0xf0]  ;;  %v8791_v5 = vld [vmem:[#allocation15 + $0x9c] sm:$0xf0] }
 0x248   :  { %2892 = vmatpush.bf16.msrb.mxu1 %v6796_v36  ;;  %2903 = vmatpush.bf16.msrb.mxu2 %v6956_v23  ;;  %v6748_v7 = vor.u32 %v8684_v10, %v6745_v2  ;;  %v8612_v23 = vld [vmem:[#allocation12 + $0x30c] sm:$0xf]  ;;  %v6732_v24 = vor.u32 %v8680_v12, %v6729_v18  ;;  %v7152_v47 = vor.u32 %v8791_v5, %v7151_v3 }
 0x249   :  { %2883 = vmatpush.bf16.msrb.mxu0 %v6604_v11  ;;  %v2615_v36 = vpop.f32.mrf.mxu3  ;;  %v7248_v11 = vor.u32 %v8815_v21, %v7247_v28  ;;  %v6460_v16 = vor.u32 %v8612_v23, %v6457_v25  ;;  %v8708_v2 = vld [vmem:[#allocation12 + $0x60c] sm:$0xf]  ;;  %v7052_v12 = vor.u32 %v8760_v6, %v7049_v22  ;;  %v7471_v28 = vld [vmem:[#allocation15 + $0x300] sm:$0xf] }
 0x24a   :  { %v9818_v39 = vpop.f32.mrf.mxu2  ;;  %v6844_v0 = vor.u32 %v8708_v2, %v6841_v40  ;;  %v8871_v21 = vld [vmem:[#allocation15 + $0x31c] sm:$0xf0]  ;;  %v8752_v25 = vld [vmem:[#allocation12 + $0x76c] sm:$0xf] }
 0x24b   :  { %2867 = vmatpush.bf16.msra.mxu3 %v6524_v13  ;;  %v8716_v13 = vld [vmem:[#allocation12 + $0x64c] sm:$0xf]  ;;  %v7087_v23 = vld [vmem:[#allocation15] sm:$0xf] }
 0x24c   :  { %2893 = vmatpush.bf16.msrb.mxu1 %v6780_v1  ;;  %2904 = vmatpush.bf16.msrb.mxu2 %v6940_v32  ;;  %v7081_v1 = vld [vmem:[#allocation12 + $0x7f8] sm:$0xf0]  ;;  %v6876_v38 = vor.u32 %v8716_v13, %v6873_v29  ;;  %v8827_v13 = vld [vmem:[#allocation15 + $0x1c4] sm:$0xf] }
 0x24d   :  { %2884 = vmatpush.bf16.msrb.mxu0 %v6588_v50  ;;  %v7084_v30 = vor.u32 %v8768_v60, %v7081_v1  ;;  %v7183_v50 = vld [vmem:[#allocation15 + $0xc0] sm:$0xf]  ;;  %v7313_v29 = vld [vmem:[#allocation15 + $0x1e0] sm:$0xf0] }
 0x24e   :  { %v7184_v10 = vor.u32 %v8799_v53, %v7183_v50  ;;  %v6985_v50 = vld [vmem:[#allocation12 + $0x738] sm:$0xf0] }
 0x24f   :  { %2868 = vmatpush.bf16.msra.mxu3 %v6508_v51  ;;  %v9820_v32 = vpop.f32.mrf.mxu0  ;;  %v7568_v51 = vor.u32 %v8895_v34, %v7567_v33  ;;  %v8748_v33 = vld [vmem:[#allocation12 + $0x74c] sm:$0xf]  ;;  %v7001_v34 = vld [vmem:[#allocation12 + $0x758] sm:$0xf0]  ;;  %v6988_v40 = vor.u32 %v8744_v42, %v6985_v50  ;;  %v8867_v42 = vld [vmem:[#allocation15 + $0x304] sm:$0xf] }
 0x250   :  { %2894 = vmatpush.bf16.msrb.mxu1 %v6764_v44  ;;  %2905 = vmatpush.bf16.msrb.mxu2 %v6924_v31  ;;  %v7065_v44 = vld [vmem:[#allocation12 + $0x7d8] sm:$0xf0]  ;;  %v7535_v31 = vld [vmem:[#allocation15 + $0x380] sm:$0xf] }
 0x251   :  { %4495 = vmatpush.bf16.msra.mxu0 %v7312_v62  ;;  %v7068_v62 = vor.u32 %v8764_v54, %v7065_v44  ;;  %v7536_v4 = vor.u32 %v8887_v56, %v7535_v31  ;;  %v7375_v44 = vld [vmem:[#allocation15 + $0x240] sm:$0xf]  ;;  %v8811_v56 = vld [vmem:[#allocation15 + $0x144] sm:$0xf] }
 0x252   :  { %2885 = vmatmul.bf16.vlgmr.msrb.gmra.mxu0 %v9760_v52  ;;  %v7215_v52 = vld [vmem:[#allocation15 + $0x100] sm:$0xf]  ;;  %v2654_v61 = vpop.f32.mrf.mxu2 }
 0x253   :  { %2869 = vmatpush.bf16.msra.mxu3 %v6492_v8  ;;  %v7216_v41 = vor.u32 %v8807_v20, %v7215_v52  ;;  %v7020_v20 = vor.u32 %v8752_v25, %v7017_v26  ;;  %v8847_v31 = vld [vmem:[#allocation15 + $0x25c] sm:$0xf0]  ;;  %v7537_v25 = vld [vmem:[#allocation15 + $0x3a0] sm:$0xf0] }
 0x254   :  { %2895 = vmatpush.bf16.msrb.mxu1 %v6748_v7  ;;  %2906 = vmatpush.bf16.msrb.mxu2 %v6908_v9  ;;  %v7503_v7 = vld [vmem:[#allocation15 + $0x340] sm:$0xf]  ;;  %v7376_v5 = vor.u32 %v8847_v31, %v7375_v44 }
 0x255   :  { %4496 = vmatpush.bf16.msra.mxu0 %v7280_v14  ;;  %v8879_v9 = vld [vmem:[#allocation15 + $0x35c] sm:$0xf0] }
 0x256   :  { %v7119_v14 = vld [vmem:[#allocation15 + $0x40] sm:$0xf]  ;;  %v7504_v18 = vor.u32 %v8879_v9, %v7503_v7  ;;  %v8803_v9 = vld [vmem:[#allocation15 + $0x104] sm:$0xf] }
 0x257   :  { %2870 = vmatpush.bf16.msra.mxu3 %v6476_v37  ;;  %v2680_v8 = vpop.f32.mrf.mxu0  ;;  %v7823_v61 = vld [vmem:[#allocation15 + $0x5c0] sm:$0xf] }
 0x258   :  { %2896 = vmatpush.bf16.msrb.mxu1 %v6732_v24  ;;  %2907 = vmatpush.bf16.msrb.mxu2 %v6892_v58  ;;  %v8775_v24 = vld [vmem:[#allocation15 + $0x1c] sm:$0xf0]  ;;  %v7472_v58 = vor.u32 %v8871_v21, %v7471_v28 }
 0x259   :  { %4497 = vmatpush.bf16.msra.mxu0 %v7248_v11  ;;  %v8863_v11 = vld [vmem:[#allocation15 + $0x2dc] sm:$0xf0]  ;;  %v7088_v52 = vor.u32 %v8775_v24, %v7087_v23  ;;  %v7185_v23 = vld [vmem:[#allocation15 + $0xe0] sm:$0xf0] }
 0x25a   :  { %v7440_v1 = vor.u32 %v8863_v11, %v7439_v27  ;;  %v7343_v8 = vld [vmem:[#allocation15 + $0x200] sm:$0xf]  ;;  %v8883_v24 = vld [vmem:[#allocation15 + $0x384] sm:$0xf] }
 0x25b   :  { %2871 = vmatpush.bf16.msra.mxu3 %v6460_v16  ;;  %v7316_v16 = vor.u32 %v8827_v13, %v7313_v29  ;;  %v8839_v7 = vld [vmem:[#allocation15 + $0x21c] sm:$0xf0] }
 0x25c   :  { %2897 = vmatpush.bf16.msrb.mxu1 %v6716_v35  ;;  %2908 = vmatpush.bf16.msrb.mxu2 %v6876_v38  ;;  %v9824_v37 = vpop.f32.mrf.mxu1  ;;  %v7407_v35 = vld [vmem:[#allocation15 + $0x280] sm:$0xf]  ;;  %v7344_v28 = vor.u32 %v8839_v7, %v7343_v8 }
 0x25d   :  { %4498 = vmatpush.bf16.msra.mxu0 %v7216_v41  ;;  %v8855_v38 = vld [vmem:[#allocation15 + $0x29c] sm:$0xf0]  ;;  %v8819_v41 = vld [vmem:[#allocation15 + $0x184] sm:$0xf] }
 0x25e   :  { %2872 = vmatmul.bf16.vlgmr.msra.gmra.mxu3 %v9758_v48  ;;  %v8756_v48 = vld [vmem:[#allocation12 + $0x78c] sm:$0xf]  ;;  %v7408_v53 = vor.u32 %v8855_v38, %v7407_v35  ;;  %v8943_v26 = vld [vmem:[#allocation15 + $0x55c] sm:$0xf0] }
 0x25f   :  { %2916 = vmatpush.bf16.msrb.mxu3 %v7084_v30  ;;  %2898 = vmatmul.bf16.vlgmr.msrb.gmra.mxu1 %v9762_v55  ;;  %v7120_v55 = vor.u32 %v8783_v46, %v7119_v14  ;;  %v7036_v36 = vor.u32 %v8756_v48, %v7033_v15  ;;  %v7281_v30 = vld [vmem:[#allocation15 + $0x1a0] sm:$0xf0]  ;;  %v8935_v35 = vld [vmem:[#allocation15 + $0x51c] sm:$0xf0] }
 0x260   :  { %4508 = vmatpush.bf16.msra.mxu1 %v7568_v51  ;;  %2909 = vmatpush.bf16.msrb.mxu2 %v6860_v59  ;;  %v9831_v51 = vpack.c.bf16 %v9811_v17, %v9811_v17  ;;  %v7284_v54 = vor.u32 %v8819_v41, %v7281_v30  ;;  %v7249_v59 = vld [vmem:[#allocation15 + $0x160] sm:$0xf0]  ;;  %v8740_v17 = vld [vmem:[#allocation12 + $0x70c] sm:$0xf] }
 0x261   :  { %4499 = vmatpush.bf16.msra.mxu0 %v7184_v10  ;;  %v9827_v60 = vpop.f32.mrf.mxu3  ;;  %v8959_v10 = vld [vmem:[#allocation15 + $0x5dc] sm:$0xf0]  ;;  %v7252_v6 = vor.u32 %v8811_v56, %v7249_v59  ;;  %v8891_v14 = vld [vmem:[#allocation15 + $0x3c4] sm:$0xf] }
 0x262   :  { %v7824_v2 = vor.u32 %v8959_v10, %v7823_v61  ;;  %v8771_v56 = vld [vmem:[#allocation15 + $0x4] sm:$0xf] }
 0x263   :  { %2917 = vmatpush.bf16.msrb.mxu3 %v7068_v62  ;;  %v1198_v62 = vperm.slane %v9792_v49, 1  ;;  %v7791_v49 = vld [vmem:[#allocation15 + $0x580] sm:$0xf]  ;;  %v7089_v59 = vld [vmem:[#allocation15 + $0x20] sm:$0xf0] }
 0x264   :  { %4509 = vmatpush.bf16.msra.mxu1 %v7536_v4  ;;  %2910 = vmatpush.bf16.msrb.mxu2 %v6844_v0  ;;  %v2693_v43 = vpop.f32.mrf.mxu1  ;;  %v6969_v4 = vld [vmem:[#allocation12 + $0x718] sm:$0xf0]  ;;  %v7217_v0 = vld [vmem:[#allocation15 + $0x120] sm:$0xf0] }
 0x265   :  { %4500 = vmatpush.bf16.msra.mxu0 %v7152_v47  ;;  %v8951_v47 = vld [vmem:[#allocation15 + $0x59c] sm:$0xf0]  ;;  %v6972_v15 = vor.u32 %v8740_v17, %v6969_v4  ;;  %v7220_v21 = vor.u32 %v8803_v9, %v7217_v0  ;;  %v8779_v43 = vld [vmem:[#allocation15 + $0x44] sm:$0xf] }
 0x266   :  { %v7792_v46 = vor.u32 %v8951_v47, %v7791_v49  ;;  %v8859_v10 = vld [vmem:[#allocation15 + $0x2c4] sm:$0xf]  ;;  %v8919_v17 = vld [vmem:[#allocation15 + $0x49c] sm:$0xf0]  ;;  %v7287_v47 = vld [vmem:[#allocation15 + $0x188] sm:$0xf] }
 0x267   :  { %2918 = vmatpush.bf16.msrb.mxu3 %v7052_v12  ;;  %2911 = vmatmul.bf16.vlgmr.msrb.gmra.mxu2 %v9767_v19  ;;  %v7004_v19 = vor.u32 %v8748_v33, %v7001_v34  ;;  %v2627_v12 = vadd.f32 %v9805_v57, %v1198_v62  ;;  %v7759_v57 = vld [vmem:[#allocation15 + $0x540] sm:$0xf]  ;;  %v7441_v62 = vld [vmem:[#allocation15 + $0x2e0] sm:$0xf0] }
 0x268   :  { %4510 = vmatpush.bf16.msra.mxu1 %v7504_v18  ;;  %4521 = vmatpush.bf16.msra.mxu2 %v7824_v2  ;;  %v7569_v18 = vld [vmem:[#allocation15 + $0x3e0] sm:$0xf0]  ;;  %v7760_v27 = vor.u32 %v8943_v26, %v7759_v57  ;;  %v7727_v34 = vld [vmem:[#allocation15 + $0x500] sm:$0xf]  ;;  %v7319_v2 = vld [vmem:[#allocation15 + $0x1c8] sm:$0xf]  ;;  %v7444_v8 = vor.u32 %v8859_v10, %v7441_v62 }
 0x269   :  { %4501 = vmatpush.bf16.msra.mxu0 %v7120_v55  ;;  %v2667_v3 = vpop.f32.mrf.mxu3  ;;  %v7572_v55 = vor.u32 %v8891_v14, %v7569_v18  ;;  %v7728_v41 = vor.u32 %v8935_v35, %v7727_v34  ;;  %v8851_v0 = vld [vmem:[#allocation15 + $0x284] sm:$0xf]  ;;  %v8824_v14 = vld [vmem:[#allocation15 + $0x1a4] sm:$0xf0]  ;;  %v7631_v18 = vld [vmem:[#allocation15 + $0x440] sm:$0xf] }
 0x26a   :  { %v9835_v22 = vpop.f32.mrf.mxu2  ;;  %v8832_v3 = vld [vmem:[#allocation15 + $0x1e4] sm:$0xf0]  ;;  %v7409_v49 = vld [vmem:[#allocation15 + $0x2a0] sm:$0xf0]  ;;  %v8903_v57 = vld [vmem:[#allocation15 + $0x41c] sm:$0xf0] }
 0x26b   :  { %2919 = vmatpush.bf16.msrb.mxu3 %v7036_v36  ;;  %v8795_v36 = vld [vmem:[#allocation15 + $0xc4] sm:$0xf]  ;;  %v7320_v7 = vor.u32 %v8832_v3, %v7319_v2  ;;  %v8808_v34 = vld [vmem:[#allocation15 + $0x124] sm:$0xf0] }
 0x26c   :  { %4511 = vmatpush.bf16.msra.mxu1 %v7472_v58  ;;  %4522 = vmatpush.bf16.msra.mxu2 %v7792_v46  ;;  %v2640_v58 = vadd.f32 %v9807_v63, %v2627_v12  ;;  %v7188_v13 = vor.u32 %v8795_v36, %v7185_v23  ;;  %v7505_v63 = vld [vmem:[#allocation15 + $0x360] sm:$0xf0]  ;;  %v7255_v23 = vld [vmem:[#allocation15 + $0x148] sm:$0xf] }
 0x26d   :  { %4502 = vmatpush.bf16.msra.mxu0 %v7088_v52  ;;  %v7540_v52 = vor.u32 %v8883_v24, %v7537_v25  ;;  %v7377_v36 = vld [vmem:[#allocation15 + $0x260] sm:$0xf0]  ;;  %v8816_v24 = vld [vmem:[#allocation15 + $0x164] sm:$0xf0]  ;;  %v7599_v25 = vld [vmem:[#allocation15 + $0x400] sm:$0xf] }
 0x26e   :  { %v2653_v11 = vadd.f32 %v9818_v39, %v2640_v58  ;;  %v7600_v26 = vor.u32 %v8903_v57, %v7599_v25  ;;  %v7575_v35 = vld [vmem:[#allocation15 + $0x3c8] sm:$0xf]  ;;  %v7665_v25 = vld [vmem:[#allocation15 + $0x4a0] sm:$0xf0] }
 0x26f   :  { %2920 = vmatpush.bf16.msrb.mxu3 %v7020_v20  ;;  %v9838_v48 = vpop.f32.mrf.mxu0  ;;  %v8787_v20 = vld [vmem:[#allocation15 + $0x84] sm:$0xf]  ;;  %v7159_v2 = vld [vmem:[#allocation15 + $0x88] sm:$0xf] }
 0x270   :  { %4512 = vmatpush.bf16.msra.mxu1 %v7440_v1  ;;  %4503 = vmatmul.bf16.vlgmr.msra.gmra.mxu0 %v9831_v51  ;;  %v7153_v1 = vld [vmem:[#allocation15 + $0xa0] sm:$0xf0]  ;;  %v2666_v33 = vadd.f32 %v9827_v60, %v2653_v11  ;;  %v8927_v60 = vld [vmem:[#allocation15 + $0x4dc] sm:$0xf0]  ;;  %v7511_v3 = vld [vmem:[#allocation15 + $0x348] sm:$0xf] }
 0x271   :  { %4547 = vmatpush.bf16.msrb.mxu0 %v7316_v16  ;;  %v8875_v16 = vld [vmem:[#allocation15 + $0x344] sm:$0xf]  ;;  %4523 = vmatpush.bf16.msra.mxu2 %v7760_v27  ;;  %v7156_v39 = vor.u32 %v8787_v20, %v7153_v1 }
 0x272   :  { %v2706_v29 = vpop.f32.mrf.mxu2  ;;  %v7508_v30 = vor.u32 %v8875_v16, %v7505_v63  ;;  %v2679_v50 = vadd.f32 %v9820_v32, %v2666_v33  ;;  %v7663_v32 = vld [vmem:[#allocation15 + $0x480] sm:$0xf]  ;;  %v8955_v27 = vld [vmem:[#allocation15 + $0x5c4] sm:$0xf]  ;;  %v7223_v63 = vld [vmem:[#allocation15 + $0x108] sm:$0xf] }
 0x273   :  { %2921 = vmatpush.bf16.msrb.mxu3 %v7004_v19  ;;  %v7121_v19 = vld [vmem:[#allocation15 + $0x60] sm:$0xf0]  ;;  %v7664_v4 = vor.u32 %v8919_v17, %v7663_v32  ;;  %v8880_v32 = vld [vmem:[#allocation15 + $0x364] sm:$0xf0] }
 0x274   :  { %4513 = vmatpush.bf16.msra.mxu1 %v7408_v53  ;;  %v7473_v53 = vld [vmem:[#allocation15 + $0x320] sm:$0xf0]  ;;  %v7124_v31 = vor.u32 %v8779_v43, %v7121_v19 }
 0x275   :  { %4548 = vmatpush.bf16.msrb.mxu0 %v7284_v54  ;;  %4524 = vmatpush.bf16.msra.mxu2 %v7728_v41  ;;  %v7695_v54 = vld [vmem:[#allocation15 + $0x4c0] sm:$0xf]  ;;  %v7476_v61 = vor.u32 %v8867_v42, %v7473_v53  ;;  %v7825_v11 = vld [vmem:[#allocation15 + $0x5e0] sm:$0xf0]  ;;  %v7224_v42 = vor.u32 %v8808_v34, %v7223_v63  ;;  %v7191_v53 = vld [vmem:[#allocation15 + $0xc8] sm:$0xf] }
 0x276   :  { %v7696_v44 = vor.u32 %v8927_v60, %v7695_v54  ;;  %v8835_v1 = vld [vmem:[#allocation15 + $0x204] sm:$0xf]  ;;  %v8800_v54 = vld [vmem:[#allocation15 + $0xe4] sm:$0xf0] }
 0x277   :  { %2922 = vmatpush.bf16.msrb.mxu3 %v6988_v40  ;;  %v2732_v38 = vpop.f32.mrf.mxu0  ;;  %v2692_v40 = vadd.f32 %v9824_v37, %v2679_v50  ;;  %v8911_v37 = vld [vmem:[#allocation15 + $0x45c] sm:$0xf0]  ;;  %v7345_v16 = vld [vmem:[#allocation15 + $0x220] sm:$0xf0]  ;;  %v7543_v60 = vld [vmem:[#allocation15 + $0x388] sm:$0xf] }
 0x278   :  { %4514 = vmatpush.bf16.msra.mxu1 %v7376_v5  ;;  %v7632_v46 = vor.u32 %v8911_v37, %v7631_v18  ;;  %v8896_v38 = vld [vmem:[#allocation15 + $0x3e4] sm:$0xf0]  ;;  %v8947_v41 = vld [vmem:[#allocation15 + $0x584] sm:$0xf]  ;;  %v7348_v19 = vor.u32 %v8835_v1, %v7345_v16  ;;  %v7289_v1 = vld [vmem:[#allocation15 + $0x1a8] sm:$0xf0] }
 0x279   :  { %4549 = vmatpush.bf16.msrb.mxu0 %v7252_v6  ;;  %4525 = vmatpush.bf16.msra.mxu2 %v7696_v44  ;;  %v2705_v5 = vadd.f32 %v9835_v22, %v2692_v40  ;;  %v7092_v6 = vor.u32 %v8771_v56, %v7089_v59  ;;  %v7412_v22 = vor.u32 %v8851_v0, %v7409_v49  ;;  %v8888_v44 = vld [vmem:[#allocation15 + $0x3a4] sm:$0xf0]  ;;  %v7761_v56 = vld [vmem:[#allocation15 + $0x560] sm:$0xf0] }
 0x27a   :  { %v7576_v50 = vor.u32 %v8896_v38, %v7575_v35  ;;  %v7544_v62 = vor.u32 %v8888_v44, %v7543_v60  ;;  %v8792_v40 = vld [vmem:[#allocation15 + $0xa4] sm:$0xf0]  ;;  %v8931_v17 = vld [vmem:[#allocation15 + $0x504] sm:$0xf]  ;;  %v8079_v60 = vld [vmem:[#allocation15 + $0x7c0] sm:$0xf] }
 0x27b   :  { %2923 = vmatpush.bf16.msrb.mxu3 %v6972_v15  ;;  %v8784_v0 = vld [vmem:[#allocation15 + $0x64] sm:$0xf0]  ;;  %v8907_v16 = vld [vmem:[#allocation15 + $0x444] sm:$0xf]  ;;  %v9023_v44 = vld [vmem:[#allocation15 + $0x7dc] sm:$0xf0] }
 0x27c   :  { %4515 = vmatpush.bf16.msra.mxu1 %v7344_v28  ;;  %v7479_v49 = vld [vmem:[#allocation15 + $0x308] sm:$0xf]  ;;  %v7633_v63 = vld [vmem:[#allocation15 + $0x460] sm:$0xf0] }
 0x27d   :  { %4550 = vmatpush.bf16.msrb.mxu0 %v7220_v21  ;;  %4526 = vmatpush.bf16.msra.mxu2 %v7664_v4  ;;  %v8843_v21 = vld [vmem:[#allocation15 + $0x244] sm:$0xf]  ;;  %v7636_v34 = vor.u32 %v8907_v16, %v7633_v63  ;;  %v8780_v63 = vld [vmem:[#allocation15 + $0x4c] sm:$0xf] }
 0x27e   :  { %2924 = vmatmul.bf16.vlgmr.msrb.gmra.mxu3 %v9770_v45  ;;  %v9845_v45 = vpop.f32.mrf.mxu1  ;;  %v7380_v29 = vor.u32 %v8843_v21, %v7377_v36  ;;  %v7729_v4 = vld [vmem:[#allocation15 + $0x520] sm:$0xf0]  ;;  %v8828_v36 = vld [vmem:[#allocation15 + $0x1cc] sm:$0xf] }
 0x280   :  { %4560 = vmatpush.bf16.msrb.mxu1 %v7572_v55  ;;  %v7288_v55 = vor.u32 %v8824_v14, %v7287_v47  ;;  %v8872_v47 = vld [vmem:[#allocation15 + $0x324] sm:$0xf0]  ;;  %v7697_v14 = vld [vmem:[#allocation15 + $0x4e0] sm:$0xf0] }
 0x281   :  { %4551 = vmatpush.bf16.msrb.mxu0 %v7188_v13  ;;  %v2717_v9 = vpop.f32.mrf.mxu3  ;;  %4527 = vmatpush.bf16.msra.mxu2 %v7632_v46  ;;  %v7828_v13 = vor.u32 %v8955_v27, %v7825_v11  ;;  %v7095_v46 = vld [vmem:[#allocation15 + $0x8] sm:$0xf]  ;;  %v7480_v21 = vor.u32 %v8872_v47, %v7479_v49 }
 0x282   :  { %v2718_v12 = vadd.f32 %v2717_v9, %v2705_v5  ;;  %v7732_v5 = vor.u32 %v8931_v17, %v7729_v4  ;;  %v7127_v9 = vld [vmem:[#allocation15 + $0x48] sm:$0xf]  ;;  %v8892_v17 = vld [vmem:[#allocation15 + $0x3cc] sm:$0xf] }
 0x283   :  { %v7128_v37 = vor.u32 %v8784_v0, %v7127_v9 }
 0x284   :  { %4561 = vmatpush.bf16.msrb.mxu1 %v7540_v52  ;;  %v2930_v15 = vmax.f32 %v2718_v12, 0.0  ;;  %v7256_v52 = vor.u32 %v8816_v24, %v7255_v23  ;;  %v8923_v12 = vld [vmem:[#allocation15 + $0x4c4] sm:$0xf]  ;;  %v7321_v23 = vld [vmem:[#allocation15 + $0x1e8] sm:$0xf0] }
 0x285   :  { %4552 = vmatpush.bf16.msrb.mxu0 %v7156_v39  ;;  %4528 = vmatpush.bf16.msra.mxu2 %v7600_v26  ;;  %v7793_v39 = vld [vmem:[#allocation15 + $0x5a0] sm:$0xf0]  ;;  %v7700_v18 = vor.u32 %v8923_v12, %v7697_v14  ;;  %v7324_v11 = vor.u32 %v8828_v36, %v7321_v23  ;;  %v8796_v12 = vld [vmem:[#allocation15 + $0xcc] sm:$0xf] }
 0x286   :  { %v2745_v28 = vpop.f32.mrf.mxu1  ;;  %2934 = vst [vmem:[%s10103_s13 + $0x8] sm:$0xff] %v2930_v15  ;;  %v9852_v58 = vpack.c.bf16 %v2930_v15, %v2930_v15  ;;  %v8776_v15 = vld [vmem:[#allocation15 + $0x24] sm:$0xf0]  ;;  %v8915_v24 = vld [vmem:[#allocation15 + $0x484] sm:$0xf] }
 0x287   :  { %v7668_v57 = vor.u32 %v8915_v24, %v7665_v25  ;;  %v7096_v26 = vor.u32 %v8776_v15, %v7095_v46  ;;  %v7193_v14 = vld [vmem:[#allocation15 + $0xe8] sm:$0xf0]  ;;  %v8015_v15 = vld [vmem:[#allocation15 + $0x740] sm:$0xf] }
 0x288   :  { %4562 = vmatpush.bf16.msrb.mxu1 %v7508_v30  ;;  %v7796_v30 = vor.u32 %v8947_v41, %v7793_v39  ;;  %v7383_v39 = vld [vmem:[#allocation15 + $0x248] sm:$0xf]  ;;  %v7545_v46 = vld [vmem:[#allocation15 + $0x3a8] sm:$0xf0]  ;;  %v7196_v36 = vor.u32 %v8796_v12, %v7193_v14 }
 0x289   :  { %4553 = vmatpush.bf16.msrb.mxu0 %v7124_v31  ;;  %4516 = vmatmul.bf16.vlgmr.msra.gmra.mxu1 %v9852_v58  ;;  %v2719_v20 = vpop.f32.mrf.mxu3  ;;  %v8939_v31 = vld [vmem:[#allocation15 + $0x544] sm:$0xf]  ;;  %v8788_v24 = vld [vmem:[#allocation15 + $0x8c] sm:$0xf]  ;;  %v7831_v12 = vld [vmem:[#allocation15 + $0x5c8] sm:$0xf] }
 0x28a   :  { %v9856_v33 = vpop.f32.mrf.mxu2  ;;  %4573 = vmatpush.bf16.msrb.mxu2 %v7828_v13  ;;  %v7764_v59 = vor.u32 %v8939_v31, %v7761_v56  ;;  %v7415_v13 = vld [vmem:[#allocation15 + $0x288] sm:$0xf]  ;;  %v8080_v31 = vor.u32 %v9023_v44, %v8079_v60  ;;  %v9866_v56 = vld [vmem:[#allocation13] sm:$0xf]  ;;  %v7161_v25 = vld [vmem:[#allocation15 + $0xa8] sm:$0xf0] }
 0x28b   :  { %v7327_v60 = vld [vmem:[#allocation15 + $0x1d0] sm:$0xf]  ;;  %v8844_v14 = vld [vmem:[#allocation15 + $0x24c] sm:$0xf] }
 0x28c   :  { %4563 = vmatpush.bf16.msrb.mxu1 %v7476_v61  ;;  %v7192_v61 = vor.u32 %v8800_v54, %v7191_v53  ;;  %v7601_v53 = vld [vmem:[#allocation15 + $0x420] sm:$0xf0]  ;;  %4534 = vmatpush.bf16.msra.mxu3 %v8080_v31  ;;  %v8833_v31 = vld [vmem:[#allocation15 + $0x1ec] sm:$0xf0] }
 0x28d   :  { %4554 = vmatpush.bf16.msrb.mxu0 %v7092_v6 }
 0x28e   :  { %4574 = vmatpush.bf16.msrb.mxu2 %v7796_v30  ;;  %v8848_v30 = vld [vmem:[#allocation15 + $0x264] sm:$0xf0] }
 0x28f   :  { %v9858_v43 = vpop.f32.mrf.mxu0 }
 0x290   :  { %4564 = vmatpush.bf16.msrb.mxu1 %v7444_v8  ;;  %4555 = vmatmul.bf16.vlgmr.msrb.gmra.mxu0 %v9831_v51  ;;  %v7160_v8 = vor.u32 %v8792_v40, %v7159_v2  ;;  %v8840_v2 = vld [vmem:[#allocation15 + $0x224] sm:$0xf0] }
 0x291   :  { %4599 = vmatpush.bf16.msra.mxu0 %v7320_v7  ;;  %v7512_v7 = vor.u32 %v8880_v32, %v7511_v3  ;;  %v8804_v3 = vld [vmem:[#allocation15 + $0x10c] sm:$0xf] }
 0x292   :  { %v2758_v10 = vpop.f32.mrf.mxu2  ;;  %4575 = vmatpush.bf16.msrb.mxu2 %v7764_v59  ;;  %v1199_v59 = vperm.slane %v9866_v56, 2  ;;  %v7225_v32 = vld [vmem:[#allocation15 + $0x128] sm:$0xf0] }
 0x293   :  { %v7228_v0 = vor.u32 %v8804_v3, %v7225_v32  ;;  %v8852_v3 = vld [vmem:[#allocation15 + $0x28c] sm:$0xf] }
 0x294   :  { %4565 = vmatpush.bf16.msrb.mxu1 %v7412_v22  ;;  %v7447_v22 = vld [vmem:[#allocation15 + $0x2c8] sm:$0xf]  ;;  %v7417_v32 = vld [vmem:[#allocation15 + $0x2a8] sm:$0xf0] }
 0x295   :  { %4600 = vmatpush.bf16.msra.mxu0 %v7288_v55  ;;  %v8864_v55 = vld [vmem:[#allocation15 + $0x2e4] sm:$0xf0] }
 0x296   :  { %4576 = vmatpush.bf16.msrb.mxu2 %v7732_v5  ;;  %v7448_v27 = vor.u32 %v8864_v55, %v7447_v22  ;;  %v7577_v5 = vld [vmem:[#allocation15 + $0x3e8] sm:$0xf0] }
 0x297   :  { %v2784_v6 = vpop.f32.mrf.mxu0  ;;  %v7580_v47 = vor.u32 %v8892_v17, %v7577_v5  ;;  %v7295_v17 = vld [vmem:[#allocation15 + $0x190] sm:$0xf] }
 0x298   :  { %4566 = vmatpush.bf16.msrb.mxu1 %v7380_v29  ;;  %v8856_v29 = vld [vmem:[#allocation15 + $0x2a4] sm:$0xf0]  ;;  %v8047_v6 = vld [vmem:[#allocation15 + $0x780] sm:$0xf] }
 0x299   :  { %4601 = vmatpush.bf16.msra.mxu0 %v7256_v52  ;;  %v8820_v52 = vld [vmem:[#allocation15 + $0x18c] sm:$0xf]  ;;  %v7416_v38 = vor.u32 %v8856_v29, %v7415_v13  ;;  %v8999_v13 = vld [vmem:[#allocation15 + $0x71c] sm:$0xf0] }
 0x29a   :  { %4577 = vmatpush.bf16.msrb.mxu2 %v7700_v18  ;;  %v7292_v41 = vor.u32 %v8820_v52, %v7289_v1  ;;  %v8884_v18 = vld [vmem:[#allocation15 + $0x38c] sm:$0xf]  ;;  %v7164_v52 = vor.u32 %v8788_v24, %v7161_v25  ;;  %v7799_v24 = vld [vmem:[#allocation15 + $0x588] sm:$0xf] }
 0x29b   :  { %v7548_v23 = vor.u32 %v8884_v18, %v7545_v46  ;;  %v7420_v18 = vor.u32 %v8852_v3, %v7417_v32  ;;  %v7385_v46 = vld [vmem:[#allocation15 + $0x268] sm:$0xf0] }
 0x29c   :  { %4567 = vmatpush.bf16.msrb.mxu1 %v7348_v19  ;;  %v9861_v28 = vpop.f32.mrf.mxu1  ;;  %v8812_v19 = vld [vmem:[#allocation15 + $0x14c] sm:$0xf] }
 0x29d   :  { %4602 = vmatpush.bf16.msra.mxu0 %v7224_v42  ;;  %v7257_v42 = vld [vmem:[#allocation15 + $0x168] sm:$0xf0] }
 0x29e   :  { %4578 = vmatpush.bf16.msrb.mxu2 %v7668_v57  ;;  %v7260_v10 = vor.u32 %v8812_v19, %v7257_v42  ;;  %v8876_v57 = vld [vmem:[#allocation15 + $0x34c] sm:$0xf] }
 0x29f   :  { %4568 = vmatmul.bf16.vlgmr.msrb.gmra.mxu1 %v9852_v58  ;;  %v8772_v42 = vld [vmem:[#allocation15 + $0xc] sm:$0xf] }
 0x2a0   :  { %4612 = vmatpush.bf16.msra.mxu1 %v7576_v50  ;;  %v8899_v50 = vld [vmem:[#allocation15 + $0x404] sm:$0xf] }
 0x2a1   :  { %4603 = vmatpush.bf16.msra.mxu0 %v7192_v61  ;;  %v9863_v20 = vpop.f32.mrf.mxu3  ;;  %v7604_v54 = vor.u32 %v8899_v50, %v7601_v53  ;;  %v7384_v61 = vor.u32 %v8848_v30, %v7383_v39  ;;  %v7097_v50 = vld [vmem:[#allocation15 + $0x28] sm:$0xf0] }
 0x2a2   :  { %4579 = vmatpush.bf16.msrb.mxu2 %v7636_v34  ;;  %v7129_v34 = vld [vmem:[#allocation15 + $0x68] sm:$0xf0] }
 0x2a3   :  { %v7132_v19 = vor.u32 %v8780_v63, %v7129_v34  ;;  %v8860_v53 = vld [vmem:[#allocation15 + $0x2cc] sm:$0xf]  ;;  %v7583_v63 = vld [vmem:[#allocation15 + $0x3d0] sm:$0xf] }
 0x2a4   :  { %4613 = vmatpush.bf16.msra.mxu1 %v7544_v62  ;;  %v2797_v35 = vpop.f32.mrf.mxu1  ;;  %v7351_v62 = vld [vmem:[#allocation15 + $0x208] sm:$0xf] }
 0x2a5   :  { %4604 = vmatpush.bf16.msra.mxu0 %v7160_v8  ;;  %v9015_v8 = vld [vmem:[#allocation15 + $0x79c] sm:$0xf0]  ;;  %v7352_v9 = vor.u32 %v8840_v2, %v7351_v62  ;;  %v8868_v35 = vld [vmem:[#allocation15 + $0x30c] sm:$0xf] }
 0x2a6   :  { %4580 = vmatpush.bf16.msrb.mxu2 %v7604_v54  ;;  %v7449_v54 = vld [vmem:[#allocation15 + $0x2e8] sm:$0xf0] }
 0x2a7   :  { %v7452_v2 = vor.u32 %v8860_v53, %v7449_v54  ;;  %v7199_v54 = vld [vmem:[#allocation15 + $0xd0] sm:$0xf] }
 0x2a8   :  { %4614 = vmatpush.bf16.msra.mxu1 %v7512_v7  ;;  %v8048_v7 = vor.u32 %v9015_v8, %v8047_v6  ;;  %v8825_v6 = vld [vmem:[#allocation15 + $0x1ac] sm:$0xf0]  ;;  %v7887_v8 = vld [vmem:[#allocation15 + $0x640] sm:$0xf] }
 0x2a9   :  { %4605 = vmatpush.bf16.msra.mxu0 %v7128_v37  ;;  %v2771_v40 = vpop.f32.mrf.mxu3  ;;  %v2731_v37 = vadd.f32 %v9838_v48, %v1199_v59  ;;  %v7983_v48 = vld [vmem:[#allocation15 + $0x700] sm:$0xf] }
 0x2aa   :  { %v9869_v4 = vpop.f32.mrf.mxu2  ;;  %4535 = vmatpush.bf16.msra.mxu3 %v8048_v7  ;;  %v7984_v29 = vor.u32 %v8999_v13, %v7983_v48  ;;  %v7919_v59 = vld [vmem:[#allocation15 + $0x680] sm:$0xf]  ;;  %v7328_v40 = vor.u32 %v8833_v31, %v7327_v60  ;;  %v7388_v48 = vor.u32 %v8844_v14, %v7385_v46  ;;  %v8801_v60 = vld [vmem:[#allocation15 + $0xec] sm:$0xf0]  ;;  %v8928_v14 = vld [vmem:[#allocation15 + $0x4e4] sm:$0xf0] }
 0x2ab   :  { %v2744_v55 = vadd.f32 %v9845_v45, %v2731_v37  ;;  %v8975_v7 = vld [vmem:[#allocation15 + $0x65c] sm:$0xf0]  ;;  %v7296_v37 = vor.u32 %v8825_v6, %v7295_v17  ;;  %v7551_v31 = vld [vmem:[#allocation15 + $0x390] sm:$0xf]  ;;  %v7200_v32 = vor.u32 %v8801_v60, %v7199_v54  ;;  %v8821_v54 = vld [vmem:[#allocation15 + $0x194] sm:$0xf] }
 0x2ac   :  { %4615 = vmatpush.bf16.msra.mxu1 %v7480_v21  ;;  %v9007_v21 = vld [vmem:[#allocation15 + $0x75c] sm:$0xf0]  ;;  %v8793_v6 = vld [vmem:[#allocation15 + $0xac] sm:$0xf0] }
 0x2ad   :  { %4606 = vmatpush.bf16.msra.mxu0 %v7096_v26  ;;  %v8016_v22 = vor.u32 %v9007_v21, %v8015_v15  ;;  %v2757_v26 = vadd.f32 %v9856_v33, %v2744_v55  ;;  %v7951_v33 = vld [vmem:[#allocation15 + $0x6c0] sm:$0xf]  ;;  %v7263_v15 = vld [vmem:[#allocation15 + $0x150] sm:$0xf] }
 0x2ae   :  { %v8817_v21 = vld [vmem:[#allocation15 + $0x16c] sm:$0xf0] }
 0x2af   :  { %v9871_v49 = vpop.f32.mrf.mxu0  ;;  %4536 = vmatpush.bf16.msra.mxu3 %v8016_v22  ;;  %v2770_v45 = vadd.f32 %v9863_v20, %v2757_v26  ;;  %v7264_v13 = vor.u32 %v8817_v21, %v7263_v15  ;;  %v7135_v15 = vld [vmem:[#allocation15 + $0x50] sm:$0xf] }
 0x2b0   :  { %4616 = vmatpush.bf16.msra.mxu1 %v7448_v27  ;;  %4607 = vmatmul.bf16.vlgmr.msra.gmra.mxu0 %v9831_v51  ;;  %v8785_v21 = vld [vmem:[#allocation15 + $0x6c] sm:$0xf0] }
 0x2b1   :  { %4651 = vmatpush.bf16.msrb.mxu0 %v7324_v11  ;;  %v7513_v11 = vld [vmem:[#allocation15 + $0x368] sm:$0xf0]  ;;  %v2783_v30 = vadd.f32 %v9858_v43, %v2770_v45  ;;  %v7100_v43 = vor.u32 %v8772_v42, %v7097_v50 }
 0x2b2   :  { %v2810_v27 = vpop.f32.mrf.mxu2  ;;  %v7516_v16 = vor.u32 %v8876_v57, %v7513_v11  ;;  %v9019_v57 = vld [vmem:[#allocation15 + $0x7c4] sm:$0xf]  ;;  %v7353_v45 = vld [vmem:[#allocation15 + $0x228] sm:$0xf0] }
 0x2b3   :  { %4537 = vmatpush.bf16.msra.mxu3 %v7984_v29  ;;  %v2796_v62 = vadd.f32 %v9861_v28, %v2783_v30  ;;  %v8960_v28 = vld [vmem:[#allocation15 + $0x5e4] sm:$0xf0]  ;;  %v8081_v11 = vld [vmem:[#allocation15 + $0x7e0] sm:$0xf0]  ;;  %v8836_v29 = vld [vmem:[#allocation15 + $0x20c] sm:$0xf] }
 0x2b4   :  { %4617 = vmatpush.bf16.msra.mxu1 %v7416_v38  ;;  %v7481_v38 = vld [vmem:[#allocation15 + $0x328] sm:$0xf0]  ;;  %v8952_v27 = vld [vmem:[#allocation15 + $0x5a4] sm:$0xf0]  ;;  %v7356_v50 = vor.u32 %v8836_v29, %v7353_v45  ;;  %v7455_v45 = vld [vmem:[#allocation15 + $0x2d0] sm:$0xf] }
 0x2b5   :  { %4652 = vmatpush.bf16.msrb.mxu0 %v7292_v41  ;;  %v8991_v41 = vld [vmem:[#allocation15 + $0x6dc] sm:$0xf0]  ;;  %v7484_v20 = vor.u32 %v8868_v35, %v7481_v38  ;;  %v2809_v5 = vadd.f32 %v9869_v4, %v2796_v62  ;;  %v7800_v35 = vor.u32 %v8952_v27, %v7799_v24  ;;  %v8897_v38 = vld [vmem:[#allocation15 + $0x3ec] sm:$0xf0]  ;;  %v7767_v30 = vld [vmem:[#allocation15 + $0x548] sm:$0xf] }
 0x2b6   :  { %v7952_v39 = vor.u32 %v8991_v41, %v7951_v33  ;;  %v7855_v4 = vld [vmem:[#allocation15 + $0x600] sm:$0xf]  ;;  %v9011_v33 = vld [vmem:[#allocation15 + $0x784] sm:$0xf]  ;;  %v7584_v53 = vor.u32 %v8897_v38, %v7583_v63  ;;  %v7329_v63 = vld [vmem:[#allocation15 + $0x1f0] sm:$0xf0] }
 0x2b7   :  { %v2836_v1 = vpop.f32.mrf.mxu0  ;;  %v8049_v41 = vld [vmem:[#allocation15 + $0x7a0] sm:$0xf0] }
 0x2b8   :  { %4618 = vmatpush.bf16.msra.mxu1 %v7384_v61  ;;  %4538 = vmatpush.bf16.msra.mxu3 %v7952_v39  ;;  %v8983_v61 = vld [vmem:[#allocation15 + $0x69c] sm:$0xf0]  ;;  %v7231_v1 = vld [vmem:[#allocation15 + $0x110] sm:$0xf]  ;;  %v8052_v42 = vor.u32 %v9011_v33, %v8049_v41  ;;  %v9003_v62 = vld [vmem:[#allocation15 + $0x744] sm:$0xf] }
 0x2b9   :  { %4653 = vmatpush.bf16.msrb.mxu0 %v7260_v10  ;;  %v7920_v10 = vor.u32 %v8983_v61, %v7919_v59  ;;  %v7953_v24 = vld [vmem:[#allocation15 + $0x6e0] sm:$0xf0]  ;;  %v7639_v33 = vld [vmem:[#allocation15 + $0x448] sm:$0xf] }
 0x2ba   :  { %v8912_v41 = vld [vmem:[#allocation15 + $0x464] sm:$0xf0] }
 0x2bb   :  { %v7640_v60 = vor.u32 %v8912_v41, %v7639_v33  ;;  %v8932_v41 = vld [vmem:[#allocation15 + $0x50c] sm:$0xf] }
 0x2bc   :  { %4619 = vmatpush.bf16.msra.mxu1 %v7352_v9  ;;  %v9879_v44 = vpop.f32.mrf.mxu1  ;;  %4539 = vmatpush.bf16.msra.mxu3 %v7920_v10  ;;  %v8889_v10 = vld [vmem:[#allocation15 + $0x3ac] sm:$0xf0] }
 0x2bd   :  { %4654 = vmatpush.bf16.msrb.mxu0 %v7228_v0  ;;  %v7888_v0 = vor.u32 %v8975_v7, %v7887_v8  ;;  %v7552_v17 = vor.u32 %v8889_v10, %v7551_v31  ;;  %v7519_v8 = vld [vmem:[#allocation15 + $0x350] sm:$0xf]  ;;  %v7297_v31 = vld [vmem:[#allocation15 + $0x1b0] sm:$0xf0]  ;;  %v7889_v10 = vld [vmem:[#allocation15 + $0x660] sm:$0xf0] }
 0x2bf   :  { %4620 = vmatmul.bf16.vlgmr.msra.gmra.mxu1 %v9852_v58 }
 0x2c0   :  { %4664 = vmatpush.bf16.msrb.mxu1 %v7580_v47  ;;  %4540 = vmatpush.bf16.msra.mxu3 %v7888_v0  ;;  %v8995_v0 = vld [vmem:[#allocation15 + $0x704] sm:$0xf] }
 0x2c1   :  { %4655 = vmatpush.bf16.msrb.mxu0 %v7196_v36  ;;  %v2821_v9 = vpop.f32.mrf.mxu3  ;;  %v8967_v36 = vld [vmem:[#allocation15 + $0x61c] sm:$0xf0] }
 0x2c2   :  { %v2822_v47 = vadd.f32 %v2821_v9, %v2809_v5  ;;  %v7856_v25 = vor.u32 %v8967_v36, %v7855_v4  ;;  %v7167_v5 = vld [vmem:[#allocation15 + $0x90] sm:$0xf] }
 0x2c3   :  { %v8881_v9 = vld [vmem:[#allocation15 + $0x36c] sm:$0xf0] }
 0x2c4   :  { %4665 = vmatpush.bf16.msrb.mxu1 %v7548_v23  ;;  %v2931_v22 = vmax.f32 %v2822_v47, 0.0  ;;  %v2849_v55 = vpop.f32.mrf.mxu1  ;;  %v7832_v23 = vor.u32 %v8960_v28, %v7831_v12  ;;  %4541 = vmatpush.bf16.msra.mxu3 %v7856_v25  ;;  %v7985_v47 = vld [vmem:[#allocation15 + $0x720] sm:$0xf0]  ;;  %v7703_v28 = vld [vmem:[#allocation15 + $0x4c8] sm:$0xf]  ;;  %v7520_v46 = vor.u32 %v8881_v9, %v7519_v8 }
 0x2c5   :  { %4656 = vmatpush.bf16.msrb.mxu0 %v7164_v52  ;;  %v8084_v52 = vor.u32 %v9019_v57, %v8081_v11  ;;  %v7704_v4 = vor.u32 %v8928_v14, %v7703_v28  ;;  %v8873_v36 = vld [vmem:[#allocation15 + $0x32c] sm:$0xf0]  ;;  %v7671_v25 = vld [vmem:[#allocation15 + $0x488] sm:$0xf]  ;;  %v7136_v11 = vor.u32 %v8785_v21, %v7135_v15 }
 0x2c6   :  { %2935 = vst [vmem:[%s10103_s13 + $0x10] sm:$0xff] %v2931_v22  ;;  %v9887_v26 = vpack.c.bf16 %v2931_v22, %v2931_v22  ;;  %v7487_v22 = vld [vmem:[#allocation15 + $0x310] sm:$0xf]  ;;  %v8920_v57 = vld [vmem:[#allocation15 + $0x4a4] sm:$0xf0] }
 0x2c7   :  { %v7488_v29 = vor.u32 %v8873_v36, %v7487_v22  ;;  %v8849_v8 = vld [vmem:[#allocation15 + $0x26c] sm:$0xf0]  ;;  %v7233_v36 = vld [vmem:[#allocation15 + $0x130] sm:$0xf0] }
 0x2c8   :  { %4666 = vmatpush.bf16.msrb.mxu1 %v7516_v16  ;;  %4529 = vmatmul.bf16.vlgmr.msra.gmra.mxu2 %v9887_v26  ;;  %v8809_v16 = vld [vmem:[#allocation15 + $0x12c] sm:$0xf0] }
 0x2c9   :  { %4657 = vmatpush.bf16.msrb.mxu0 %v7132_v19  ;;  %4625 = vmatpush.bf16.msra.mxu2 %v7832_v23  ;;  %v2823_v34 = vpop.f32.mrf.mxu3  ;;  %v8944_v19 = vld [vmem:[#allocation15 + $0x564] sm:$0xf0]  ;;  %v8987_v23 = vld [vmem:[#allocation15 + $0x6c4] sm:$0xf]  ;;  %v7359_v22 = vld [vmem:[#allocation15 + $0x210] sm:$0xf] }
 0x2ca   :  { %4586 = vmatpush.bf16.msrb.mxu3 %v8084_v52  ;;  %v9890_v39 = vpop.f32.mrf.mxu2  ;;  %v7768_v61 = vor.u32 %v8944_v19, %v7767_v30  ;;  %v7956_v27 = vor.u32 %v8987_v23, %v7953_v24  ;;  %v8865_v52 = vld [vmem:[#allocation15 + $0x2ec] sm:$0xf0]  ;;  %v8979_v34 = vld [vmem:[#allocation15 + $0x684] sm:$0xf]  ;;  %v8893_v24 = vld [vmem:[#allocation15 + $0x3d4] sm:$0xf] }
 0x2cc   :  { %4667 = vmatpush.bf16.msrb.mxu1 %v7484_v20  ;;  %v7232_v20 = vor.u32 %v8809_v16, %v7231_v1  ;;  %v8829_v1 = vld [vmem:[#allocation15 + $0x1d4] sm:$0xf]  ;;  %v7672_v16 = vor.u32 %v8920_v57, %v7671_v25 }
 0x2cd   :  { %4658 = vmatpush.bf16.msrb.mxu0 %v7100_v43  ;;  %4626 = vmatpush.bf16.msra.mxu2 %v7800_v35  ;;  %v8017_v43 = vld [vmem:[#allocation15 + $0x760] sm:$0xf0]  ;;  %v7585_v25 = vld [vmem:[#allocation15 + $0x3f0] sm:$0xf0] }
 0x2ce   :  { %4587 = vmatpush.bf16.msrb.mxu3 %v8052_v42  ;;  %v8020_v3 = vor.u32 %v9003_v62, %v8017_v43  ;;  %v7921_v35 = vld [vmem:[#allocation15 + $0x6a0] sm:$0xf0]  ;;  %v7456_v42 = vor.u32 %v8865_v52, %v7455_v45  ;;  %v7607_v62 = vld [vmem:[#allocation15 + $0x408] sm:$0xf]  ;;  %v7588_v52 = vor.u32 %v8893_v24, %v7585_v25  ;;  %v7425_v25 = vld [vmem:[#allocation15 + $0x2b0] sm:$0xf0] }
 0x2cf   :  { %v9892_v59 = vpop.f32.mrf.mxu0  ;;  %v7924_v30 = vor.u32 %v8979_v34, %v7921_v35  ;;  %v8904_v43 = vld [vmem:[#allocation15 + $0x424] sm:$0xf0]  ;;  %v8885_v34 = vld [vmem:[#allocation15 + $0x394] sm:$0xf] }
 0x2d0   :  { %4668 = vmatpush.bf16.msrb.mxu1 %v7452_v2  ;;  %4659 = vmatmul.bf16.vlgmr.msrb.gmra.mxu0 %v9831_v51  ;;  %v7735_v2 = vld [vmem:[#allocation15 + $0x508] sm:$0xf]  ;;  %v7608_v9 = vor.u32 %v8904_v43, %v7607_v62  ;;  %v7553_v35 = vld [vmem:[#allocation15 + $0x3b0] sm:$0xf0] }
 0x2d1   :  { %4703 = vmatpush.bf16.msra.mxu0 %v7328_v40  ;;  %v8936_v40 = vld [vmem:[#allocation15 + $0x524] sm:$0xf0]  ;;  %4627 = vmatpush.bf16.msra.mxu2 %v7768_v61  ;;  %v8971_v61 = vld [vmem:[#allocation15 + $0x644] sm:$0xf] }
 0x2d2   :  { %v7736_v7 = vor.u32 %v8936_v40, %v7735_v2  ;;  %4588 = vmatpush.bf16.msrb.mxu3 %v8020_v3  ;;  %v2862_v12 = vpop.f32.mrf.mxu2  ;;  %v7892_v2 = vor.u32 %v8971_v61, %v7889_v10  ;;  %v8956_v3 = vld [vmem:[#allocation15 + $0x5cc] sm:$0xf] }
 0x2d3   :  { %v7857_v12 = vld [vmem:[#allocation15 + $0x620] sm:$0xf0]  ;;  %v8924_v61 = vld [vmem:[#allocation15 + $0x4cc] sm:$0xf] }
 0x2d4   :  { %4669 = vmatpush.bf16.msrb.mxu1 %v7420_v18  ;;  %v7988_v18 = vor.u32 %v8995_v0, %v7985_v47  ;;  %v7265_v0 = vld [vmem:[#allocation15 + $0x170] sm:$0xf0]  ;;  %v8963_v47 = vld [vmem:[#allocation15 + $0x604] sm:$0xf]  ;;  %v7705_v10 = vld [vmem:[#allocation15 + $0x4e8] sm:$0xf0] }
 0x2d5   :  { %4704 = vmatpush.bf16.msra.mxu0 %v7296_v37  ;;  %v7168_v37 = vor.u32 %v8793_v6, %v7167_v5  ;;  %4628 = vmatpush.bf16.msra.mxu2 %v7736_v7  ;;  %v7300_v5 = vor.u32 %v8821_v54, %v7297_v31  ;;  %v7391_v6 = vld [vmem:[#allocation15 + $0x250] sm:$0xf]  ;;  %v8813_v7 = vld [vmem:[#allocation15 + $0x154] sm:$0xf] }
 0x2d6   :  { %4589 = vmatpush.bf16.msrb.mxu3 %v7988_v18  ;;  %v7860_v18 = vor.u32 %v8963_v47, %v7857_v12  ;;  %v7392_v15 = vor.u32 %v8849_v8, %v7391_v6  ;;  %v7268_v21 = vor.u32 %v8813_v7, %v7265_v0  ;;  %v7521_v31 = vld [vmem:[#allocation15 + $0x370] sm:$0xf0]  ;;  %v8916_v7 = vld [vmem:[#allocation15 + $0x48c] sm:$0xf] }
 0x2d7   :  { %v2888_v55 = vpop.f32.mrf.mxu0  ;;  %v7489_v6 = vld [vmem:[#allocation15 + $0x330] sm:$0xf0] }
 0x2d8   :  { %4670 = vmatpush.bf16.msrb.mxu1 %v7388_v48  ;;  %v7103_v48 = vld [vmem:[#allocation15 + $0x10] sm:$0xf]  ;;  %4581 = vmatmul.bf16.vlgmr.msrb.gmra.mxu2 %v9887_v26  ;;  %v8773_v47 = vld [vmem:[#allocation15 + $0x14] sm:$0xf] }
 0x2d9   :  { %4705 = vmatpush.bf16.msra.mxu0 %v7264_v13  ;;  %v8777_v13 = vld [vmem:[#allocation15 + $0x2c] sm:$0xf0]  ;;  %4629 = vmatpush.bf16.msra.mxu2 %v7704_v4  ;;  %v8805_v4 = vld [vmem:[#allocation15 + $0x114] sm:$0xf] }
 0x2da   :  { %4590 = vmatpush.bf16.msrb.mxu3 %v7956_v27  ;;  %v7104_v19 = vor.u32 %v8777_v13, %v7103_v48  ;;  %v8841_v55 = vld [vmem:[#allocation15 + $0x22c] sm:$0xf0]  ;;  %v8940_v27 = vld [vmem:[#allocation15 + $0x54c] sm:$0xf]  ;;  %v1200_v48 = vperm.slane %v9866_v56, 3  ;;  %v7236_v45 = vor.u32 %v8805_v4, %v7233_v36 }
 0x2db   :  { %v7105_v12 = vld [vmem:[#allocation15 + $0x30] sm:$0xf0] }
 0x2dc   :  { %4671 = vmatpush.bf16.msrb.mxu1 %v7356_v50  ;;  %v9896_v38 = vpop.f32.mrf.mxu1  ;;  %v7332_v50 = vor.u32 %v8829_v1, %v7329_v63  ;;  %v8797_v1 = vld [vmem:[#allocation15 + $0xd4] sm:$0xf]  ;;  %v2835_v56 = vadd.f32 %v9871_v49, %v1200_v48 }
 0x2dd   :  { %4706 = vmatpush.bf16.msra.mxu0 %v7232_v20  ;;  %v7423_v20 = vld [vmem:[#allocation15 + $0x290] sm:$0xf]  ;;  %4630 = vmatpush.bf16.msra.mxu2 %v7672_v16  ;;  %v7201_v16 = vld [vmem:[#allocation15 + $0xf0] sm:$0xf0] }
 0x2de   :  { %4591 = vmatpush.bf16.msrb.mxu3 %v7924_v30  ;;  %v7737_v30 = vld [vmem:[#allocation15 + $0x528] sm:$0xf0]  ;;  %v8853_v36 = vld [vmem:[#allocation15 + $0x294] sm:$0xf] }
 0x2df   :  { %4672 = vmatmul.bf16.vlgmr.msrb.gmra.mxu1 %v9852_v58  ;;  %v7740_v54 = vor.u32 %v8932_v41, %v7737_v30  ;;  %v8845_v41 = vld [vmem:[#allocation15 + $0x254] sm:$0xf] }
 0x2e0   :  { %4716 = vmatpush.bf16.msra.mxu1 %v7584_v53  ;;  %v8857_v53 = vld [vmem:[#allocation15 + $0x2ac] sm:$0xf0]  ;;  %v7393_v30 = vld [vmem:[#allocation15 + $0x270] sm:$0xf0] }
 0x2e1   :  { %4707 = vmatpush.bf16.msra.mxu0 %v7200_v32  ;;  %v9898_v40 = vpop.f32.mrf.mxu3  ;;  %v7833_v32 = vld [vmem:[#allocation15 + $0x5e8] sm:$0xf0]  ;;  %4631 = vmatpush.bf16.msra.mxu2 %v7640_v60  ;;  %v8877_v60 = vld [vmem:[#allocation15 + $0x354] sm:$0xf] }
 0x2e2   :  { %4592 = vmatpush.bf16.msrb.mxu3 %v7892_v2  ;;  %v7836_v14 = vor.u32 %v8956_v3, %v7833_v32  ;;  %v7524_v2 = vor.u32 %v8877_v60, %v7521_v31  ;;  %v8781_v3 = vld [vmem:[#allocation15 + $0x54] sm:$0xf]  ;;  %v7396_v60 = vor.u32 %v8845_v41, %v7393_v30  ;;  %v8055_v31 = vld [vmem:[#allocation15 + $0x788] sm:$0xf]  ;;  %v8786_v30 = vld [vmem:[#allocation15 + $0x74] sm:$0xf0] }
 0x2e3   :  { %v7137_v32 = vld [vmem:[#allocation15 + $0x70] sm:$0xf0] }
 0x2e4   :  { %4717 = vmatpush.bf16.msra.mxu1 %v7552_v17  ;;  %v7424_v17 = vor.u32 %v8857_v53, %v7423_v20  ;;  %v2901_v28 = vpop.f32.mrf.mxu1  ;;  %v7169_v20 = vld [vmem:[#allocation15 + $0xb0] sm:$0xf0]  ;;  %v2848_v53 = vadd.f32 %v9879_v44, %v2835_v56  ;;  %v7708_v44 = vor.u32 %v8924_v61, %v7705_v10  ;;  %v7140_v0 = vor.u32 %v8781_v3, %v7137_v32  ;;  %v9016_v61 = vld [vmem:[#allocation15 + $0x7a4] sm:$0xf0]  ;;  %v8810_v32 = vld [vmem:[#allocation15 + $0x134] sm:$0xf0] }
 0x2e5   :  { %4708 = vmatpush.bf16.msra.mxu0 %v7168_v37  ;;  %v8948_v37 = vld [vmem:[#allocation15 + $0x58c] sm:$0xf]  ;;  %4632 = vmatpush.bf16.msra.mxu2 %v7608_v9  ;;  %v8861_v28 = vld [vmem:[#allocation15 + $0x2d4] sm:$0xf] }
 0x2e6   :  { %4593 = vmatpush.bf16.msrb.mxu3 %v7860_v18  ;;  %v2861_v62 = vadd.f32 %v9890_v39, %v2848_v53  ;;  %v7673_v9 = vld [vmem:[#allocation15 + $0x4a8] sm:$0xf0]  ;;  %v8953_v53 = vld [vmem:[#allocation15 + $0x5ac] sm:$0xf0]  ;;  %v8837_v10 = vld [vmem:[#allocation15 + $0x214] sm:$0xf] }
 0x2e7   :  { %v7676_v18 = vor.u32 %v8916_v7, %v7673_v9  ;;  %v8056_v9 = vor.u32 %v9016_v61, %v8055_v31  ;;  %v7927_v31 = vld [vmem:[#allocation15 + $0x688] sm:$0xf] }
 0x2e8   :  { %4718 = vmatpush.bf16.msra.mxu1 %v7520_v46  ;;  %v7801_v46 = vld [vmem:[#allocation15 + $0x5a8] sm:$0xf0]  ;;  %4633 = vmatmul.bf16.vlgmr.msra.gmra.mxu2 %v9887_v26 }
 0x2e9   :  { %4709 = vmatpush.bf16.msra.mxu0 %v7136_v11  ;;  %4677 = vmatpush.bf16.msrb.mxu2 %v7836_v14  ;;  %v7804_v23 = vor.u32 %v8948_v37, %v7801_v46  ;;  %v2875_v57 = vpop.f32.mrf.mxu3  ;;  %v7769_v11 = vld [vmem:[#allocation15 + $0x568] sm:$0xf0]  ;;  %v7457_v37 = vld [vmem:[#allocation15 + $0x2f0] sm:$0xf0]  ;;  %v8834_v46 = vld [vmem:[#allocation15 + $0x1f4] sm:$0xf0] }
 0x2ea   :  { %v9902_v13 = vpop.f32.mrf.mxu2  ;;  %v7772_v63 = vor.u32 %v8940_v27, %v7769_v11  ;;  %v7303_v57 = vld [vmem:[#allocation15 + $0x198] sm:$0xf]  ;;  %v8900_v27 = vld [vmem:[#allocation15 + $0x40c] sm:$0xf] }
 0x2eb   :  { %v7609_v11 = vld [vmem:[#allocation15 + $0x428] sm:$0xf0] }
 0x2ec   :  { %4719 = vmatpush.bf16.msra.mxu1 %v7488_v29  ;;  %v7360_v29 = vor.u32 %v8841_v55, %v7359_v22  ;;  %v7108_v22 = vor.u32 %v8773_v47, %v7105_v12  ;;  %v7460_v55 = vor.u32 %v8861_v28, %v7457_v37  ;;  %v8023_v12 = vld [vmem:[#allocation15 + $0x748] sm:$0xf]  ;;  %v8802_v37 = vld [vmem:[#allocation15 + $0xf4] sm:$0xf0] }
 0x2ed   :  { %4710 = vmatpush.bf16.msra.mxu0 %v7104_v19  ;;  %4678 = vmatpush.bf16.msrb.mxu2 %v7804_v23  ;;  %v9905_v33 = vpop.f32.mrf.mxu0  ;;  %v7204_v19 = vor.u32 %v8797_v1, %v7201_v16  ;;  %v7428_v1 = vor.u32 %v8853_v36, %v7425_v25  ;;  %v9008_v28 = vld [vmem:[#allocation15 + $0x764] sm:$0xf0] }
 0x2f0   :  { %4720 = vmatpush.bf16.msra.mxu1 %v7456_v42  ;;  %4711 = vmatmul.bf16.vlgmr.msra.gmra.mxu0 %v9831_v51  ;;  %v7556_v42 = vor.u32 %v8885_v34, %v7553_v35  ;;  %v9024_v35 = vld [vmem:[#allocation15 + $0x7e4] sm:$0xf0] }
 0x2f1   :  { %4755 = vmatpush.bf16.msrb.mxu0 %v7332_v50  ;;  %v8789_v50 = vld [vmem:[#allocation15 + $0x94] sm:$0xf]  ;;  %4679 = vmatpush.bf16.msrb.mxu2 %v7772_v63  ;;  %v8087_v63 = vld [vmem:[#allocation15 + $0x7c8] sm:$0xf] }
 0x2f2   :  { %v2914_v49 = vpop.f32.mrf.mxu2  ;;  %v7172_v43 = vor.u32 %v8789_v50, %v7169_v20  ;;  %v7807_v20 = vld [vmem:[#allocation15 + $0x590] sm:$0xf] }
 0x2f3   :  { %v7808_v3 = vor.u32 %v8953_v53, %v7807_v20  ;;  %v8921_v20 = vld [vmem:[#allocation15 + $0x4ac] sm:$0xf0] }
 0x2f4   :  { %4721 = vmatpush.bf16.msra.mxu1 %v7424_v17  ;;  %v2874_v17 = vadd.f32 %v9898_v40, %v2861_v62  ;;  %v7335_v40 = vld [vmem:[#allocation15 + $0x1d8] sm:$0xf] }
 0x2f5   :  { %4756 = vmatpush.bf16.msrb.mxu0 %v7300_v5  ;;  %4680 = vmatpush.bf16.msrb.mxu2 %v7740_v54  ;;  %v8869_v5 = vld [vmem:[#allocation15 + $0x314] sm:$0xf]  ;;  %v4506_v8 = vpop.f32.mrf.mxu0  ;;  %v7336_v4 = vor.u32 %v8834_v46, %v7335_v40  ;;  %v8088_v54 = vor.u32 %v9024_v35, %v8087_v63  ;;  %v7559_v40 = vld [vmem:[#allocation15 + $0x398] sm:$0xf] }
 0x2f6   :  { %v7492_v39 = vor.u32 %v8869_v5, %v7489_v6  ;;  %v2887_v14 = vadd.f32 %v9892_v59, %v2874_v17  ;;  %v8826_v59 = vld [vmem:[#allocation15 + $0x1b4] sm:$0xf0]  ;;  %v7775_v6 = vld [vmem:[#allocation15 + $0x550] sm:$0xf] }
 0x2f7   :  { %v7304_v16 = vor.u32 %v8826_v59, %v7303_v57  ;;  %v7591_v17 = vld [vmem:[#allocation15 + $0x3d8] sm:$0xf]  ;;  %v8945_v8 = vld [vmem:[#allocation15 + $0x56c] sm:$0xf0]  ;;  %v7991_v57 = vld [vmem:[#allocation15 + $0x708] sm:$0xf] }
 0x2f8   :  { %4722 = vmatpush.bf16.msra.mxu1 %v7392_v15  ;;  %v8908_v15 = vld [vmem:[#allocation15 + $0x44c] sm:$0xf]  ;;  %v2900_v23 = vadd.f32 %v9896_v38, %v2887_v14  ;;  %v7612_v38 = vor.u32 %v8900_v27, %v7609_v11  ;;  %v7207_v14 = vld [vmem:[#allocation15 + $0xd8] sm:$0xf]  ;;  %v9000_v59 = vld [vmem:[#allocation15 + $0x724] sm:$0xf0] }
 0x2f9   :  { %4757 = vmatpush.bf16.msrb.mxu0 %v7268_v21  ;;  %4681 = vmatpush.bf16.msrb.mxu2 %v7708_v44  ;;  %v7641_v21 = vld [vmem:[#allocation15 + $0x468] sm:$0xf0]  ;;  %v8898_v44 = vld [vmem:[#allocation15 + $0x3f4] sm:$0xf0] }
 0x2fa   :  { %v7644_v24 = vor.u32 %v8908_v15, %v7641_v21  ;;  %v2913_v48 = vadd.f32 %v9902_v13, %v2900_v23  ;;  %v8818_v13 = vld [vmem:[#allocation15 + $0x174] sm:$0xf0]  ;;  %v7592_v47 = vor.u32 %v8898_v44, %v7591_v17  ;;  %v7208_v23 = vor.u32 %v8802_v37, %v7207_v14  ;;  %v8830_v44 = vld [vmem:[#allocation15 + $0x1dc] sm:$0xf] }
 0x2fb   :  { %v8890_v46 = vld [vmem:[#allocation15 + $0x3b4] sm:$0xf0]  ;;  %v8822_v37 = vld [vmem:[#allocation15 + $0x19c] sm:$0xf] }
 0x2fc   :  { %4723 = vmatpush.bf16.msra.mxu1 %v7360_v29  ;;  %v7839_v29 = vld [vmem:[#allocation15 + $0x5d0] sm:$0xf]  ;;  %v7560_v25 = vor.u32 %v8890_v46, %v7559_v40  ;;  %v7175_v27 = vld [vmem:[#allocation15 + $0x98] sm:$0xf]  ;;  %v7305_v46 = vld [vmem:[#allocation15 + $0x1b8] sm:$0xf0] }
 0x2fd   :  { %4758 = vmatpush.bf16.msrb.mxu0 %v7236_v45  ;;  %4682 = vmatpush.bf16.msrb.mxu2 %v7676_v18  ;;  %v8961_v45 = vld [vmem:[#allocation15 + $0x5ec] sm:$0xf0]  ;;  %v7776_v18 = vor.u32 %v8945_v8, %v7775_v6  ;;  %v7143_v35 = vld [vmem:[#allocation15 + $0x58] sm:$0xf] }
 0x2fe   :  { %v7840_v56 = vor.u32 %v8961_v45, %v7839_v29  ;;  %v8882_v29 = vld [vmem:[#allocation15 + $0x374] sm:$0xf0]  ;;  %v7711_v45 = vld [vmem:[#allocation15 + $0x4d0] sm:$0xf]  ;;  %v7144_v61 = vor.u32 %v8786_v30, %v7143_v35  ;;  %v9012_v30 = vld [vmem:[#allocation15 + $0x78c] sm:$0xf] }
 0x2ff   :  { %4724 = vmatmul.bf16.vlgmr.msra.gmra.mxu1 %v9852_v58  ;;  %v8866_v17 = vld [vmem:[#allocation15 + $0x2f4] sm:$0xf0]  ;;  %v7647_v6 = vld [vmem:[#allocation15 + $0x450] sm:$0xf] }
 0x300   :  { %4768 = vmatpush.bf16.msrb.mxu1 %v7588_v52  ;;  %v8913_v8 = vld [vmem:[#allocation15 + $0x46c] sm:$0xf0]  ;;  %v7431_v14 = vld [vmem:[#allocation15 + $0x298] sm:$0xf] }
 0x301   :  { %4759 = vmatpush.bf16.msrb.mxu0 %v7204_v19  ;;  %v2925_v52 = vpop.f32.mrf.mxu3  ;;  %4683 = vmatpush.bf16.msrb.mxu2 %v7644_v24  ;;  %v7271_v19 = vld [vmem:[#allocation15 + $0x158] sm:$0xf] }
 0x302   :  { %v2926_v34 = vadd.f32 %v2925_v52, %v2913_v48  ;;  %v7272_v49 = vor.u32 %v8818_v13, %v7271_v19  ;;  %v7527_v48 = vld [vmem:[#allocation15 + $0x358] sm:$0xf]  ;;  %v8929_v52 = vld [vmem:[#allocation15 + $0x4ec] sm:$0xf0] }
 0x303   :  { %v7528_v63 = vor.u32 %v8882_v29, %v7527_v48  ;;  %v7712_v41 = vor.u32 %v8929_v52, %v7711_v45  ;;  %v8874_v19 = vld [vmem:[#allocation15 + $0x334] sm:$0xf0]  ;;  %v8089_v48 = vld [vmem:[#allocation15 + $0x7e8] sm:$0xf0] }
 0x304   :  { %4769 = vmatpush.bf16.msrb.mxu1 %v7556_v42  ;;  %v9916_v42 = vld [vmem:[#allocation16] sm:$0xff]  ;;  %v2932_v50 = vmax.f32 %v2926_v34, 0.0  ;;  %v7959_v34 = vld [vmem:[#allocation15 + $0x6c8] sm:$0xf]  ;;  %v7399_v29 = vld [vmem:[#allocation15 + $0x258] sm:$0xf] }
 0x305   :  { %4760 = vmatpush.bf16.msrb.mxu0 %v7172_v43  ;;  %4684 = vmatpush.bf16.msrb.mxu2 %v7612_v38  ;;  %v7361_v43 = vld [vmem:[#allocation15 + $0x230] sm:$0xf0]  ;;  %v3199_v5 = vperm.slane %v9916_v42, 0  ;;  %v8992_v38 = vld [vmem:[#allocation15 + $0x6e4] sm:$0xf0]  ;;  %v3200_v53 = vperm.slane %v9916_v42, 1 }
 0x306   :  { %2936 = vst [vmem:[%s10103_s13 + $0x18] sm:$0xff] %v2932_v50  ;;  %v9921_v62 = vpack.c.bf16 %v2932_v50, %v2932_v50  ;;  %v4517_v36 = vpop.f32.mrf.mxu1  ;;  %v7679_v50 = vld [vmem:[#allocation15 + $0x490] sm:$0xf]  ;;  %v8850_v45 = vld [vmem:[#allocation15 + $0x274] sm:$0xf0] }
 0x307   :  { %v4505_v15 = vadd.f32 %v9905_v33, %v3199_v5  ;;  %v8794_v33 = vld [vmem:[#allocation15 + $0xb4] sm:$0xf0]  ;;  %v7337_v5 = vld [vmem:[#allocation15 + $0x1f8] sm:$0xf0] }
 0x308   :  { %4770 = vmatpush.bf16.msrb.mxu1 %v7524_v2  ;;  %v7239_v2 = vld [vmem:[#allocation15 + $0x118] sm:$0xf]  ;;  %4542 = vmatmul.bf16.vlgmr.msra.gmra.mxu3 %v9921_v62 }
 0x309   :  { %4761 = vmatpush.bf16.msrb.mxu0 %v7140_v0  ;;  %4729 = vmatpush.bf16.msra.mxu2 %v7840_v56  ;;  %v2927_v7 = vpop.f32.mrf.mxu3  ;;  %v7364_v0 = vor.u32 %v8837_v10, %v7361_v43  ;;  %v9929_v24 = vadd.f32 %v4517_v36, %v4505_v15  ;;  %v7495_v56 = vld [vmem:[#allocation15 + $0x318] sm:$0xf]  ;;  %v7615_v15 = vld [vmem:[#allocation15 + $0x410] sm:$0xf]  ;;  %v8957_v36 = vld [vmem:[#allocation15 + $0x5d4] sm:$0xf] }
 0x30a   :  { %4638 = vmatpush.bf16.msra.mxu3 %v8088_v54  ;;  %4685 = vmatmul.bf16.vlgmr.msrb.gmra.mxu2 %v9887_v26  ;;  %v7960_v54 = vor.u32 %v8992_v38, %v7959_v34  ;;  %v7496_v10 = vor.u32 %v8874_v19, %v7495_v56  ;;  %v7111_v43 = vld [vmem:[#allocation15 + $0x18] sm:$0xf]  ;;  %v8949_v34 = vld [vmem:[#allocation15 + $0x594] sm:$0xf]  ;;  %v8057_v56 = vld [vmem:[#allocation15 + $0x7a8] sm:$0xf0] }
 0x30b   :  { %v7809_v38 = vld [vmem:[#allocation15 + $0x5b0] sm:$0xf0] }
 0x30c   :  { %4771 = vmatpush.bf16.msrb.mxu1 %v7492_v39  ;;  %v7240_v39 = vor.u32 %v8810_v32, %v7239_v2  ;;  %v8778_v2 = vld [vmem:[#allocation15 + $0x34] sm:$0xf0] }
 0x30d   :  { %4762 = vmatpush.bf16.msrb.mxu0 %v7108_v22  ;;  %4730 = vmatpush.bf16.msra.mxu2 %v7808_v3  ;;  %v9927_v21 = vpop.f32.mrf.mxu0  ;;  %v7743_v22 = vld [vmem:[#allocation15 + $0x510] sm:$0xf]  ;;  %v7680_v3 = vor.u32 %v8921_v20, %v7679_v50  ;;  %v7463_v32 = vld [vmem:[#allocation15 + $0x2d8] sm:$0xf]  ;;  %v8806_v20 = vld [vmem:[#allocation15 + $0x11c] sm:$0xf] }
 0x30e   :  { %4639 = vmatpush.bf16.msra.mxu3 %v8056_v9  ;;  %v7112_v9 = vor.u32 %v8778_v2, %v7111_v43  ;;  %v4557_v40 = vadd.f32 %v9927_v21, %v3200_v53  ;;  %v8842_v50 = vld [vmem:[#allocation15 + $0x234] sm:$0xf0]  ;;  %v7812_v53 = vor.u32 %v8949_v34, %v7809_v38  ;;  %v8060_v43 = vor.u32 %v9012_v30, %v8057_v56  ;;  %v7929_v30 = vld [vmem:[#allocation15 + $0x6a8] sm:$0xf0]  ;;  %v8774_v56 = vld [vmem:[#allocation15 + $0x1c] sm:$0xf] }
 0x310   :  { %4772 = vmatpush.bf16.msrb.mxu1 %v7460_v55  ;;  %4763 = vmatmul.bf16.vlgmr.msrb.gmra.mxu0 %v9831_v51  ;;  %v8937_v55 = vld [vmem:[#allocation15 + $0x52c] sm:$0xf0] }
 0x311   :  { %4807 = vmatpush.bf16.msra.mxu0 %v7336_v4  ;;  %v8024_v4 = vor.u32 %v9008_v28, %v8023_v12  ;;  %4731 = vmatpush.bf16.msra.mxu2 %v7776_v18  ;;  %v7744_v11 = vor.u32 %v8937_v55, %v7743_v22  ;;  %v7340_v12 = vor.u32 %v8830_v44, %v7337_v5  ;;  %v8858_v18 = vld [vmem:[#allocation15 + $0x2b4] sm:$0xf0]  ;;  %v8905_v22 = vld [vmem:[#allocation15 + $0x42c] sm:$0xf0]  ;;  %v8025_v44 = vld [vmem:[#allocation15 + $0x768] sm:$0xf0] }
 0x312   :  { %v7648_v28 = vor.u32 %v8913_v8, %v7647_v6  ;;  %v7616_v21 = vor.u32 %v8905_v22, %v7615_v15  ;;  %v8798_v5 = vld [vmem:[#allocation15 + $0xdc] sm:$0xf] }
 0x313   :  { %4640 = vmatpush.bf16.msra.mxu3 %v8024_v4  ;;  %v7209_v8 = vld [vmem:[#allocation15 + $0xf8] sm:$0xf0] }
 0x314   :  { %4773 = vmatpush.bf16.msrb.mxu1 %v7428_v1  ;;  %v7992_v1 = vor.u32 %v9000_v59, %v7991_v57  ;;  %v7432_v57 = vor.u32 %v8858_v18, %v7431_v14  ;;  %v7863_v59 = vld [vmem:[#allocation15 + $0x608] sm:$0xf]  ;;  %v8996_v18 = vld [vmem:[#allocation15 + $0x70c] sm:$0xf]  ;;  %v7177_v15 = vld [vmem:[#allocation15 + $0xb8] sm:$0xf0] }
 0x315   :  { %4808 = vmatpush.bf16.msra.mxu0 %v7304_v16  ;;  %v7176_v16 = vor.u32 %v8794_v33, %v7175_v27  ;;  %4732 = vmatpush.bf16.msra.mxu2 %v7744_v11  ;;  %v4558_v13 = vpop.f32.mrf.mxu0  ;;  %v8968_v27 = vld [vmem:[#allocation15 + $0x624] sm:$0xf0]  ;;  %v9020_v11 = vld [vmem:[#allocation15 + $0x7cc] sm:$0xf]  ;;  %v7308_v33 = vor.u32 %v8822_v37, %v7305_v46  ;;  %v8878_v22 = vld [vmem:[#allocation15 + $0x35c] sm:$0xf] }
 0x316   :  { %v8092_v35 = vor.u32 %v9020_v11, %v8089_v48  ;;  %v7367_v13 = vld [vmem:[#allocation15 + $0x218] sm:$0xf]  ;;  %v7993_v37 = vld [vmem:[#allocation15 + $0x728] sm:$0xf0]  ;;  %v7145_v48 = vld [vmem:[#allocation15 + $0x78] sm:$0xf0] }
 0x317   :  { %4641 = vmatpush.bf16.msra.mxu3 %v7992_v1  ;;  %v8814_v1 = vld [vmem:[#allocation15 + $0x15c] sm:$0xf]  ;;  %v7368_v2 = vor.u32 %v8842_v50, %v7367_v13  ;;  %v7961_v11 = vld [vmem:[#allocation15 + $0x6e8] sm:$0xf0] }
 0x318   :  { %4774 = vmatpush.bf16.msrb.mxu1 %v7396_v60  ;;  %v4519_v60 = vpop.f32.mrf.mxu1  ;;  %4594 = vmatmul.bf16.vlgmr.msrb.gmra.mxu3 %v9921_v62  ;;  %v7113_v13 = vld [vmem:[#allocation15 + $0x38] sm:$0xf0] }
 0x319   :  { %4809 = vmatpush.bf16.msra.mxu0 %v7272_v49  ;;  %v8984_v49 = vld [vmem:[#allocation15 + $0x6a4] sm:$0xf0]  ;;  %4733 = vmatpush.bf16.msra.mxu2 %v7712_v41  ;;  %v7400_v41 = vor.u32 %v8850_v45, %v7399_v29  ;;  %v8894_v60 = vld [vmem:[#allocation15 + $0x3dc] sm:$0xf] }
 0x31a   :  { %v7928_v7 = vor.u32 %v8984_v49, %v7927_v31  ;;  %v7593_v31 = vld [vmem:[#allocation15 + $0x3f8] sm:$0xf0]  ;;  %v7777_v49 = vld [vmem:[#allocation15 + $0x570] sm:$0xf0] }
 0x31b   :  { %4642 = vmatpush.bf16.msra.mxu3 %v7960_v54  ;;  %v7241_v54 = vld [vmem:[#allocation15 + $0x138] sm:$0xf0] }
 0x31c   :  { %4775 = vmatpush.bf16.msrb.mxu1 %v7364_v0  ;;  %v7464_v0 = vor.u32 %v8866_v17, %v7463_v32  ;;  %v7596_v32 = vor.u32 %v8894_v60, %v7593_v31  ;;  %v9004_v17 = vld [vmem:[#allocation15 + $0x74c] sm:$0xf]  ;;  %v8870_v29 = vld [vmem:[#allocation15 + $0x31c] sm:$0xf]  ;;  %v7649_v60 = vld [vmem:[#allocation15 + $0x470] sm:$0xf0] }
 0x31d   :  { %4810 = vmatpush.bf16.msra.mxu0 %v7240_v39  ;;  %v7895_v39 = vld [vmem:[#allocation15 + $0x648] sm:$0xf]  ;;  %4734 = vmatpush.bf16.msra.mxu2 %v7680_v3  ;;  %v7244_v3 = vor.u32 %v8806_v20, %v7241_v54  ;;  %v7497_v45 = vld [vmem:[#allocation15 + $0x338] sm:$0xf0]  ;;  %v8909_v54 = vld [vmem:[#allocation15 + $0x454] sm:$0xf] }
 0x31e   :  { %v8862_v50 = vld [vmem:[#allocation15 + $0x2dc] sm:$0xf] }
 0x31f   :  { %4776 = vmatmul.bf16.vlgmr.msrb.gmra.mxu1 %v9852_v58  ;;  %4643 = vmatpush.bf16.msra.mxu3 %v7928_v7  ;;  %v8886_v7 = vld [vmem:[#allocation15 + $0x39c] sm:$0xf] }
 0x320   :  { %4820 = vmatpush.bf16.msra.mxu1 %v7592_v47  ;;  %v8976_v47 = vld [vmem:[#allocation15 + $0x664] sm:$0xf0]  ;;  %v4569_v4 = vpop.f32.mrf.mxu1  ;;  %v7465_v20 = vld [vmem:[#allocation15 + $0x2f8] sm:$0xf0] }
 0x321   :  { %4811 = vmatpush.bf16.msra.mxu0 %v7208_v23  ;;  %v7896_v55 = vor.u32 %v8976_v47, %v7895_v39  ;;  %v7841_v23 = vld [vmem:[#allocation15 + $0x5f0] sm:$0xf0]  ;;  %4735 = vmatpush.bf16.msra.mxu2 %v7648_v28  ;;  %v7212_v28 = vor.u32 %v8798_v5, %v7209_v8 }
 0x322   :  { %v7844_v52 = vor.u32 %v8957_v36, %v7841_v23  ;;  %v8933_v39 = vld [vmem:[#allocation15 + $0x514] sm:$0xf]  ;;  %v7996_v23 = vor.u32 %v8996_v18, %v7993_v37  ;;  %v8846_v18 = vld [vmem:[#allocation15 + $0x25c] sm:$0xf] }
 0x323   :  { %4644 = vmatpush.bf16.msra.mxu3 %v7896_v55  ;;  %v7745_v47 = vld [vmem:[#allocation15 + $0x530] sm:$0xf0]  ;;  %v7529_v55 = vld [vmem:[#allocation15 + $0x378] sm:$0xf0] }
 0x324   :  { %4821 = vmatpush.bf16.msra.mxu1 %v7560_v25  ;;  %v9935_v25 = vadd.f32 %v4569_v4, %v4557_v40  ;;  %v8790_v40 = vld [vmem:[#allocation15 + $0x9c] sm:$0xf]  ;;  %v7748_v46 = vor.u32 %v8933_v39, %v7745_v47  ;;  %v8925_v4 = vld [vmem:[#allocation15 + $0x4d4] sm:$0xf]  ;;  %v8964_v39 = vld [vmem:[#allocation15 + $0x60c] sm:$0xf] }
 0x325   :  { %4812 = vmatpush.bf16.msra.mxu0 %v7176_v16  ;;  %v7273_v16 = vld [vmem:[#allocation15 + $0x178] sm:$0xf0]  ;;  %4736 = vmatpush.bf16.msra.mxu2 %v7616_v21  ;;  %v7713_v36 = vld [vmem:[#allocation15 + $0x4f0] sm:$0xf0]  ;;  %v7865_v47 = vld [vmem:[#allocation15 + $0x628] sm:$0xf0] }
 0x326   :  { %v7276_v19 = vor.u32 %v8814_v1, %v7273_v16  ;;  %v7716_v21 = vor.u32 %v8925_v4, %v7713_v36  ;;  %v8917_v16 = vld [vmem:[#allocation15 + $0x494] sm:$0xf]  ;;  %v7401_v37 = vld [vmem:[#allocation15 + $0x278] sm:$0xf0] }
 0x327   :  { %v8901_v5 = vld [vmem:[#allocation15 + $0x414] sm:$0xf]  ;;  %v7404_v36 = vor.u32 %v8846_v18, %v7401_v37  ;;  %v7871_v18 = vld [vmem:[#allocation15 + $0x610] sm:$0xf] }
 0x328   :  { %4822 = vmatpush.bf16.msra.mxu1 %v7528_v63  ;;  %v7864_v63 = vor.u32 %v8968_v27, %v7863_v59  ;;  %4737 = vmatmul.bf16.vlgmr.msra.gmra.mxu2 %v9887_v26  ;;  %v7532_v59 = vor.u32 %v8878_v22, %v7529_v55  ;;  %v8988_v27 = vld [vmem:[#allocation15 + $0x6cc] sm:$0xf]  ;;  %v7815_v22 = vld [vmem:[#allocation15 + $0x598] sm:$0xf]  ;;  %v8969_v37 = vld [vmem:[#allocation15 + $0x62c] sm:$0xf0] }
 0x329   :  { %4813 = vmatpush.bf16.msra.mxu0 %v7144_v61  ;;  %4781 = vmatpush.bf16.msrb.mxu2 %v7844_v52  ;;  %v4571_v61 = vpop.f32.mrf.mxu1  ;;  %v3201_v52 = vperm.slane %v9916_v42, 2  ;;  %v7964_v34 = vor.u32 %v8988_v27, %v7961_v11  ;;  %v8954_v55 = vld [vmem:[#allocation15 + $0x5b4] sm:$0xf0]  ;;  %v7369_v27 = vld [vmem:[#allocation15 + $0x238] sm:$0xf0] }
 0x32a   :  { %4645 = vmatpush.bf16.msra.mxu3 %v7864_v63  ;;  %v7681_v63 = vld [vmem:[#allocation15 + $0x4b0] sm:$0xf0]  ;;  %v7816_v11 = vor.u32 %v8954_v55, %v7815_v22 }
 0x32c   :  { %4823 = vmatpush.bf16.msra.mxu1 %v7496_v10  ;;  %v8941_v10 = vld [vmem:[#allocation15 + $0x554] sm:$0xf] }
 0x32d   :  { %4814 = vmatpush.bf16.msra.mxu0 %v7112_v9  ;;  %4646 = vmatmul.bf16.vlgmr.msra.gmra.mxu3 %v9921_v62  ;;  %v7780_v6 = vor.u32 %v8941_v10, %v7777_v49  ;;  %v7561_v9 = vld [vmem:[#allocation15 + $0x3b8] sm:$0xf0]  ;;  %v7116_v49 = vor.u32 %v8774_v56, %v7113_v13  ;;  %v8930_v56 = vld [vmem:[#allocation15 + $0x4f4] sm:$0xf0]  ;;  %v7967_v13 = vld [vmem:[#allocation15 + $0x6d0] sm:$0xf] }
 0x32e   :  { %4690 = vmatpush.bf16.msrb.mxu3 %v8092_v35  ;;  %4782 = vmatpush.bf16.msrb.mxu2 %v7812_v53  ;;  %v7564_v14 = vor.u32 %v8886_v7, %v7561_v9  ;;  %v7500_v35 = vor.u32 %v8870_v29, %v7497_v45  ;;  %v7847_v7 = vld [vmem:[#allocation15 + $0x5d8] sm:$0xf]  ;;  %v8031_v29 = vld [vmem:[#allocation15 + $0x750] sm:$0xf] }
 0x32f   :  { %v8962_v9 = vld [vmem:[#allocation15 + $0x5f4] sm:$0xf0]  ;;  %v9009_v45 = vld [vmem:[#allocation15 + $0x76c] sm:$0xf0] }
 0x330   :  { %4824 = vmatpush.bf16.msra.mxu1 %v7464_v0  ;;  %4815 = vmatmul.bf16.vlgmr.msra.gmra.mxu0 %v9831_v51  ;;  %v4608_v0 = vpop.f32.mrf.mxu0 }
 0x331   :  { %4859 = vmatpush.bf16.msrb.mxu0 %v7340_v12  ;;  %v8028_v12 = vor.u32 %v9004_v17, %v8025_v44  ;;  %v4609_v53 = vadd.f32 %v4608_v0, %v3201_v52  ;;  %v8854_v17 = vld [vmem:[#allocation15 + $0x29c] sm:$0xf] }
 0x332   :  { %4691 = vmatpush.bf16.msrb.mxu3 %v8060_v43  ;;  %4783 = vmatpush.bf16.msrb.mxu2 %v7780_v6  ;;  %v7468_v43 = vor.u32 %v8862_v50, %v7465_v20  ;;  %v7433_v44 = vld [vmem:[#allocation15 + $0x2b8] sm:$0xf0]  ;;  %v7617_v6 = vld [vmem:[#allocation15 + $0x430] sm:$0xf0]  ;;  %v8993_v50 = vld [vmem:[#allocation15 + $0x6ec] sm:$0xf0] }
 0x333   :  { %v7436_v0 = vor.u32 %v8854_v17, %v7433_v44  ;;  %v7655_v17 = vld [vmem:[#allocation15 + $0x458] sm:$0xf] }
 0x334   :  { %4825 = vmatpush.bf16.msra.mxu1 %v7432_v57  ;;  %v7180_v57 = vor.u32 %v8790_v40, %v7177_v15  ;;  %v7848_v40 = vor.u32 %v8962_v9, %v7847_v7  ;;  %v7868_v15 = vor.u32 %v8964_v39, %v7865_v47  ;;  %v8914_v44 = vld [vmem:[#allocation15 + $0x474] sm:$0xf0]  ;;  %v7903_v7 = vld [vmem:[#allocation15 + $0x650] sm:$0xf] }
 0x335   :  { %4860 = vmatpush.bf16.msrb.mxu0 %v7308_v33  ;;  %v8782_v33 = vld [vmem:[#allocation15 + $0x5c] sm:$0xf]  ;;  %v8977_v9 = vld [vmem:[#allocation15 + $0x66c] sm:$0xf0]  ;;  %v7623_v39 = vld [vmem:[#allocation15 + $0x418] sm:$0xf] }
 0x336   :  { %4692 = vmatpush.bf16.msrb.mxu3 %v8028_v12  ;;  %4784 = vmatpush.bf16.msrb.mxu2 %v7748_v46  ;;  %v7148_v38 = vor.u32 %v8782_v33, %v7145_v48  ;;  %v8095_v12 = vld [vmem:[#allocation15 + $0x7d0] sm:$0xf]  ;;  %v7783_v33 = vld [vmem:[#allocation15 + $0x558] sm:$0xf] }
 0x337   :  { %v8906_v47 = vld [vmem:[#allocation15 + $0x434] sm:$0xf0] }
 0x338   :  { %4826 = vmatpush.bf16.msra.mxu1 %v7400_v41  ;;  %v4610_v1 = vpop.f32.mrf.mxu0  ;;  %v8980_v41 = vld [vmem:[#allocation15 + $0x68c] sm:$0xf] }
 0x339   :  { %4861 = vmatpush.bf16.msrb.mxu0 %v7276_v19  ;;  %v7684_v19 = vor.u32 %v8917_v16, %v7681_v63  ;;  %v7932_v61 = vor.u32 %v8980_v41, %v7929_v30  ;;  %v7751_v16 = vld [vmem:[#allocation15 + $0x518] sm:$0xf] }
 0x33a   :  { %4693 = vmatpush.bf16.msrb.mxu3 %v7996_v23  ;;  %4785 = vmatpush.bf16.msrb.mxu2 %v7716_v21  ;;  %v8063_v23 = vld [vmem:[#allocation15 + $0x790] sm:$0xf]  ;;  %v8946_v21 = vld [vmem:[#allocation15 + $0x574] sm:$0xf0] }
 0x33b   :  { %v7784_v52 = vor.u32 %v8946_v21, %v7783_v33  ;;  %v8938_v63 = vld [vmem:[#allocation15 + $0x534] sm:$0xf0]  ;;  %v8942_v21 = vld [vmem:[#allocation15 + $0x55c] sm:$0xf] }
 0x33c   :  { %4827 = vmatpush.bf16.msra.mxu1 %v7368_v2  ;;  %v4621_v31 = vpop.f32.mrf.mxu1  ;;  %v8972_v2 = vld [vmem:[#allocation15 + $0x64c] sm:$0xf]  ;;  %v7752_v41 = vor.u32 %v8938_v63, %v7751_v16  ;;  %v7719_v30 = vld [vmem:[#allocation15 + $0x4d8] sm:$0xf]  ;;  %v8934_v16 = vld [vmem:[#allocation15 + $0x51c] sm:$0xf] }
 0x33d   :  { %4862 = vmatpush.bf16.msrb.mxu0 %v7244_v3  ;;  %v9942_v10 = vadd.f32 %v4621_v31, %v4609_v53  ;;  %v7897_v3 = vld [vmem:[#allocation15 + $0x668] sm:$0xf0]  ;;  %v7720_v20 = vor.u32 %v8930_v56, %v7719_v30  ;;  %v3202_v53 = vperm.slane %v9916_v42, 3  ;;  %v8922_v31 = vld [vmem:[#allocation15 + $0x4b4] sm:$0xf0] }
 0x33e   :  { %4694 = vmatpush.bf16.msrb.mxu3 %v7964_v34  ;;  %4786 = vmatpush.bf16.msrb.mxu2 %v7684_v19  ;;  %v7900_v8 = vor.u32 %v8972_v2, %v7897_v3  ;;  %v8032_v34 = vor.u32 %v9009_v45, %v8031_v29  ;;  %v8985_v2 = vld [vmem:[#allocation15 + $0x6ac] sm:$0xf0]  ;;  %v9005_v29 = vld [vmem:[#allocation15 + $0x754] sm:$0xf]  ;;  %v7753_v63 = vld [vmem:[#allocation15 + $0x538] sm:$0xf0] }
 0x33f   :  { %4828 = vmatmul.bf16.vlgmr.msra.gmra.mxu1 %v9852_v58  ;;  %v8033_v45 = vld [vmem:[#allocation15 + $0x770] sm:$0xf0]  ;;  %v8926_v56 = vld [vmem:[#allocation15 + $0x4dc] sm:$0xf] }
 0x340   :  { %4872 = vmatpush.bf16.msrb.mxu1 %v7596_v32  ;;  %v7652_v32 = vor.u32 %v8909_v54, %v7649_v60  ;;  %v7687_v60 = vld [vmem:[#allocation15 + $0x498] sm:$0xf] }
 0x341   :  { %4863 = vmatpush.bf16.msrb.mxu0 %v7212_v28  ;;  %v7620_v28 = vor.u32 %v8901_v5, %v7617_v6  ;;  %v7688_v3 = vor.u32 %v8922_v31, %v7687_v60  ;;  %v8918_v31 = vld [vmem:[#allocation15 + $0x49c] sm:$0xf] }
 0x342   :  { %4695 = vmatpush.bf16.msrb.mxu3 %v7932_v61  ;;  %4787 = vmatpush.bf16.msrb.mxu2 %v7652_v32 }
 0x344   :  { %4873 = vmatpush.bf16.msrb.mxu1 %v7564_v14  ;;  %v9025_v14 = vld [vmem:[#allocation15 + $0x7ec] sm:$0xf0]  ;;  %v4623_v46 = vpop.f32.mrf.mxu1 }
 0x345   :  { %4864 = vmatpush.bf16.msrb.mxu0 %v7180_v57  ;;  %v8096_v4 = vor.u32 %v9025_v14, %v8095_v12  ;;  %v9017_v57 = vld [vmem:[#allocation15 + $0x7ac] sm:$0xf0]  ;;  %v7904_v12 = vor.u32 %v8977_v9, %v7903_v7  ;;  %v7849_v14 = vld [vmem:[#allocation15 + $0x5f8] sm:$0xf0]  ;;  %v9021_v46 = vld [vmem:[#allocation15 + $0x7d4] sm:$0xf] }
 0x346   :  { %4696 = vmatpush.bf16.msrb.mxu3 %v7900_v8  ;;  %4788 = vmatpush.bf16.msrb.mxu2 %v7620_v28  ;;  %v8958_v28 = vld [vmem:[#allocation15 + $0x5dc] sm:$0xf] }
 0x347   :  { %v7852_v22 = vor.u32 %v8958_v28, %v7849_v14  ;;  %v7625_v28 = vld [vmem:[#allocation15 + $0x438] sm:$0xf0] }
 0x348   :  { %4874 = vmatpush.bf16.msrb.mxu1 %v7532_v59  ;;  %v8838_v59 = vld [vmem:[#allocation15 + $0x21c] sm:$0xf] }
 0x349   :  { %4865 = vmatpush.bf16.msrb.mxu0 %v7148_v38  ;;  %v7372_v48 = vor.u32 %v8838_v59, %v7369_v27  ;;  %4789 = vmatmul.bf16.vlgmr.msrb.gmra.mxu2 %v9887_v26  ;;  %v7999_v38 = vld [vmem:[#allocation15 + $0x710] sm:$0xf]  ;;  %v9013_v59 = vld [vmem:[#allocation15 + $0x794] sm:$0xf] }
 0x34a   :  { %4833 = vmatpush.bf16.msra.mxu2 %v7848_v40  ;;  %4697 = vmatpush.bf16.msrb.mxu3 %v7868_v15  ;;  %v7624_v40 = vor.u32 %v8906_v47, %v7623_v39  ;;  %v8097_v15 = vld [vmem:[#allocation15 + $0x7f0] sm:$0xf0] }
 0x34b   :  { %v4530_v61 = vpop.f32.mrf.mxu2  ;;  %v8065_v27 = vld [vmem:[#allocation15 + $0x7b0] sm:$0xf0] }
 0x34c   :  { %4875 = vmatpush.bf16.msrb.mxu1 %v7500_v35  ;;  %v9001_v35 = vld [vmem:[#allocation15 + $0x72c] sm:$0xf0]  ;;  %v8973_v39 = vld [vmem:[#allocation15 + $0x654] sm:$0xf] }
 0x34d   :  { %4866 = vmatpush.bf16.msrb.mxu0 %v7116_v49  ;;  %4698 = vmatmul.bf16.vlgmr.msrb.gmra.mxu3 %v9921_v62  ;;  %v4660_v1 = vpop.f32.mrf.mxu0  ;;  %v8000_v19 = vor.u32 %v9001_v35, %v7999_v38  ;;  %v7968_v49 = vor.u32 %v8993_v50, %v7967_v13  ;;  %v8997_v38 = vld [vmem:[#allocation15 + $0x714] sm:$0xf] }
 0x34e   :  { %4742 = vmatpush.bf16.msra.mxu3 %v8096_v4  ;;  %4834 = vmatpush.bf16.msra.mxu2 %v7816_v11  ;;  %v4661_v32 = vadd.f32 %v4660_v1, %v3202_v53  ;;  %v7872_v4 = vor.u32 %v8969_v37, %v7871_v18  ;;  %v8001_v35 = vld [vmem:[#allocation15 + $0x730] sm:$0xf0] }
 0x34f   :  { %v8004_v13 = vor.u32 %v8997_v38, %v8001_v35  ;;  %v8989_v50 = vld [vmem:[#allocation15 + $0x6d4] sm:$0xf] }
 0x350   :  { %4876 = vmatpush.bf16.msrb.mxu1 %v7468_v43  ;;  %4867 = vmatmul.bf16.vlgmr.msrb.gmra.mxu0 %v9831_v51  ;;  %v8064_v51 = vor.u32 %v9017_v57, %v8063_v23  ;;  %v9950_v43 = vadd.f32 %v4530_v61, %v9929_v24  ;;  %v7817_v23 = vld [vmem:[#allocation15 + $0x5b8] sm:$0xf0]  ;;  %v8100_v57 = vor.u32 %v9021_v46, %v8097_v15  ;;  %v7905_v47 = vld [vmem:[#allocation15 + $0x670] sm:$0xf0]  ;;  %v8103_v46 = vld [vmem:[#allocation15 + $0x7d8] sm:$0xf] }
 0x351   :  { %v7689_v61 = vld [vmem:[#allocation15 + $0x4b8] sm:$0xf0]  ;;  %v7908_v14 = vor.u32 %v8973_v39, %v7905_v47  ;;  %v8965_v18 = vld [vmem:[#allocation15 + $0x614] sm:$0xf]  ;;  %v9026_v15 = vld [vmem:[#allocation15 + $0x7f4] sm:$0xf0] }
 0x352   :  { %4743 = vmatpush.bf16.msra.mxu3 %v8064_v51  ;;  %4835 = vmatpush.bf16.msra.mxu2 %v7784_v52  ;;  %v7785_v51 = vld [vmem:[#allocation15 + $0x578] sm:$0xf0]  ;;  %v7873_v37 = vld [vmem:[#allocation15 + $0x630] sm:$0xf0]  ;;  %v9059_v39 = vld [vmem:[#allocation18 + $0xe4] sm:$0xf] }
 0x353   :  { %v4532_v24 = vpop.f32.mrf.mxu2  ;;  %v7788_v52 = vor.u32 %v8942_v21, %v7785_v51  ;;  %v8007_v51 = vld [vmem:[#allocation15 + $0x718] sm:$0xf] }
 0x354   :  { %4877 = vmatpush.bf16.msrb.mxu1 %v7436_v0  ;;  %v7656_v0 = vor.u32 %v8914_v44, %v7655_v17  ;;  %v8910_v17 = vld [vmem:[#allocation15 + $0x45c] sm:$0xf] }
 0x355   :  { %v4662_v54 = vpop.f32.mrf.mxu0  ;;  %v7657_v44 = vld [vmem:[#allocation15 + $0x478] sm:$0xf0] }
 0x356   :  { %4744 = vmatpush.bf16.msra.mxu3 %v8032_v34  ;;  %4836 = vmatpush.bf16.msra.mxu2 %v7752_v41  ;;  %v8036_v34 = vor.u32 %v9005_v29, %v8033_v45  ;;  %v7756_v41 = vor.u32 %v8934_v16, %v7753_v63  ;;  %v3203_v54 = vperm.slane %v9916_v42, 4  ;;  %v7660_v24 = vor.u32 %v8910_v17, %v7657_v44  ;;  %v7975_v45 = vld [vmem:[#allocation15 + $0x6d8] sm:$0xf]  ;;  %v8239_v17 = vld [vmem:[#allocation18 + $0xe0] sm:$0xf] }
 0x357   :  { %v9061_v44 = vld [vmem:[#allocation18 + $0xec] sm:$0xf0] }
 0x358   :  { %4878 = vmatpush.bf16.msrb.mxu1 %v7404_v36  ;;  %v8950_v36 = vld [vmem:[#allocation15 + $0x59c] sm:$0xf] }
 0x359   :  { %v7820_v11 = vor.u32 %v8950_v36, %v7817_v23  ;;  %v8071_v36 = vld [vmem:[#allocation15 + $0x798] sm:$0xf] }
 0x35a   :  { %4745 = vmatpush.bf16.msra.mxu3 %v8000_v19  ;;  %4837 = vmatpush.bf16.msra.mxu2 %v7720_v20  ;;  %v7721_v19 = vld [vmem:[#allocation15 + $0x4f8] sm:$0xf0]  ;;  %v7969_v20 = vld [vmem:[#allocation15 + $0x6f0] sm:$0xf0]  ;;  %v9018_v23 = vld [vmem:[#allocation15 + $0x7b4] sm:$0xf0] }
 0x35b   :  { %v9954_v33 = vpop.f32.mrf.mxu2  ;;  %v7724_v53 = vor.u32 %v8926_v56, %v7721_v19 }
 0x35c   :  { %4879 = vmatpush.bf16.msrb.mxu1 %v7372_v48  ;;  %v4673_v5 = vpop.f32.mrf.mxu1  ;;  %v8068_v48 = vor.u32 %v9013_v59, %v8065_v27  ;;  %v8039_v59 = vld [vmem:[#allocation15 + $0x758] sm:$0xf]  ;;  %v4583_v47 = vadd.f32 %v9954_v33, %v9935_v25  ;;  %v9055_v33 = vld [vmem:[#allocation18 + $0xc4] sm:$0xf] }
 0x35d   :  { %v9952_v8 = vadd.f32 %v4673_v5, %v4661_v32  ;;  %v9010_v27 = vld [vmem:[#allocation15 + $0x774] sm:$0xf0] }
 0x35e   :  { %4746 = vmatpush.bf16.msra.mxu3 %v7968_v49  ;;  %4838 = vmatpush.bf16.msra.mxu2 %v7688_v3  ;;  %v7972_v49 = vor.u32 %v8989_v50, %v7969_v20  ;;  %v7692_v3 = vor.u32 %v8918_v31, %v7689_v61  ;;  %v8040_v21 = vor.u32 %v9010_v27, %v8039_v59  ;;  %v8978_v50 = vld [vmem:[#allocation15 + $0x674] sm:$0xf0]  ;;  %v8105_v31 = vld [vmem:[#allocation15 + $0x7f8] sm:$0xf0] }
 0x35f   :  { %4880 = vmatmul.bf16.vlgmr.msrb.gmra.mxu1 %v9852_v58  ;;  %v7935_v58 = vld [vmem:[#allocation15 + $0x690] sm:$0xf] }
 0x360   :  { %v7936_v6 = vor.u32 %v8985_v2, %v7935_v58  ;;  %v8981_v58 = vld [vmem:[#allocation15 + $0x694] sm:$0xf] }
 0x361   :  { %v7937_v2 = vld [vmem:[#allocation15 + $0x6b0] sm:$0xf0] }
 0x362   :  { %4747 = vmatpush.bf16.msra.mxu3 %v7936_v6  ;;  %4839 = vmatpush.bf16.msra.mxu2 %v7656_v0  ;;  %v7940_v7 = vor.u32 %v8981_v58, %v7937_v2 }
 0x363   :  { %v4584_v30 = vpop.f32.mrf.mxu2 }
 0x364   :  { %v4675_v55 = vpop.f32.mrf.mxu1 }
 0x366   :  { %4748 = vmatpush.bf16.msra.mxu3 %v7904_v12  ;;  %4840 = vmatpush.bf16.msra.mxu2 %v7624_v40  ;;  %v8902_v12 = vld [vmem:[#allocation15 + $0x41c] sm:$0xf] }
 0x367   :  { %v7628_v40 = vor.u32 %v8902_v12, %v7625_v28  ;;  %v9006_v28 = vld [vmem:[#allocation15 + $0x75c] sm:$0xf] }
 0x369   :  { %4841 = vmatmul.bf16.vlgmr.msra.gmra.mxu2 %v9887_v26 }
 0x36a   :  { %4885 = vmatpush.bf16.msrb.mxu2 %v7852_v22  ;;  %4749 = vmatpush.bf16.msra.mxu3 %v7872_v4  ;;  %v7876_v4 = vor.u32 %v8965_v18, %v7873_v37  ;;  %v8241_v37 = vld [vmem:[#allocation18 + $0xf0] sm:$0xf0] }
 0x36b   :  { %v4634_v6 = vpop.f32.mrf.mxu2 }
 0x36c   :  { %v9962_v0 = vadd.f32 %v4634_v6, %v9942_v10  ;;  %v8104_v10 = vor.u32 %v9026_v15, %v8103_v46  ;;  %v8240_v6 = vor.u32 %v9061_v44, %v8239_v17  ;;  %v8244_v46 = vor.u32 %v9059_v39, %v8241_v37  ;;  %v8982_v17 = vld [vmem:[#allocation15 + $0x69c] sm:$0xf] }
 0x36d   :  { %4750 = vmatmul.bf16.vlgmr.msra.gmra.mxu3 %v9921_v62  ;;  %v4712_v1 = vpop.f32.mrf.mxu0  ;;  %v7945_v44 = vld [vmem:[#allocation15 + $0x6b8] sm:$0xf0] }
 0x36e   :  { %4794 = vmatpush.bf16.msrb.mxu3 %v8100_v57  ;;  %4886 = vmatpush.bf16.msrb.mxu2 %v7820_v11  ;;  %v4713_v32 = vadd.f32 %v4712_v1, %v3203_v54  ;;  %v8072_v57 = vor.u32 %v9018_v23, %v8071_v36  ;;  %v3204_v1 = vperm.slane %v9916_v42, 5  ;;  %v8970_v42 = vld [vmem:[#allocation15 + $0x634] sm:$0xf0]  ;;  %v8225_v36 = vld [vmem:[#allocation18 + $0xd0] sm:$0xf0]  ;;  %v7948_v37 = vor.u32 %v8982_v17, %v7945_v44 }
 0x36f   :  { %5345 = vmatpush.bf16.msra.mxu0 %v8240_v6  ;;  %v9045_v6 = vld [vmem:[#allocation18 + $0x6c] sm:$0xf0] }
 0x372   :  { %4795 = vmatpush.bf16.msrb.mxu3 %v8068_v48  ;;  %4887 = vmatpush.bf16.msrb.mxu2 %v7788_v52  ;;  %v9002_v48 = vld [vmem:[#allocation15 + $0x734] sm:$0xf0] }
 0x373   :  { %v4636_v55 = vpop.f32.mrf.mxu2  ;;  %v8008_v29 = vor.u32 %v9002_v48, %v8007_v51  ;;  %v8994_v52 = vld [vmem:[#allocation15 + $0x6f4] sm:$0xf0]  ;;  %v8009_v51 = vld [vmem:[#allocation15 + $0x738] sm:$0xf0] }
 0x374   :  { %v7976_v63 = vor.u32 %v8994_v52, %v7975_v45  ;;  %v9057_v55 = vld [vmem:[#allocation18 + $0xcc] sm:$0xf0]  ;;  %v8335_v52 = vld [vmem:[#allocation18 + $0x1a0] sm:$0xf] }
 0x375   :  { %v4714_v60 = vpop.f32.mrf.mxu0  ;;  %v9053_v45 = vld [vmem:[#allocation18 + $0xac] sm:$0xf0] }
 0x376   :  { %4796 = vmatpush.bf16.msrb.mxu3 %v8036_v34  ;;  %4888 = vmatpush.bf16.msrb.mxu2 %v7756_v41  ;;  %v8986_v34 = vld [vmem:[#allocation15 + $0x6b4] sm:$0xf0]  ;;  %v9022_v60 = vld [vmem:[#allocation15 + $0x7dc] sm:$0xf] }
 0x377   :  { %v8108_v2 = vor.u32 %v9022_v60, %v8105_v31  ;;  %v9047_v60 = vld [vmem:[#allocation18 + $0x84] sm:$0xf]  ;;  %v8193_v31 = vld [vmem:[#allocation18 + $0x90] sm:$0xf0] }
 0x37a   :  { %4797 = vmatpush.bf16.msrb.mxu3 %v8004_v13  ;;  %4889 = vmatpush.bf16.msrb.mxu2 %v7724_v53  ;;  %v7911_v13 = vld [vmem:[#allocation15 + $0x658] sm:$0xf] }
 0x37b   :  { %v7912_v20 = vor.u32 %v8978_v50, %v7911_v13  ;;  %v7879_v53 = vld [vmem:[#allocation15 + $0x618] sm:$0xf]  ;;  %v8191_v50 = vld [vmem:[#allocation18 + $0x80] sm:$0xf] }
 0x37c   :  { %v4725_v5 = vpop.f32.mrf.mxu1  ;;  %v7880_v58 = vor.u32 %v8970_v42, %v7879_v53  ;;  %v8319_v53 = vld [vmem:[#allocation18 + $0x180] sm:$0xf] }
 0x37d   :  { %v9959_v9 = vadd.f32 %v4725_v5, %v4713_v32  ;;  %v8073_v32 = vld [vmem:[#allocation15 + $0x7b8] sm:$0xf0]  ;;  %v8367_v5 = vld [vmem:[#allocation18 + $0x1e0] sm:$0xf] }
 0x37e   :  { %4798 = vmatpush.bf16.msrb.mxu3 %v7972_v49  ;;  %4890 = vmatpush.bf16.msrb.mxu2 %v7692_v3  ;;  %v9014_v3 = vld [vmem:[#allocation15 + $0x79c] sm:$0xf] }
 0x37f   :  { %v8076_v12 = vor.u32 %v9014_v3, %v8073_v32 }
 0x382   :  { %4799 = vmatpush.bf16.msrb.mxu3 %v7940_v7  ;;  %4891 = vmatpush.bf16.msrb.mxu2 %v7660_v24  ;;  %v9093_v7 = vld [vmem:[#allocation18 + $0x1ec] sm:$0xf0] }
 0x383   :  { %v8368_v18 = vor.u32 %v9093_v7, %v8367_v5  ;;  %v8175_v5 = vld [vmem:[#allocation18 + $0x60] sm:$0xf] }
 0x384   :  { %v4727_v22 = vpop.f32.mrf.mxu1  ;;  %v8303_v7 = vld [vmem:[#allocation18 + $0x160] sm:$0xf] }
 0x385   :  { %5364 = vmatpush.bf16.msra.mxu1 %v8368_v18  ;;  %v8223_v22 = vld [vmem:[#allocation18 + $0xc0] sm:$0xf] }
 0x386   :  { %4800 = vmatpush.bf16.msrb.mxu3 %v7908_v14  ;;  %4892 = vmatpush.bf16.msrb.mxu2 %v7628_v40  ;;  %v8041_v14 = vld [vmem:[#allocation15 + $0x778] sm:$0xf0]  ;;  %v8224_v25 = vor.u32 %v9057_v55, %v8223_v22 }
 0x388   :  { %5346 = vmatpush.bf16.msra.mxu0 %v8224_v25  ;;  %v8159_v25 = vld [vmem:[#allocation18 + $0x40] sm:$0xf] }
 0x389   :  { %4893 = vmatmul.bf16.vlgmr.msrb.gmra.mxu2 %v9887_v26  ;;  %v7943_v26 = vld [vmem:[#allocation15 + $0x698] sm:$0xf] }
 0x38a   :  { %4801 = vmatpush.bf16.msrb.mxu3 %v7876_v4  ;;  %v7944_v56 = vor.u32 %v8986_v34, %v7943_v26  ;;  %v8351_v4 = vld [vmem:[#allocation18 + $0x1c0] sm:$0xf]  ;;  %5383 = vmatpush.bf16.msra.mxu2 %v8244_v46  ;;  %v8209_v26 = vld [vmem:[#allocation18 + $0xb0] sm:$0xf0] }
 0x38b   :  { %v4543_v38 = vpop.f32.mrf.mxu3 }
 0x38c   :  { %v4544_v24 = vadd.f32 %v4543_v38, %v9950_v43  ;;  %v9089_v43 = vld [vmem:[#allocation18 + $0x1cc] sm:$0xf0]  ;;  %v8990_v38 = vld [vmem:[#allocation15 + $0x6dc] sm:$0xf] }
 0x38d   :  { %4802 = vmatmul.bf16.vlgmr.msrb.gmra.mxu3 %v9921_v62  ;;  %v4764_v11 = vpop.f32.mrf.mxu0  ;;  %v9967_v30 = vpop.f32.mrf.mxu2  ;;  %v8352_v27 = vor.u32 %v9089_v43, %v8351_v4  ;;  %v8974_v4 = vld [vmem:[#allocation15 + $0x65c] sm:$0xf]  ;;  %v9041_v43 = vld [vmem:[#allocation18 + $0x4c] sm:$0xf0] }
 0x38e   :  { %4846 = vmatpush.bf16.msra.mxu3 %v8104_v10  ;;  %v4765_v35 = vadd.f32 %v4764_v11, %v3204_v1  ;;  %v8044_v10 = vor.u32 %v9006_v28, %v8041_v14  ;;  %v4911_v23 = vmax.f32 %v4544_v24, 0.0  ;;  %v8228_v11 = vor.u32 %v9055_v33, %v8225_v36  ;;  %v9077_v24 = vld [vmem:[#allocation18 + $0x16c] sm:$0xf0]  ;;  %v8177_v28 = vld [vmem:[#allocation18 + $0x70] sm:$0xf0] }
 0x38f   :  { %5365 = vmatpush.bf16.msra.mxu1 %v8352_v27  ;;  %v8287_v33 = vld [vmem:[#allocation18 + $0x140] sm:$0xf]  ;;  %v8160_v36 = vor.u32 %v9041_v43, %v8159_v25 }
 0x390   :  { %5384 = vmatpush.bf16.msra.mxu2 %v8228_v11  ;;  %v8966_v11 = vld [vmem:[#allocation15 + $0x61c] sm:$0xf] }
 0x392   :  { %4847 = vmatpush.bf16.msra.mxu3 %v8072_v57 }
 0x393   :  { %v4545_v54 = vpop.f32.mrf.mxu3 }
 0x394   :  { %v9081_v54 = vld [vmem:[#allocation18 + $0x18c] sm:$0xf0] }
 0x395   :  { %v4766_v16 = vpop.f32.mrf.mxu0  ;;  %v4688_v49 = vpop.f32.mrf.mxu2 }
 0x396   :  { %4848 = vmatpush.bf16.msra.mxu3 %v8040_v21  ;;  %v8998_v21 = vld [vmem:[#allocation15 + $0x71c] sm:$0xf]  ;;  %v9085_v16 = vld [vmem:[#allocation18 + $0x1ac] sm:$0xf0] }
 0x397   :  { %v8012_v34 = vor.u32 %v8998_v21, %v8009_v51  ;;  %v7881_v51 = vld [vmem:[#allocation15 + $0x638] sm:$0xf0] }
 0x39a   :  { %4849 = vmatpush.bf16.msra.mxu3 %v8008_v29  ;;  %v8207_v29 = vld [vmem:[#allocation18 + $0xa0] sm:$0xf] }
 0x39b   :  { %v4595_v40 = vpop.f32.mrf.mxu3  ;;  %v8208_v1 = vor.u32 %v9053_v45, %v8207_v29  ;;  %v8369_v29 = vld [vmem:[#allocation18 + $0x1f0] sm:$0xf0]  ;;  %v8143_v45 = vld [vmem:[#allocation18 + $0x20] sm:$0xf] }
 0x39c   :  { %v4777_v41 = vpop.f32.mrf.mxu1  ;;  %v4596_v15 = vadd.f32 %v4595_v40, %v4583_v47  ;;  %v8176_v47 = vor.u32 %v9045_v6, %v8175_v5  ;;  %v8304_v40 = vor.u32 %v9077_v24, %v8303_v7  ;;  %v9083_v5 = vld [vmem:[#allocation18 + $0x1a4] sm:$0xf]  ;;  %v8337_v6 = vld [vmem:[#allocation18 + $0x1b0] sm:$0xf0] }
 0x39d   :  { %v9969_v19 = vadd.f32 %v4777_v41, %v4765_v35  ;;  %v7977_v35 = vld [vmem:[#allocation15 + $0x6f8] sm:$0xf0]  ;;  %v8336_v41 = vor.u32 %v9085_v16, %v8335_v52  ;;  %5347 = vmatpush.bf16.msra.mxu0 %v8208_v1  ;;  %v9037_v52 = vld [vmem:[#allocation18 + $0x2c] sm:$0xf0]  ;;  %v8271_v1 = vld [vmem:[#allocation18 + $0x120] sm:$0xf] }
 0x39e   :  { %4850 = vmatpush.bf16.msra.mxu3 %v7976_v63  ;;  %v4912_v57 = vmax.f32 %v4596_v15, 0.0  ;;  %v9051_v63 = vld [vmem:[#allocation18 + $0xa4] sm:$0xf]  ;;  %v7980_v32 = vor.u32 %v8990_v38, %v7977_v35  ;;  %v8144_v16 = vor.u32 %v9037_v52, %v8143_v45  ;;  %v8321_v24 = vld [vmem:[#allocation18 + $0x190] sm:$0xf0] }
 0x39f   :  { %5366 = vmatpush.bf16.msra.mxu1 %v8336_v41  ;;  %v7884_v41 = vor.u32 %v8966_v11, %v7881_v51  ;;  %v9063_v51 = vld [vmem:[#allocation18 + $0x104] sm:$0xf] }
 0x3a0   :  { %v4919_v48 = vpack.c.bf16 %v4912_v57, %v4911_v23  ;;  %v9073_v23 = vld [vmem:[#allocation18 + $0x14c] sm:$0xf0]  ;;  %v9039_v57 = vld [vmem:[#allocation18 + $0x44] sm:$0xf] }
 0x3a1   :  { %v8288_v21 = vor.u32 %v9073_v23, %v8287_v33 }
 0x3a2   :  { %4851 = vmatpush.bf16.msra.mxu3 %v7944_v56  ;;  %4920 = vst [vmem:[#allocation3] sm:$0xff] %v4919_v48  ;;  %v8212_v56 = vor.u32 %v9051_v63, %v8209_v26  ;;  %v9091_v48 = vld [vmem:[#allocation18 + $0x1e4] sm:$0xf]  ;;  %v9069_v63 = vld [vmem:[#allocation18 + $0x12c] sm:$0xf0] }
 0x3a3   :  { %v4597_v13 = vpop.f32.mrf.mxu3  ;;  %v9035_v26 = vld [vmem:[#allocation18 + $0x24] sm:$0xf] }
 0x3a4   :  { %v4779_v61 = vpop.f32.mrf.mxu1  ;;  %5385 = vmatpush.bf16.msra.mxu2 %v8212_v56  ;;  %v9087_v56 = vld [vmem:[#allocation18 + $0x1c4] sm:$0xf]  ;;  %v8272_v13 = vor.u32 %v9069_v63, %v8271_v1 }
 0x3a5   :  { %v9975_v61 = vld [vmem:[#allocation16] sm:$0xff] }
 0x3a6   :  { %4852 = vmatpush.bf16.msra.mxu3 %v7912_v20  ;;  %v9049_v20 = vld [vmem:[#allocation18 + $0x8c] sm:$0xf0]  ;;  %v3205_v49 = vperm.slane %v9975_v61, 6 }
 0x3a7   :  { %v8192_v42 = vor.u32 %v9049_v20, %v8191_v50  ;;  %v8127_v20 = vld [vmem:[#allocation18] sm:$0xf] }
 0x3a9   :  { %5348 = vmatpush.bf16.msra.mxu0 %v8192_v42  ;;  %v8372_v42 = vor.u32 %v9091_v48, %v8369_v29  ;;  %v8257_v48 = vld [vmem:[#allocation18 + $0x110] sm:$0xf0]  ;;  %v8111_v45 = vld [vmem:[#allocation3] sm:$0xf] }
 0x3aa   :  { %4853 = vmatpush.bf16.msra.mxu3 %v7880_v58  ;;  %v8320_v58 = vor.u32 %v9081_v54, %v8319_v53  ;;  %v9033_v54 = vld [vmem:[#allocation18 + $0xc] sm:$0xf0] }
 0x3ab   :  { %v4738_v18 = vpop.f32.mrf.mxu2  ;;  %v9027_v1 = vld [vmem:[#allocation3 + $0x4] sm:$0xf] }
 0x3ac   :  { %5367 = vmatpush.bf16.msra.mxu1 %v8320_v58  ;;  %v9981_v22 = vadd.f32 %v4738_v18, %v9959_v9  ;;  %v8128_v58 = vor.u32 %v9033_v54, %v8127_v20  ;;  %v3206_v18 = vperm.slane %v9975_v61, 7  ;;  %v9067_v61 = vld [vmem:[#allocation18 + $0x124] sm:$0xf] }
 0x3ad   :  { %4854 = vmatmul.bf16.vlgmr.msra.gmra.mxu3 %v9921_v62  ;;  %v4816_v59 = vpop.f32.mrf.mxu0  ;;  %5349 = vmatpush.bf16.msra.mxu0 %v8176_v47  ;;  %v9079_v47 = vld [vmem:[#allocation18 + $0x184] sm:$0xf] }
 0x3ae   :  { %4898 = vmatpush.bf16.msrb.mxu3 %v8108_v2  ;;  %v8196_v2 = vor.u32 %v9047_v60, %v8193_v31  ;;  %v4817_v39 = vadd.f32 %v4816_v59, %v3205_v49  ;;  %v8161_v59 = vld [vmem:[#allocation18 + $0x50] sm:$0xf0]  ;;  %v8255_v60 = vld [vmem:[#allocation18 + $0x100] sm:$0xf]  ;;  %v9065_v31 = vld [vmem:[#allocation18 + $0x10c] sm:$0xf0] }
 0x3af   :  { %v8164_v9 = vor.u32 %v9039_v57, %v8161_v59  ;;  %v8353_v49 = vld [vmem:[#allocation18 + $0x1d0] sm:$0xf0] }
 0x3b0   :  { %5386 = vmatpush.bf16.msra.mxu2 %v8196_v2  ;;  %v9983_v55 = vpop.f32.mrf.mxu3  ;;  %5368 = vmatpush.bf16.msra.mxu1 %v8304_v40  ;;  %v8256_v2 = vor.u32 %v9065_v31, %v8255_v60  ;;  %v8356_v44 = vor.u32 %v9087_v56, %v8353_v49  ;;  %v8273_v59 = vld [vmem:[#allocation18 + $0x130] sm:$0xf0] }
 0x3b1   :  { %5350 = vmatpush.bf16.msra.mxu0 %v8160_v36  ;;  %v4648_v25 = vadd.f32 %v9983_v55, %v9962_v0  ;;  %v8260_v55 = vor.u32 %v9063_v51, %v8257_v48  ;;  %v8345_v51 = vld [vmem:[#allocation18 + $0x1b8] sm:$0xf0]  ;;  %v8199_v48 = vld [vmem:[#allocation18 + $0x88] sm:$0xf] }
 0x3b2   :  { %4899 = vmatpush.bf16.msrb.mxu3 %v8076_v12  ;;  %v9043_v12 = vld [vmem:[#allocation18 + $0x64] sm:$0xf] }
 0x3b3   :  { %v8180_v46 = vor.u32 %v9043_v12, %v8177_v28  ;;  %v4740_v35 = vpop.f32.mrf.mxu2  ;;  %v8324_v12 = vor.u32 %v9079_v47, %v8321_v24  ;;  %v9075_v28 = vld [vmem:[#allocation18 + $0x164] sm:$0xf]  ;;  %v4913_v11 = vmax.f32 %v4648_v25, 0.0  ;;  %v8231_v24 = vld [vmem:[#allocation18 + $0xc8] sm:$0xf] }
 0x3b4   :  { %5369 = vmatpush.bf16.msra.mxu1 %v8288_v21 }
 0x3b5   :  { %v4818_v3 = vpop.f32.mrf.mxu0  ;;  %5387 = vmatpush.bf16.msra.mxu2 %v8180_v46  ;;  %5351 = vmatpush.bf16.msra.mxu0 %v8144_v16  ;;  %v9071_v46 = vld [vmem:[#allocation18 + $0x144] sm:$0xf] }
 0x3b6   :  { %4900 = vmatpush.bf16.msrb.mxu3 %v8044_v10  ;;  %v7913_v10 = vld [vmem:[#allocation15 + $0x678] sm:$0xf0]  ;;  %v9031_v3 = vld [vmem:[#allocation18 + $0x4] sm:$0xf] }
 0x3b7   :  { %v7916_v27 = vor.u32 %v8974_v4, %v7913_v10  ;;  %v8289_v4 = vld [vmem:[#allocation18 + $0x150] sm:$0xf0] }
 0x3b8   :  { %v4649_v53 = vpop.f32.mrf.mxu3  ;;  %5370 = vmatpush.bf16.msra.mxu1 %v8272_v13  ;;  %v8292_v36 = vor.u32 %v9071_v46, %v8289_v4 }
 0x3b9   :  { %5388 = vmatpush.bf16.msra.mxu2 %v8164_v9  ;;  %5352 = vmatpush.bf16.msra.mxu0 %v8128_v58  ;;  %v8276_v9 = vor.u32 %v9067_v61, %v8273_v59  ;;  %v9086_v61 = vld [vmem:[#allocation18 + $0x1b4] sm:$0xf0]  ;;  %v9052_v59 = vld [vmem:[#allocation18 + $0xac] sm:$0xf] }
 0x3ba   :  { %4901 = vmatpush.bf16.msrb.mxu3 %v8012_v34  ;;  %v8145_v34 = vld [vmem:[#allocation18 + $0x30] sm:$0xf0] }
 0x3bb   :  { %v8148_v50 = vor.u32 %v9035_v26, %v8145_v34 }
 0x3bc   :  { %v4829_v14 = vpop.f32.mrf.mxu1  ;;  %5371 = vmatpush.bf16.msra.mxu1 %v8256_v2  ;;  %v8247_v2 = vld [vmem:[#allocation18 + $0xe8] sm:$0xf] }
 0x3bd   :  { %v9978_v15 = vadd.f32 %v4829_v14, %v4817_v39  ;;  %5389 = vmatpush.bf16.msra.mxu2 %v8148_v50  ;;  %v8340_v39 = vor.u32 %v9083_v5, %v8337_v6  ;;  %v8305_v14 = vld [vmem:[#allocation18 + $0x170] sm:$0xf0]  ;;  %v8249_v5 = vld [vmem:[#allocation18 + $0xf8] sm:$0xf0] }
 0x3be   :  { %4902 = vmatpush.bf16.msrb.mxu3 %v7980_v32  ;;  %v8129_v32 = vld [vmem:[#allocation18 + $0x10] sm:$0xf0]  ;;  %v8308_v40 = vor.u32 %v9075_v28, %v8305_v14  ;;  %v8359_v28 = vld [vmem:[#allocation18 + $0x1c8] sm:$0xf] }
 0x3bf   :  { %v8132_v17 = vor.u32 %v9031_v3, %v8129_v32  ;;  %v8375_v3 = vld [vmem:[#allocation18 + $0x1e8] sm:$0xf] }
 0x3c1   :  { %5390 = vmatpush.bf16.msra.mxu2 %v8132_v17  ;;  %v9094_v17 = vld [vmem:[#allocation18 + $0x1f4] sm:$0xf0] }
 0x3c2   :  { %4903 = vmatpush.bf16.msrb.mxu3 %v7948_v37  ;;  %v8376_v6 = vor.u32 %v9094_v17, %v8375_v3  ;;  %v8167_v3 = vld [vmem:[#allocation18 + $0x48] sm:$0xf]  ;;  %v9042_v17 = vld [vmem:[#allocation18 + $0x54] sm:$0xf0] }
 0x3c4   :  { %v4831_v38 = vpop.f32.mrf.mxu1  ;;  %5440 = vmatpush.bf16.msrb.mxu1 %v8376_v6  ;;  %v8168_v6 = vor.u32 %v9042_v17, %v8167_v3  ;;  %v9103_v3 = vld [vmem:[#allocation21] sm:$0xff] }
 0x3c6   :  { %4904 = vmatpush.bf16.msrb.mxu3 %v7916_v27 }
 0x3ca   :  { %4905 = vmatpush.bf16.msrb.mxu3 %v7884_v41 }
 0x3cc   :  { %v4790_v33 = vpop.f32.mrf.mxu2 }
 0x3cd   :  { %4906 = vmatmul.bf16.vlgmr.msrb.gmra.mxu3 %v9921_v62  ;;  %v4868_v7 = vpop.f32.mrf.mxu0  ;;  %v4687_v62 = vadd.f32 %v9967_v30, %v9952_v8  ;;  %v4791_v50 = vadd.f32 %v4790_v33, %v9969_v19  ;;  %v9092_v19 = vld [vmem:[#allocation18 + $0x1ec] sm:$0xf]  ;;  %v9054_v33 = vld [vmem:[#allocation18 + $0xb4] sm:$0xf0] }
 0x3ce   :  { %5402 = vmatpush.bf16.msra.mxu3 %v8372_v42  ;;  %v4869_v10 = vadd.f32 %v4868_v7, %v3206_v18  ;;  %v9090_v18 = vld [vmem:[#allocation18 + $0x1d4] sm:$0xf0] }
 0x3cf   :  { %v8360_v46 = vor.u32 %v9090_v18, %v8359_v28  ;;  %v9038_v18 = vld [vmem:[#allocation18 + $0x34] sm:$0xf0] }
 0x3d0   :  { %v4699_v57 = vpop.f32.mrf.mxu3 }
 0x3d1   :  { %v4700_v27 = vadd.f32 %v4699_v57, %v4687_v62  ;;  %v8361_v62 = vld [vmem:[#allocation18 + $0x1d8] sm:$0xf0]  ;;  %5441 = vmatpush.bf16.msrb.mxu1 %v8360_v46  ;;  %v9070_v46 = vld [vmem:[#allocation18 + $0x134] sm:$0xf0] }
 0x3d2   :  { %5403 = vmatpush.bf16.msra.mxu3 %v8356_v44  ;;  %v9060_v44 = vld [vmem:[#allocation18 + $0xec] sm:$0xf] }
 0x3d3   :  { %v4914_v21 = vmax.f32 %v4700_v27, 0.0  ;;  %v8252_v7 = vor.u32 %v9060_v44, %v8249_v5  ;;  %v8217_v27 = vld [vmem:[#allocation18 + $0xb8] sm:$0xf0]  ;;  %v8295_v44 = vld [vmem:[#allocation18 + $0x148] sm:$0xf] }
 0x3d4   :  { %v4792_v0 = vpop.f32.mrf.mxu2  ;;  %v9074_v5 = vld [vmem:[#allocation18 + $0x154] sm:$0xf0] }
 0x3d5   :  { %v4870_v37 = vpop.f32.mrf.mxu0  ;;  %v4921_v8 = vpack.c.bf16 %v4914_v21, %v4913_v11  ;;  %5459 = vmatpush.bf16.msrb.mxu2 %v8252_v7  ;;  %v8220_v21 = vor.u32 %v9052_v59, %v8217_v27  ;;  %v9050_v0 = vld [vmem:[#allocation18 + $0x94] sm:$0xf0]  ;;  %v8296_v7 = vor.u32 %v9074_v5, %v8295_v44  ;;  %v8263_v59 = vld [vmem:[#allocation18 + $0x108] sm:$0xf] }
 0x3d6   :  { %5404 = vmatpush.bf16.msra.mxu3 %v8340_v39  ;;  %v8377_v39 = vld [vmem:[#allocation18 + $0x1f8] sm:$0xf0]  ;;  %v9056_v37 = vld [vmem:[#allocation18 + $0xcc] sm:$0xf] }
 0x3d7   :  { %4922 = vst [vmem:[#allocation3 + $0x8] sm:$0xff] %v4921_v8  ;;  %v8380_v47 = vor.u32 %v9092_v19, %v8377_v39  ;;  %v9040_v19 = vld [vmem:[#allocation18 + $0x4c] sm:$0xf]  ;;  %v8169_v39 = vld [vmem:[#allocation18 + $0x58] sm:$0xf0] }
 0x3d8   :  { %v4701_v29 = vpop.f32.mrf.mxu3 }
 0x3d9   :  { %v9082_v29 = vld [vmem:[#allocation18 + $0x194] sm:$0xf0] }
 0x3da   :  { %5405 = vmatpush.bf16.msra.mxu3 %v8324_v12  ;;  %v9058_v12 = vld [vmem:[#allocation18 + $0xd4] sm:$0xf0] }
 0x3db   :  { %v8232_v14 = vor.u32 %v9058_v12, %v8231_v24  ;;  %v8172_v24 = vor.u32 %v9040_v19, %v8169_v39  ;;  %v8297_v12 = vld [vmem:[#allocation18 + $0x158] sm:$0xf0] }
 0x3dc   :  { %v4881_v43 = vpop.f32.mrf.mxu1 }
 0x3dd   :  { %v9991_v23 = vadd.f32 %v4881_v43, %v4869_v10  ;;  %v9088_v10 = vld [vmem:[#allocation18 + $0x1cc] sm:$0xf]  ;;  %v8215_v43 = vld [vmem:[#allocation18 + $0xa8] sm:$0xf] }
 0x3de   :  { %5406 = vmatpush.bf16.msra.mxu3 %v8308_v40  ;;  %v9028_v52 = vld [vmem:[#allocation3 + $0x4] sm:$0xf0]  ;;  %v8113_v16 = vld [vmem:[#allocation3 + $0x8] sm:$0xf0]  ;;  %v8364_v25 = vor.u32 %v9088_v10, %v8361_v62  ;;  %v8216_v57 = vor.u32 %v9054_v33, %v8215_v43  ;;  %v9068_v43 = vld [vmem:[#allocation18 + $0x12c] sm:$0xf] }
 0x3df   :  { %v9993_v63 = vor.u32 %v9028_v52, %v8111_v45  ;;  %v9995_v26 = vor.u32 %v9027_v1, %v8113_v16  ;;  %v8233_v40 = vld [vmem:[#allocation18 + $0xd8] sm:$0xf0]  ;;  %v8200_v45 = vor.u32 %v9050_v0, %v8199_v48  ;;  %v9048_v1 = vld [vmem:[#allocation18 + $0x8c] sm:$0xf] }
 0x3e0   :  { %v8236_v4 = vor.u32 %v9056_v37, %v8233_v40  ;;  %v8201_v16 = vld [vmem:[#allocation18 + $0x98] sm:$0xf0]  ;;  %v8279_v37 = vld [vmem:[#allocation18 + $0x128] sm:$0xf] }
 0x3e1   :  { %5353 = vmatmul.bf16.vlgmr.msra.gmra.mxu0 %v9993_v63  ;;  %5372 = vmatmul.bf16.vlgmr.msra.gmra.mxu1 %v9995_v26  ;;  %v8153_v10 = vld [vmem:[#allocation18 + $0x38] sm:$0xf0]  ;;  %v8280_v62 = vor.u32 %v9070_v46, %v8279_v37 }
 0x3e2   :  { %5407 = vmatpush.bf16.msra.mxu3 %v8292_v36  ;;  %5391 = vmatmul.bf16.vlgmr.msra.gmra.mxu2 %v9993_v63  ;;  %v8343_v36 = vld [vmem:[#allocation18 + $0x1a8] sm:$0xf]  ;;  %v8281_v33 = vld [vmem:[#allocation18 + $0x138] sm:$0xf0] }
 0x3e3   :  { %5460 = vmatpush.bf16.msrb.mxu2 %v8236_v4  ;;  %v8344_v11 = vor.u32 %v9086_v61, %v8343_v36  ;;  %v9036_v4 = vld [vmem:[#allocation18 + $0x2c] sm:$0xf]  ;;  %v8284_v36 = vor.u32 %v9068_v43, %v8281_v33  ;;  %v9034_v61 = vld [vmem:[#allocation18 + $0x14] sm:$0xf0] }
 0x3e4   :  { %v4883_v30 = vpop.f32.mrf.mxu1 }
 0x3e5   :  { %5442 = vmatpush.bf16.msrb.mxu1 %v8344_v11  ;;  %v9066_v11 = vld [vmem:[#allocation18 + $0x114] sm:$0xf0] }
 0x3e6   :  { %5408 = vmatpush.bf16.msra.mxu3 %v8276_v9  ;;  %v9084_v9 = vld [vmem:[#allocation18 + $0x1ac] sm:$0xf] }
 0x3e7   :  { %v8348_v30 = vor.u32 %v9084_v9, %v8345_v51  ;;  %5461 = vmatpush.bf16.msrb.mxu2 %v8220_v21  ;;  %v9032_v21 = vld [vmem:[#allocation18 + $0xc] sm:$0xf]  ;;  %v8137_v9 = vld [vmem:[#allocation18 + $0x18] sm:$0xf0]  ;;  %v8264_v51 = vor.u32 %v9066_v11, %v8263_v59 }
 0x3e8   :  { %v8140_v48 = vor.u32 %v9032_v21, %v8137_v9 }
 0x3ea   :  { %5409 = vmatpush.bf16.msra.mxu3 %v8260_v55  ;;  %v8327_v55 = vld [vmem:[#allocation18 + $0x188] sm:$0xf] }
 0x3eb   :  { %v8328_v52 = vor.u32 %v9082_v29, %v8327_v55 }
 0x3ec   :  { %v4842_v34 = vpop.f32.mrf.mxu2 }
 0x3ed   :  { %5410 = vmatmul.bf16.vlgmr.msra.gmra.mxu3 %v9995_v26  ;;  %v10002_v38 = vadd.f32 %v4842_v34, %v9978_v15  ;;  %v9062_v15 = vld [vmem:[#allocation18 + $0xf4] sm:$0xf0]  ;;  %v9080_v34 = vld [vmem:[#allocation18 + $0x18c] sm:$0xf]  ;;  %5443 = vmatpush.bf16.msrb.mxu1 %v8328_v52 }
 0x3ee   :  { %v8248_v32 = vor.u32 %v9062_v15, %v8247_v2  ;;  %5478 = vmatpush.bf16.msrb.mxu3 %v8380_v47  ;;  %v9076_v2 = vld [vmem:[#allocation18 + $0x16c] sm:$0xf]  ;;  %v8313_v15 = vld [vmem:[#allocation18 + $0x178] sm:$0xf0] }
 0x3ef   :  { %v9072_v47 = vld [vmem:[#allocation18 + $0x14c] sm:$0xf] }
 0x3f0   :  { %v4751_v35 = vpop.f32.mrf.mxu3  ;;  %5421 = vmatpush.bf16.msrb.mxu0 %v8248_v32  ;;  %v8316_v32 = vor.u32 %v9076_v2, %v8313_v15  ;;  %v8300_v28 = vor.u32 %v9072_v47, %v8297_v12 }
 0x3f1   :  { %v4752_v20 = vadd.f32 %v4751_v35, %v9981_v22  ;;  %v8204_v35 = vor.u32 %v9048_v1, %v8201_v16  ;;  %v9110_v1 = vld [vmem:[#allocation21 + $0x38] sm:$0xff] }
 0x3f2   :  { %5479 = vmatpush.bf16.msrb.mxu3 %v8364_v25  ;;  %v8156_v25 = vor.u32 %v9036_v4, %v8153_v10 }
 0x3f3   :  { %v4915_v54 = vmax.f32 %v4752_v20, 0.0  ;;  %5462 = vmatpush.bf16.msrb.mxu2 %v8204_v35  ;;  %v9046_v20 = vld [vmem:[#allocation18 + $0x74] sm:$0xf0] }
 0x3f4   :  { %v4844_v41 = vpop.f32.mrf.mxu2  ;;  %5422 = vmatpush.bf16.msrb.mxu0 %v8232_v14  ;;  %v8151_v14 = vld [vmem:[#allocation18 + $0x28] sm:$0xf] }
 0x3f5   :  { %v8329_v41 = vld [vmem:[#allocation18 + $0x198] sm:$0xf0]  ;;  %v8152_v40 = vor.u32 %v9038_v18, %v8151_v14 }
 0x3f6   :  { %5480 = vmatpush.bf16.msrb.mxu3 %v8348_v30  ;;  %v8265_v30 = vld [vmem:[#allocation18 + $0x118] sm:$0xf0] }
 0x3f8   :  { %v4753_v56 = vpop.f32.mrf.mxu3  ;;  %5423 = vmatpush.bf16.msrb.mxu0 %v8216_v57  ;;  %v8135_v57 = vld [vmem:[#allocation18 + $0x8] sm:$0xf] }
 0x3f9   :  { %v8332_v56 = vor.u32 %v9080_v34, %v8329_v41  ;;  %v8136_v27 = vor.u32 %v9034_v61, %v8135_v57  ;;  %v9109_v41 = vld [vmem:[#allocation21 + $0x30] sm:$0xff] }
 0x3fb   :  { %5481 = vmatpush.bf16.msrb.mxu3 %v8332_v56 }
 0x3fc   :  { %5424 = vmatpush.bf16.msrb.mxu0 %v8200_v45 }
 0x3ff   :  { %5482 = vmatpush.bf16.msrb.mxu3 %v8316_v32 }
 0x403   :  { %5483 = vmatpush.bf16.msrb.mxu3 %v8300_v28 }
 0x407   :  { %5484 = vmatpush.bf16.msrb.mxu3 %v8284_v36 }
 0x40c   :  { %v10004_v13 = vpop.f32.mrf.mxu2 }
 0x40d   :  { %v4895_v0 = vadd.f32 %v10004_v13, %v9991_v23  ;;  %v9108_v23 = vld [vmem:[#allocation21 + $0x28] sm:$0xff] }
 0x410   :  { %v4803_v53 = vpop.f32.mrf.mxu3 }
 0x411   :  { %v4804_v42 = vadd.f32 %v4803_v53, %v4791_v50  ;;  %v8183_v50 = vld [vmem:[#allocation18 + $0x68] sm:$0xf] }
 0x412   :  { %v8311_v53 = vld [vmem:[#allocation18 + $0x168] sm:$0xf] }
 0x413   :  { %v4916_v60 = vmax.f32 %v4804_v42, 0.0  ;;  %v8184_v42 = vor.u32 %v9046_v20, %v8183_v50 }
 0x414   :  { %v4896_v49 = vpop.f32.mrf.mxu2 }
 0x415   :  { %v4923_v31 = vpack.c.bf16 %v4916_v60, %v4915_v54  ;;  %v9078_v54 = vld [vmem:[#allocation18 + $0x174] sm:$0xf0]  ;;  %v9044_v60 = vld [vmem:[#allocation18 + $0x6c] sm:$0xf]  ;;  %5425 = vmatpush.bf16.msrb.mxu0 %v8184_v42 }
 0x416   :  { %v8312_v49 = vor.u32 %v9078_v54, %v8311_v53  ;;  %v9106_v54 = vld [vmem:[#allocation21 + $0x18] sm:$0xff] }
 0x417   :  { %4924 = vst [vmem:[#allocation3 + $0x10] sm:$0xff] %v4923_v31  ;;  %v8185_v31 = vld [vmem:[#allocation18 + $0x78] sm:$0xf0] }
 0x418   :  { %v4805_v58 = vpop.f32.mrf.mxu3  ;;  %5444 = vmatpush.bf16.msrb.mxu1 %v8312_v49  ;;  %v10014_v49 = vld [vmem:[#allocation19] sm:$0xf] }
 0x419   :  { %v8188_v58 = vor.u32 %v9044_v60, %v8185_v31  ;;  %5426 = vmatpush.bf16.msrb.mxu0 %v8168_v6  ;;  %v9105_v60 = vld [vmem:[#allocation21 + $0x10] sm:$0xff]  ;;  %v9104_v31 = vld [vmem:[#allocation21 + $0x8] sm:$0xff]  ;;  %v4997_v15 = vperm.slane %v10014_v49, 0  ;;  %v4998_v5 = vperm.slane %v10014_v49, 1 }
 0x41b   :  { %5463 = vmatpush.bf16.msrb.mxu2 %v8188_v58 }
 0x41c   :  { %5445 = vmatpush.bf16.msrb.mxu1 %v8296_v7 }
 0x41d   :  { %5427 = vmatpush.bf16.msrb.mxu0 %v8152_v40 }
 0x41e   :  { %v8119_v13 = vld [vmem:[#allocation3 + $0x10] sm:$0xf]  ;;  %v9029_v50 = vld [vmem:[#allocation3 + $0x14] sm:$0xf] }
 0x41f   :  { %5464 = vmatpush.bf16.msrb.mxu2 %v8172_v24 }
 0x420   :  { %5446 = vmatpush.bf16.msrb.mxu1 %v8280_v62 }
 0x421   :  { %5428 = vmatpush.bf16.msrb.mxu0 %v8136_v27 }
 0x423   :  { %5465 = vmatpush.bf16.msrb.mxu2 %v8156_v25 }
 0x424   :  { %5447 = vmatpush.bf16.msrb.mxu1 %v8264_v51 }
 0x425   :  { %5677 = vmatpush.bf16.msra.mxu0 %v9110_v1  ;;  %v4999_v1 = vperm.slane %v10014_v49, 2 }
 0x427   :  { %5466 = vmatpush.bf16.msrb.mxu2 %v8140_v48 }
 0x429   :  { %5678 = vmatpush.bf16.msra.mxu0 %v9109_v41 }
 0x42d   :  { %5679 = vmatpush.bf16.msra.mxu0 %v9108_v23 }
 0x430   :  { %v10008_v22 = vpop.f32.mrf.mxu3 }
 0x431   :  { %v4856_v55 = vadd.f32 %v10008_v22, %v10002_v38  ;;  %v9107_v38 = vld [vmem:[#allocation21 + $0x20] sm:$0xff] }
 0x432   :  { %5680 = vmatpush.bf16.msra.mxu0 %v9107_v38  ;;  %v5000_v38 = vperm.slane %v10014_v49, 3 }
 0x433   :  { %v4917_v16 = vmax.f32 %v4856_v55, 0.0 }
 0x436   :  { %5681 = vmatpush.bf16.msra.mxu0 %v9106_v54 }
 0x438   :  { %v4857_v8 = vpop.f32.mrf.mxu3 }
 0x439   :  { %v9064_v8 = vld [vmem:[#allocation18 + $0x10c] sm:$0xf] }
 0x43a   :  { %v8268_v29 = vor.u32 %v9064_v8, %v8265_v30  ;;  %5682 = vmatpush.bf16.msra.mxu0 %v9105_v60 }
 0x43c   :  { %5485 = vmatpush.bf16.msrb.mxu3 %v8268_v29 }
 0x43e   :  { %5683 = vmatpush.bf16.msra.mxu0 %v9104_v31 }
 0x442   :  { %5684 = vmatpush.bf16.msra.mxu0 %v9103_v3 }
 0x450   :  { %v4907_v45 = vpop.f32.mrf.mxu3 }
 0x451   :  { %v4908_v52 = vadd.f32 %v4907_v45, %v4895_v0 }
 0x453   :  { %v4918_v34 = vmax.f32 %v4908_v52, 0.0 }
 0x455   :  { %v4925_v35 = vpack.c.bf16 %v4918_v34, %v4917_v16 }
 0x457   :  { %4926 = vst [vmem:[#allocation3 + $0x18] sm:$0xff] %v4925_v35 }
 0x458   :  { %v4909_v56 = vpop.f32.mrf.mxu3 }
 0x45e   :  { %v9030_v22 = vld [vmem:[#allocation3 + $0x14] sm:$0xf0]  ;;  %v8121_v20 = vld [vmem:[#allocation3 + $0x18] sm:$0xf0]  ;;  %v5354_v58 = vpop.f32.mrf.mxu0  ;;  %v5373_v2 = vpop.f32.mrf.mxu1 }
 0x45f   :  { %v8120_v53 = vor.u32 %v9030_v22, %v8119_v13  ;;  %v8124_v42 = vor.u32 %v9029_v50, %v8121_v20  ;;  %v5355_v32 = vadd.f32 %v5354_v58, %v4997_v15 }
 0x461   :  { %5358 = vmatmul.bf16.gmra.mxu0 %v8120_v53  ;;  %5377 = vmatmul.bf16.gmra.mxu1 %v8124_v42  ;;  %v5374_v7 = vadd.f32 %v5373_v2, %v5355_v32 }
 0x462   :  { %5396 = vmatmul.bf16.gmra.mxu2 %v8120_v53  ;;  %5415 = vmatmul.bf16.gmra.mxu3 %v8124_v42 }
 0x463   :  { %v5497_v12 = vmax.f32 %v5374_v7, 0.0 }
 0x465   :  { %v5392_v17 = vpop.f32.mrf.mxu2 }
 0x466   :  { %v5356_v6 = vpop.f32.mrf.mxu0  ;;  %v5375_v39 = vpop.f32.mrf.mxu1  ;;  %v5393_v24 = vadd.f32 %v5392_v17, %v4998_v5 }
 0x467   :  { %v5357_v19 = vadd.f32 %v5356_v6, %v4997_v15 }
 0x469   :  { %v5376_v47 = vadd.f32 %v5375_v39, %v5357_v19 }
 0x46b   :  { %v5501_v28 = vmax.f32 %v5376_v47, 0.0 }
 0x46d   :  { %v9114_v14 = vpack.c.bf16 %v5501_v28, %v5497_v12  ;;  %v5394_v18 = vpop.f32.mrf.mxu2 }
 0x46e   :  { %v5395_v40 = vadd.f32 %v5394_v18, %v4998_v5 }
 0x46f   :  { %9115 = vst [vmem:[#allocation4 + $0x30] sm:$0xff] %v9114_v14  }
 0x470   :  { %v5411_v44 = vpop.f32.mrf.mxu3 }
 0x471   :  { %5429 = vmatmul.bf16.vlgmr.msrb.gmra.mxu0 %v9993_v63  ;;  %5448 = vmatmul.bf16.vlgmr.msrb.gmra.mxu1 %v9995_v26  ;;  %v5412_v37 = vadd.f32 %v5411_v44, %v5393_v24 }
 0x472   :  { %5467 = vmatmul.bf16.vlgmr.msrb.gmra.mxu2 %v9993_v63  ;;  %5486 = vmatmul.bf16.vlgmr.msrb.gmra.mxu3 %v9995_v26 }
 0x473   :  { %v5498_v10 = vmax.f32 %v5412_v37, 0.0 }
 0x476   :  { %v9095_v26 = vld [vmem:[#allocation4 + $0x30] sm:$0xff] }
 0x478   :  { %v5413_v46 = vpop.f32.mrf.mxu3 }
 0x479   :  { %v5414_v4 = vadd.f32 %v5413_v46, %v5395_v40 }
 0x47b   :  { %v5502_v62 = vmax.f32 %v5414_v4, 0.0 }
 0x47d   :  { %v9124_v63 = vpack.c.bf16 %v5502_v62, %v5498_v10  ;;  %v10024_v62 = vld [vmem:[#allocation22] ss:$0 sm:$0xff] }
 0x47f   :  { %9152 = vst [vmem:[#allocation4 + $0x18] sm:$0xff] %v9124_v63  }
 0x481   :  { %5434 = vmatmul.bf16.gmra.mxu0 %v8120_v53  ;;  %5453 = vmatmul.bf16.gmra.mxu1 %v8124_v42 }
 0x482   :  { %5472 = vmatmul.bf16.gmra.mxu2 %v8120_v53  ;;  %5491 = vmatmul.bf16.gmra.mxu3 %v8124_v42 }
 0x486   :  { %v9097_v28 = vld [vmem:[#allocation4 + $0x18] sm:$0xff] }
 0x491   :  { %5685 = vmatmul.bf16.vlgmr.msra.gmra.mxu0 %v9095_v26 }
 0x4de   :  { %v5359_v25 = vpop.f32.mrf.mxu0  ;;  %v5378_v43 = vpop.f32.mrf.mxu1 }
 0x4df   :  { %v5360_v33 = vadd.f32 %v5359_v25, %v4997_v15 }
 0x4e1   :  { %v5379_v27 = vadd.f32 %v5378_v43, %v5360_v33 }
 0x4e3   :  { %v5505_v51 = vmax.f32 %v5379_v27, 0.0 }
 0x4e5   :  { %v5397_v36 = vpop.f32.mrf.mxu2  ;;  %v5416_v57 = vpop.f32.mrf.mxu3 }
 0x4e6   :  { %v5361_v61 = vpop.f32.mrf.mxu0  ;;  %v5380_v59 = vpop.f32.mrf.mxu1  ;;  %v5398_v9 = vadd.f32 %v5397_v36, %v4998_v5 }
 0x4e7   :  { %v5362_v11 = vadd.f32 %v5361_v61, %v4997_v15 }
 0x4e8   :  { %v5417_v55 = vadd.f32 %v5416_v57, %v5398_v9 }
 0x4e9   :  { %v5381_v21 = vadd.f32 %v5380_v59, %v5362_v11 }
 0x4ea   :  { %v5506_v34 = vmax.f32 %v5417_v55, 0.0 }
 0x4eb   :  { %v5509_v48 = vmax.f32 %v5381_v21, 0.0 }
 0x4ed   :  { %v9119_v8 = vpack.c.bf16 %v5509_v48, %v5505_v51  ;;  %v5399_v30 = vpop.f32.mrf.mxu2  ;;  %v5418_v0 = vpop.f32.mrf.mxu3 }
 0x4ee   :  { %v5400_v29 = vadd.f32 %v5399_v30, %v4998_v5  ;;  %v5430_v45 = vpop.f32.mrf.mxu0  ;;  %v5449_v52 = vpop.f32.mrf.mxu1 }
 0x4ef   :  { %9151 = vst [vmem:[#allocation4] sm:$0xff] %v9119_v8   ;;  %v5431_v41 = vadd.f32 %v5430_v45, %v4999_v1 }
 0x4f0   :  { %v5419_v16 = vadd.f32 %v5418_v0, %v5400_v29 }
 0x4f1   :  { %v5450_v53 = vadd.f32 %v5449_v52, %v5431_v41 }
 0x4f2   :  { %v5510_v35 = vmax.f32 %v5419_v16, 0.0 }
 0x4f3   :  { %v5499_v31 = vmax.f32 %v5450_v53, 0.0 }
 0x4f4   :  { %v9129_v56 = vpack.c.bf16 %v5510_v35, %v5506_v34 }
 0x4f5   :  { %v5468_v23 = vpop.f32.mrf.mxu2  ;;  %v5487_v13 = vpop.f32.mrf.mxu3 }
 0x4f6   :  { %9153 = vst [vmem:[#allocation4 + $0x10] sm:$0xff] %v9129_v56   ;;  %v5432_v22 = vpop.f32.mrf.mxu0  ;;  %v5451_v50 = vpop.f32.mrf.mxu1  ;;  %v9096_v20 = vld [vmem:[#allocation4] sm:$0xff]  ;;  %v5469_v60 = vadd.f32 %v5468_v23, %v5000_v38 }
 0x4f7   :  { %v5433_v42 = vadd.f32 %v5432_v22, %v4999_v1  ;;  %5690 = vmatmul.bf16.gmra.mxu0 %v9096_v20 }
 0x4f8   :  { %v5488_v32 = vadd.f32 %v5487_v13, %v5469_v60 }
 0x4f9   :  { %v5452_v54 = vadd.f32 %v5451_v50, %v5433_v42 }
 0x4fa   :  { %v5500_v49 = vmax.f32 %v5488_v32, 0.0 }
 0x4fb   :  { %v5503_v58 = vmax.f32 %v5452_v54, 0.0 }
 0x4fd   :  { %v9134_v2 = vpack.c.bf16 %v5503_v58, %v5499_v31  ;;  %v5470_v15 = vpop.f32.mrf.mxu2  ;;  %v5489_v3 = vpop.f32.mrf.mxu3  ;;  %v9098_v51 = vld [vmem:[#allocation4 + $0x10] sm:$0xff] }
 0x4fe   :  { %v5471_v17 = vadd.f32 %v5470_v15, %v5000_v38  ;;  %v5435_v44 = vpop.f32.mrf.mxu0  ;;  %v5454_v5 = vpop.f32.mrf.mxu1 }
 0x4ff   :  { %9154 = vst [vmem:[#allocation4 + $0x8] sm:$0xff] %v9134_v2   ;;  %v5436_v19 = vadd.f32 %v5435_v44, %v4999_v1 }
 0x500   :  { %v5490_v6 = vadd.f32 %v5489_v3, %v5471_v17 }
 0x501   :  { %v5455_v14 = vadd.f32 %v5454_v5, %v5436_v19 }
 0x502   :  { %v5504_v7 = vmax.f32 %v5490_v6, 0.0 }
 0x503   :  { %v5507_v4 = vmax.f32 %v5455_v14, 0.0 }
 0x504   :  { %v9144_v39 = vpack.c.bf16 %v5504_v7, %v5500_v49 }
 0x505   :  { %v5473_v47 = vpop.f32.mrf.mxu2  ;;  %v5492_v24 = vpop.f32.mrf.mxu3 }
 0x506   :  { %9156 = vst [vmem:[#allocation4 + $0x28] sm:$0xff] %v9144_v39   ;;  %v5437_v12 = vpop.f32.mrf.mxu0  ;;  %v5456_v37 = vpop.f32.mrf.mxu1  ;;  %v5474_v46 = vadd.f32 %v5473_v47, %v5000_v38  ;;  %v9099_v30 = vld [vmem:[#allocation4 + $0x8] sm:$0xff] }
 0x507   :  { %v5438_v18 = vadd.f32 %v5437_v12, %v4999_v1  ;;  %5695 = vmatmul.bf16.gmra.mxu0 %v9097_v28 }
 0x508   :  { %v5493_v25 = vadd.f32 %v5492_v24, %v5474_v46 }
 0x509   :  { %v5457_v40 = vadd.f32 %v5456_v37, %v5438_v18 }
 0x50a   :  { %v5508_v27 = vmax.f32 %v5493_v25, 0.0 }
 0x50b   :  { %v5511_v10 = vmax.f32 %v5457_v40, 0.0 }
 0x50d   :  { %v9139_v63 = vpack.c.bf16 %v5511_v10, %v5507_v4  ;;  %v5475_v26 = vpop.f32.mrf.mxu2  ;;  %v5494_v36 = vpop.f32.mrf.mxu3  ;;  %v9101_v55 = vld [vmem:[#allocation4 + $0x28] sm:$0xff] }
 0x50e   :  { %v5476_v43 = vadd.f32 %v5475_v26, %v5000_v38  ;;  %v5686_v33 = vpop.f32.mrf.mxu0 }
 0x50f   :  { %9155 = vst [vmem:[#allocation4 + $0x20] sm:$0xff] %v9139_v63   ;;  %v5687_v57 = vadd.f32 %v10024_v62, %v5686_v33 }
 0x510   :  { %v5495_v61 = vadd.f32 %v5494_v36, %v5476_v43 }
 0x511   :  { %v5726_v59 = vmax.f32 %v5687_v57, 0.0 }
 0x512   :  { %v5512_v11 = vmax.f32 %v5495_v61, 0.0 }
 0x513   :  { %5742 = vst [vmem:[%s10104_s14] sm:$0xff] %v5726_v59 }
 0x514   :  { %v9149_v21 = vpack.c.bf16 %v5512_v11, %v5508_v27 }
 0x516   :  { %9157 = vst [vmem:[#allocation4 + $0x38] sm:$0xff] %v9149_v21   ;;  %v5688_v9 = vpop.f32.mrf.mxu0  ;;  %v9100_v0 = vld [vmem:[#allocation4 + $0x20] sm:$0xff] }
 0x517   :  { %v5689_v48 = vadd.f32 %v10024_v62, %v5688_v9  ;;  %5700 = vmatmul.bf16.gmra.mxu0 %v9098_v51 }
 0x519   :  { %v5727_v8 = vmax.f32 %v5689_v48, 0.0 }
 0x51b   :  { %5743 = vst [vmem:[%s10104_s14 + $0x8] sm:$0xff] %v5727_v8 }
 0x51d   :  { %v9102_v29 = vld [vmem:[#allocation4 + $0x38] sm:$0xff] }
 0x527   :  { %5705 = vmatmul.bf16.gmra.mxu0 %v9099_v30 }
 0x537   :  { %5710 = vmatmul.bf16.gmra.mxu0 %v9100_v0 }
 0x547   :  { %5715 = vmatmul.bf16.gmra.mxu0 %v9101_v55 }
 0x557   :  { %5720 = vmatmul.bf16.gmra.mxu0 %v9102_v29 }
 0x574   :  { %v5691_v45 = vpop.f32.mrf.mxu0 }
 0x575   :  { %v5692_v52 = vadd.f32 %v10024_v62, %v5691_v45 }
 0x577   :  { %v5728_v1 = vmax.f32 %v5692_v52, 0.0 }
 0x579   :  { %5744 = vst [vmem:[%s10104_s14 + $0x10] sm:$0xff] %v5728_v1 }
 0x57c   :  { %v5693_v16 = vpop.f32.mrf.mxu0 }
 0x57d   :  { %v5694_v34 = vadd.f32 %v10024_v62, %v5693_v16 }
 0x57f   :  { %v5729_v35 = vmax.f32 %v5694_v34, 0.0 }
 0x581   :  { %5745 = vst [vmem:[%s10104_s14 + $0x18] sm:$0xff] %v5729_v35 }
 0x584   :  { %v5696_v41 = vpop.f32.mrf.mxu0 }
 0x585   :  { %v5697_v56 = vadd.f32 %v10024_v62, %v5696_v41 }
 0x587   :  { %v5730_v23 = vmax.f32 %v5697_v56, 0.0 }
 0x589   :  { %5746 = vst [vmem:[%s10104_s14 + $0x20] sm:$0xff] %v5730_v23 }
 0x58c   :  { %v5698_v13 = vpop.f32.mrf.mxu0 }
 0x58d   :  { %v5699_v38 = vadd.f32 %v10024_v62, %v5698_v13 }
 0x58f   :  { %v5731_v22 = vmax.f32 %v5699_v38, 0.0 }
 0x591   :  { %5747 = vst [vmem:[%s10104_s14 + $0x28] sm:$0xff] %v5731_v22 }
 0x594   :  { %v5701_v50 = vpop.f32.mrf.mxu0 }
 0x595   :  { %v5702_v20 = vadd.f32 %v10024_v62, %v5701_v50 }
 0x597   :  { %v5732_v53 = vmax.f32 %v5702_v20, 0.0 }
 0x599   :  { %5748 = vst [vmem:[%s10104_s14 + $0x30] sm:$0xff] %v5732_v53 }
 0x59c   :  { %v5703_v42 = vpop.f32.mrf.mxu0 }
 0x59d   :  { %v5704_v54 = vadd.f32 %v10024_v62, %v5703_v42 }
 0x59f   :  { %v5733_v60 = vmax.f32 %v5704_v54, 0.0 }
 0x5a1   :  { %5749 = vst [vmem:[%s10104_s14 + $0x38] sm:$0xff] %v5733_v60 }
 0x5a4   :  { %v5706_v31 = vpop.f32.mrf.mxu0 }
 0x5a5   :  { %v5707_v58 = vadd.f32 %v10024_v62, %v5706_v31 }
 0x5a7   :  { %v5734_v2 = vmax.f32 %v5707_v58, 0.0 }
 0x5a9   :  { %5750 = vst [vmem:[%s10104_s14 + $0x40] sm:$0xff] %v5734_v2 }
 0x5ac   :  { %v5708_v15 = vpop.f32.mrf.mxu0 }
 0x5ad   :  { %v5709_v3 = vadd.f32 %v10024_v62, %v5708_v15 }
 0x5af   :  { %v5735_v32 = vmax.f32 %v5709_v3, 0.0 }
 0x5b1   :  { %5751 = vst [vmem:[%s10104_s14 + $0x48] sm:$0xff] %v5735_v32 }
 0x5b4   :  { %v5711_v17 = vpop.f32.mrf.mxu0 }
 0x5b5   :  { %v5712_v44 = vadd.f32 %v10024_v62, %v5711_v17 }
 0x5b7   :  { %v5736_v5 = vmax.f32 %v5712_v44, 0.0 }
 0x5b9   :  { %5752 = vst [vmem:[%s10104_s14 + $0x50] sm:$0xff] %v5736_v5 }
 0x5bc   :  { %v5713_v6 = vpop.f32.mrf.mxu0 }
 0x5bd   :  { %v5714_v49 = vadd.f32 %v10024_v62, %v5713_v6 }
 0x5bf   :  { %v5737_v7 = vmax.f32 %v5714_v49, 0.0 }
 0x5c1   :  { %5753 = vst [vmem:[%s10104_s14 + $0x58] sm:$0xff] %v5737_v7 }
 0x5c4   :  { %v5716_v19 = vpop.f32.mrf.mxu0 }
 0x5c5   :  { %v5717_v39 = vadd.f32 %v10024_v62, %v5716_v19 }
 0x5c7   :  { %v5738_v47 = vmax.f32 %v5717_v39, 0.0 }
 0x5c9   :  { %5754 = vst [vmem:[%s10104_s14 + $0x60] sm:$0xff] %v5738_v47 }
 0x5cc   :  { %v5718_v24 = vpop.f32.mrf.mxu0 }
 0x5cd   :  { %v5719_v12 = vadd.f32 %v10024_v62, %v5718_v24 }
 0x5cf   :  { %v5739_v28 = vmax.f32 %v5719_v12, 0.0 }
 0x5d1   :  { %5755 = vst [vmem:[%s10104_s14 + $0x68] sm:$0xff] %v5739_v28 }
 0x5d4   :  { %v5721_v14 = vpop.f32.mrf.mxu0 }
 0x5d5   :  { %v5722_v18 = vadd.f32 %v10024_v62, %v5721_v14 }
 0x5d7   :  { %v5740_v37 = vmax.f32 %v5722_v18, 0.0 }
 0x5d9   :  { %5756 = vst [vmem:[%s10104_s14 + $0x70] sm:$0xff] %v5740_v37 }
 0x5dc   :  { %v5723_v40 = vpop.f32.mrf.mxu0 }
 0x5dd   :  { %v5724_v46 = vadd.f32 %v10024_v62, %v5723_v40 }
 0x5df   :  { %v5741_v4 = vmax.f32 %v5724_v46, 0.0 }
 0x5e1   :  { %5757 = vst [vmem:[%s10104_s14 + $0x78] sm:$0xff] %v5741_v4 }
 0x5e2   :  { %5766 = vsyncpa [#allocation6], 1 }
 0x5e3   :  { %5767 = vsyncpa [#allocation8], 1 }
 0x5e4   :  { %5768 = vsyncpa [#allocation11], 1 }
 0x5e5   :  { %5769 = vsyncpa [#allocation14], 1 }
 0x5e6   :  { %5770 = vsyncpa [#allocation17], 1 }
 0x5e7   :  { %5771 = vsyncpa [#allocation20], 1 }
 0x5e8   :  { %5772 = vsyncpa [#allocation23], 1 }

</bundles_post_ra>
